<compile_context>
chip_gen: v5e
topology: v5e:2x2
jax: 0.10.0
libtpu: 0.0.40
codegen_flags: <defaults>
</compile_context>

<pallas_src>
import math

import jax
import jax.numpy as jnp
from jax.experimental import pallas as pl
from jax.experimental.pallas import tpu as pltpu


# --------------------------------------------------------------------------
# Fused text-encoder kernel (layer-streamed, batch resident in VMEM)
# --------------------------------------------------------------------------
def _make_encoder_kernel(n_heads, d_model, d_ff, batch_tile, seq_len, normalize, eps=1e-5):
    D, Dff, BT, T = d_model, d_ff, batch_tile, seq_len
    d_head = D // n_heads
    scale = 1.0 / math.sqrt(d_head)
    bf16 = jnp.bfloat16

    def layer_norm(v, g, b):
        mu = jnp.mean(v, axis=-1, keepdims=True)
        var = jnp.mean(jnp.square(v - mu), axis=-1, keepdims=True)
        return (v - mu) * jax.lax.rsqrt(var + eps) * g + b

    def kernel(eot_ref,                         # (B,) int32 scalar prefetch (SMEM)
               x_ref,                           # (BT, T, D) f32  embedded tokens
               mask_ref,                        # (T, T)  f32  causal mask (grid invariant)
               wqkv_ref,                        # (D, 3D) bf16 -- per-layer streamed slabs
               wo_ref,                          # (D, D)  bf16
               fc1_w_ref,                       # (D, Dff) bf16
               fc2_w_ref,                       # (Dff, D) bf16
               small_ref,                       # (8, Dff) f32  packed LN params + biases
               lnf_g_ref, lnf_b_ref,            # (1, D) f32   (grid invariant)
               proj_ref,                        # (D, Dout) bf16 (grid invariant)
               o_ref,                           # (BT, Dout) f32
               h_ref):                          # VMEM scratch (BT, T, D) f32 resident acts
        bt = pl.program_id(0)
        l = pl.program_id(1)
        n_layers = pl.num_programs(1)

        @pl.when(l == 0)
        def _():
            h_ref[...] = x_ref[...].astype(jnp.float32)

        x = h_ref[...].reshape(BT * T, D)                      # flattened (BT*T, D) f32

        # ---- unpack the small per-layer parameter slab -------------------------
        small = small_ref[...]
        ln1_g, ln1_b = small[0:1, :D], small[1:2, :D]
        ln2_g, ln2_b = small[2:3, :D], small[3:4, :D]
        bo,    fc2_b = small[4:5, :D], small[5:6, :D]
        fc1_b        = small[6:7, :]
        bqkv         = small[7:8, :3 * D]

        # ---- attention branch ---------------------------------------------------
        xn = layer_norm(x, ln1_g, ln1_b)
        qkv = jnp.dot(xn.astype(bf16), wqkv_ref[...],
                      preferred_element_type=jnp.float32) + bqkv     # (BT*T, 3D) f32
        q = qkv[:, 0:D].reshape(BT, T, D)
        k = qkv[:, D:2 * D].reshape(BT, T, D)
        v = qkv[:, 2 * D:3 * D].reshape(BT, T, D)
        mask = mask_ref[...][None, :, :]                             # (1, T, T)

        heads = []
        for h in range(n_heads):                 # static unroll; 128-lane-aligned head slices
            sl = slice(h * d_head, (h + 1) * d_head)
            qh = q[:, :, sl].astype(bf16)
            kh = k[:, :, sl].astype(bf16)
            vh = v[:, :, sl].astype(bf16)
            s = jnp.einsum('bqd,bkd->bqk', qh, kh,
                           preferred_element_type=jnp.float32)
            s = s * scale + mask
            s = s - jnp.max(s, axis=-1, keepdims=True)
            p = jnp.exp(s)
            p = p * pl.reciprocal(jnp.sum(p, axis=-1, keepdims=True), approx=True)
            heads.append(jnp.einsum('bqk,bkd->bqd', p.astype(bf16), vh,
                                    preferred_element_type=jnp.float32))
        # concat heads -> single (BT*T, D) @ (D, D) output projection
        attn = jnp.concatenate(heads, axis=-1).reshape(BT * T, D)
        x = x + jnp.dot(attn.astype(bf16), wo_ref[...],
                        preferred_element_type=jnp.float32) + bo

        # ---- MLP branch (QuickGELU) ---------------------------------------------
        xn2 = layer_norm(x, ln2_g, ln2_b)
        hmid = jnp.dot(xn2.astype(bf16), fc1_w_ref[...],
                       preferred_element_type=jnp.float32) + fc1_b
        hmid = hmid * pl.reciprocal(1.0 + jnp.exp(-1.702 * hmid), approx=True)
        x = x + jnp.dot(hmid.astype(bf16), fc2_w_ref[...],
                        preferred_element_type=jnp.float32) + fc2_b
        h_ref[...] = x.reshape(BT, T, D)

        # ---- fused ln_final + EOT gather + projection + L2-normalize -------------
        @pl.when(l == n_layers - 1)
        def _():
            rows = []
            for r in range(BT):
                eot = eot_ref[bt * BT + r]
                rows.append(h_ref[r, pl.ds(eot, 1), :])             # (1, D)
            feat = jnp.concatenate(rows, axis=0)                     # (BT, D)
            feat = layer_norm(feat, lnf_g_ref[...], lnf_b_ref[...])
            z = jnp.dot(feat.astype(bf16), proj_ref[...],
                        preferred_element_type=jnp.float32)
            if normalize:
                z = z * jax.lax.rsqrt(jnp.sum(z * z, axis=-1, keepdims=True))
            o_ref[...] = z.astype(o_ref.dtype)

    return kernel


def _clip_text_encoder(x_emb, eot_idx, stream, *, n_heads, normalize, batch_tile=None):
    B, T, D = x_emb.shape
    L = stream["wqkv"].shape[0]
    Dff = stream["fc1_w"].shape[2]
    Dout = stream["proj"].shape[1]
    BT = B if batch_tile is None else batch_tile
    assert B % BT == 0
    n_bt = B // BT

    kernel = _make_encoder_kernel(n_heads, D, Dff, BT, T, normalize)

    # causal mask built once on the host side (grid-invariant input)
    r = jnp.arange(T)
    mask = jnp.where(r[None, :] <= r[:, None], 0.0, -1e9).astype(jnp.float32)

    xmap = lambda bt, l, e: (bt, 0, 0)     # per-batch-tile block, constant over layers
    lmap = lambda bt, l, e: (l, 0, 0)      # per-layer weight slab (streamed, double-buffered)
    cmap = lambda bt, l, e: (0, 0)         # grid-invariant (DMA'd once)
    omap = lambda bt, l, e: (bt, 0)

    grid_spec = pltpu.PrefetchScalarGridSpec(
        num_scalar_prefetch=1,
        grid=(n_bt, L),
        in_specs=[
            pl.BlockSpec((BT, T, D), xmap),          # x (embedded tokens)
            pl.BlockSpec((T, T), cmap),              # causal mask
            pl.BlockSpec((None, D, 3 * D), lmap),    # W_qkv (bf16)
            pl.BlockSpec((None, D, D), lmap),        # W_o   (bf16)
            pl.BlockSpec((None, D, Dff), lmap),      # fc1 W (bf16)
            pl.BlockSpec((None, Dff, D), lmap),      # fc2 W (bf16)
            pl.BlockSpec((None, 8, Dff), lmap),      # packed small params (f32)
            pl.BlockSpec((1, D), cmap),              # ln_final gamma
            pl.BlockSpec((1, D), cmap),              # ln_final beta
            pl.BlockSpec((D, Dout), cmap),           # text projection (bf16)
        ],
        out_specs=pl.BlockSpec((BT, Dout), omap),
        scratch_shapes=[pltpu.VMEM((BT, T, D), jnp.float32)],
    )

    # advisory cost estimate for the XLA scheduler
    flops = L * B * (2 * T * D * 3 * D + 4 * T * T * D + 2 * T * D * D
                     + 4 * T * D * Dff) + 2 * B * D * Dout
    transcendentals = L * B * (n_heads * T * T + T * Dff)
    w_bytes = (stream["wqkv"].size + stream["wo"].size + stream["fc1_w"].size
               + stream["fc2_w"].size) * 2 + stream["small"].size * 4
    bytes_accessed = (n_bt * w_bytes + x_emb.size * 4 + T * T * 4
                      + 2 * D * 4 + D * Dout * 2 + B * Dout * 4)

    out = pl.pallas_call(
        kernel,
        out_shape=jax.ShapeDtypeStruct((B, Dout), jnp.float32),
        grid_spec=grid_spec,
        compiler_params=pltpu.CompilerParams(
            dimension_semantics=("parallel", "arbitrary"),
            vmem_limit_bytes=32 * 1024 * 1024),
        cost_estimate=pl.CostEstimate(flops=int(flops),
                                      transcendentals=int(transcendentals),
                                      bytes_accessed=int(bytes_accessed)),
    )(eot_idx.astype(jnp.int32), x_emb, mask,
      stream["wqkv"], stream["wo"], stream["fc1_w"], stream["fc2_w"],
      stream["small"], stream["lnf_g"], stream["lnf_b"], stream["proj"])
    return out


# --------------------------------------------------------------------------
# Module equivalent
# --------------------------------------------------------------------------
class FrozenCLIPTextEmbedder:
    """JAX/Pallas equivalent of ldm's FrozenCLIPTextEmbedder (CLIP text encoder)."""

    def __init__(self, vocab_size=64, max_length=16, d_model=256, n_heads=2,
                 n_layers=2, d_out=256, n_repeat=1, normalize=True,
                 batch_tile=None, key=None):
        assert d_model % n_heads == 0 and d_model % 128 == 0
        self.max_length = max_length
        self.n_repeat = n_repeat
        self.normalize = normalize
        self.n_heads = n_heads
        self.batch_tile = batch_tile       # TODO(synk): set to B//2 on v7x (2 TensorCores)
        key = jax.random.PRNGKey(0) if key is None else key
        ks = jax.random.split(key, 10)
        D, Dff, L = d_model, 4 * d_model, n_layers
        # f32 master parameters (used by the pure-JAX reference)
        self.params = dict(
            tok_emb=0.02 * jax.random.normal(ks[0], (vocab_size, D), jnp.float32),
            pos_emb=0.01 * jax.random.normal(ks[1], (max_length, D), jnp.float32),
            ln1_g=jnp.ones((L, D), jnp.float32),
            ln1_b=jnp.zeros((L, D), jnp.float32),
            wqkv=(D ** -0.5) * jax.random.normal(ks[2], (L, D, 3 * D), jnp.float32),
            bqkv=0.01 * jax.random.normal(ks[3], (L, 3 * D), jnp.float32),
            wo=(D ** -0.5) * jax.random.normal(ks[4], (L, D, D), jnp.float32),
            bo=0.01 * jax.random.normal(ks[5], (L, D), jnp.float32),
            ln2_g=jnp.ones((L, D), jnp.float32),
            ln2_b=jnp.zeros((L, D), jnp.float32),
            fc1_w=(D ** -0.5) * jax.random.normal(ks[6], (L, D, Dff), jnp.float32),
            fc1_b=0.01 * jax.random.normal(ks[7], (L, Dff), jnp.float32),
            fc2_w=(Dff ** -0.5) * jax.random.normal(ks[8], (L, Dff, D), jnp.float32),
            fc2_b=jnp.zeros((L, D), jnp.float32),
            lnf_g=jnp.ones((D,), jnp.float32),
            lnf_b=jnp.zeros((D,), jnp.float32),
            proj=(D ** -0.5) * jax.random.normal(ks[9], (D, d_out), jnp.float32),
        )
        p = self.params
        # pack the 8 small per-layer vectors into one layer-indexed slab (fewer DMAs/step)
        small = jnp.zeros((L, 8, Dff), jnp.float32)
        small = small.at[:, 0, :D].set(p["ln1_g"])
        small = small.at[:, 1, :D].set(p["ln1_b"])
        small = small.at[:, 2, :D].set(p["ln2_g"])
        small = small.at[:, 3, :D].set(p["ln2_b"])
        small = small.at[:, 4, :D].set(p["bo"])
        small = small.at[:, 5, :D].set(p["fc2_b"])
        small = small.at[:, 6, :].set(p["fc1_b"])
        small = small.at[:, 7, :3 * D].set(p["bqkv"])
        # streamed slabs in bf16 (halves weight DMA + full MXU rate), f32 accumulation in-kernel
        self.stream = dict(
            wqkv=p["wqkv"].astype(jnp.bfloat16),
            wo=p["wo"].astype(jnp.bfloat16),
            fc1_w=p["fc1_w"].astype(jnp.bfloat16),
            fc2_w=p["fc2_w"].astype(jnp.bfloat16),
            small=small,
            lnf_g=p["lnf_g"][None, :],
            lnf_b=p["lnf_b"][None, :],
            proj=p["proj"].astype(jnp.bfloat16),
        )

    def freeze(self):
        return self  # JAX arrays are immutable; nothing to do.

    def __call__(self, tokens):
        # TODO(synk): clip.tokenize (BPE text tokenizer) has no Pallas equivalent; the
        # forward takes pre-tokenized int32 ids of shape (B, max_length).
        tokens = tokens.astype(jnp.int32)
        p = self.params
        # TODO(synk): the token-embedding gather stays in plain JAX (a DMA-gather kernel is
        # not worth it at this size); everything after it is one fused kernel.
        x = jnp.take(p["tok_emb"], tokens, axis=0) + p["pos_emb"][None, :, :]
        eot_idx = jnp.argmax(tokens, axis=-1).astype(jnp.int32)   # EOT = highest id
        return _clip_text_encoder(x.astype(jnp.float32), eot_idx, self.stream,
                                  n_heads=self.n_heads, normalize=self.normalize,
                                  batch_tile=self.batch_tile)

    def encode(self, tokens):
        z = self(tokens)
        if z.ndim == 2:
            z = z[:, None, :]                                     # 'b 1 d -> b k d'
        return jnp.repeat(z, self.n_repeat, axis=1)

    # pure-JAX reference of the same forward, mirroring the kernel's bf16 weight/LHS
    # quantization with f32 accumulation (self-check only)
    def _reference(self, tokens):
        p = self.params
        bf, f32 = jnp.bfloat16, jnp.float32
        mm = lambda a, w: jnp.einsum('...k,kn->...n', a.astype(bf), w.astype(bf),
                                     preferred_element_type=f32)
        tokens = tokens.astype(jnp.int32)
        x = jnp.take(p["tok_emb"], tokens, axis=0) + p["pos_emb"][None]
        B, T, D = x.shape
        H = self.n_heads
        Dh = D // H
        r = jnp.arange(T)
        mask = jnp.where(r[None, :] <= r[:, None], 0.0, -1e9).astype(f32)

        def ln(v, g, b, eps=1e-5):
            mu = v.mean(-1, keepdims=True)
            var = ((v - mu) ** 2).mean(-1, keepdims=True)
            return (v - mu) * jax.lax.rsqrt(var + eps) * g + b

        for li in range(p["wqkv"].shape[0]):
            xn = ln(x, p["ln1_g"][li], p["ln1_b"][li])
            qkv = mm(xn, p["wqkv"][li]) + p["bqkv"][li]
            q, k, v = qkv[..., :D], qkv[..., D:2 * D], qkv[..., 2 * D:]
            outs = []
            for h in range(H):
                sl = slice(h * Dh, (h + 1) * Dh)
                s = jnp.einsum('bqd,bkd->bqk', q[..., sl].astype(bf), k[..., sl].astype(bf),
                               preferred_element_type=f32) / math.sqrt(Dh) + mask[None]
                pr = jax.nn.softmax(s, axis=-1)
                outs.append(jnp.einsum('bqk,bkd->bqd', pr.astype(bf), v[..., sl].astype(bf),
                                       preferred_element_type=f32))
            x = x + mm(jnp.concatenate(outs, axis=-1), p["wo"][li]) + p["bo"][li]
            xn2 = ln(x, p["ln2_g"][li], p["ln2_b"][li])
            hmid = mm(xn2, p["fc1_w"][li]) + p["fc1_b"][li]
            hmid = hmid * jax.nn.sigmoid(1.702 * hmid)
            x = x + mm(hmid, p["fc2_w"][li]) + p["fc2_b"][li]
        eot = jnp.argmax(tokens, axis=-1)
        xe = ln(x[jnp.arange(B), eot], p["lnf_g"], p["lnf_b"])
        z = mm(xe, p["proj"])
        if self.normalize:
            z = z / jnp.linalg.norm(z, axis=1, keepdims=True)
        return z


# --------------------------------------------------------------------------
if __name__ == "__main__":
    B, T, V, DOUT, NREP = 2, 16, 64, 256, 3
    model = FrozenCLIPTextEmbedder(vocab_size=V, max_length=T, d_model=256,
                                   n_heads=2, n_layers=2, d_out=DOUT,
                                   n_repeat=NREP, normalize=True,
                                   key=jax.random.PRNGKey(0))

    # deterministic toy "tokenized text": SOT=1, body in [2, V-2), EOT=V-1 (highest id), 0-pad
    key = jax.random.PRNGKey(0)
    body = jax.random.randint(key, (B, T), 2, V - 2)
    lens = jnp.array([9, 13])
    pos = jnp.arange(T)[None, :]
    tokens = jnp.where(pos == 0, 1, body)
    tokens = jnp.where(pos == lens[:, None], V - 1, tokens)
    tokens = jnp.where(pos > lens[:, None], 0, tokens).astype(jnp.int32)

    z = jax.block_until_ready(model(tokens))
    z_ref = model._reference(tokens)

    assert z.shape == (B, DOUT), z.shape
    err = float(jnp.max(jnp.abs(z - z_ref)))
    assert jnp.allclose(z, z_ref, atol=1e-2, rtol=1e-2), err
    assert jnp.allclose(jnp.linalg.norm(z, axis=1), 1.0, atol=1e-3)

    zk = jax.block_until_ready(model.encode(tokens))
    assert zk.shape == (B, NREP, DOUT), zk.shape
    print("KERNEL_OK")
</pallas_src>

<mosaic_0001>
module attributes {stable_mosaic.version = 11 : i64} {
  func.func @kernel(%arg0: i32, %arg1: i32, %arg2: memref<2xi32, #tpu.memory_space<smem>>, %arg3: memref<2x16x256xf32, #tpu.memory_space<vmem>>, %arg4: memref<16x16xf32, #tpu.memory_space<vmem>>, %arg5: memref<1x256x768xbf16, #tpu.memory_space<vmem>>, %arg6: memref<1x256x256xbf16, #tpu.memory_space<vmem>>, %arg7: memref<1x256x1024xbf16, #tpu.memory_space<vmem>>, %arg8: memref<1x1024x256xbf16, #tpu.memory_space<vmem>>, %arg9: memref<1x8x1024xf32, #tpu.memory_space<vmem>>, %arg10: memref<1x256xf32, #tpu.memory_space<vmem>>, %arg11: memref<1x256xf32, #tpu.memory_space<vmem>>, %arg12: memref<256x256xbf16, #tpu.memory_space<vmem>>, %arg13: memref<2x256xf32, #tpu.memory_space<vmem>>, %arg14: memref<2x16x256xf32, #tpu.memory_space<vmem>>) attributes {dimension_semantics = [#tpu.dimension_semantics<parallel>, #tpu.dimension_semantics<arbitrary>], iteration_bounds = array<i64: 1, 2>, scalar_prefetch = 1 : i64, scratch_operands = 1 : i64, tpu.core_type = #tpu.core_type<tc>, window_params = [{transform_indices = @transform_0, window_bounds = array<i64: 2, 16, 256>}, {pipeline_mode = #tpu.pipeline_mode<synchronous>, transform_indices = @transform_1, window_bounds = array<i64: 16, 16>}, {transform_indices = @transform_2, window_bounds = array<i64: 1, 256, 768>}, {transform_indices = @transform_3, window_bounds = array<i64: 1, 256, 256>}, {transform_indices = @transform_4, window_bounds = array<i64: 1, 256, 1024>}, {transform_indices = @transform_5, window_bounds = array<i64: 1, 1024, 256>}, {transform_indices = @transform_6, window_bounds = array<i64: 1, 8, 1024>}, {pipeline_mode = #tpu.pipeline_mode<synchronous>, transform_indices = @transform_7, window_bounds = array<i64: 1, 256>}, {pipeline_mode = #tpu.pipeline_mode<synchronous>, transform_indices = @transform_8, window_bounds = array<i64: 1, 256>}, {pipeline_mode = #tpu.pipeline_mode<synchronous>, transform_indices = @transform_9, window_bounds = array<i64: 256, 256>}, {transform_indices = @transform_10, window_bounds = array<i64: 2, 256>}]} {
    %c0_i32 = arith.constant 0 : i32
    %0 = arith.cmpi eq, %arg1, %c0_i32 : i32
    %1 = arith.extui %0 : i1 to i32
    %c0_i32_0 = arith.constant 0 : i32
    %2 = arith.cmpi ne, %1, %c0_i32_0 : i32
    scf.if %2 {
      %c0_49 = arith.constant 0 : index
      %c0_50 = arith.constant 0 : index
      %c0_51 = arith.constant 0 : index
      %153 = vector.load %arg3[%c0_49, %c0_50, %c0_51] : memref<2x16x256xf32, #tpu.memory_space<vmem>>, vector<2x16x256xf32>
      %c0_52 = arith.constant 0 : index
      %c0_53 = arith.constant 0 : index
      %c0_54 = arith.constant 0 : index
      %154 = vector.load %arg14[%c0_52, %c0_53, %c0_54] : memref<2x16x256xf32, #tpu.memory_space<vmem>>, vector<2x16x256xf32>
      tpu.vector_store %arg14[%c0_52, %c0_53, %c0_54], %153 {strides = array<i32>} : memref<2x16x256xf32, #tpu.memory_space<vmem>>, vector<2x16x256xf32>,
    } else {
    }
    %c0 = arith.constant 0 : index
    %c0_1 = arith.constant 0 : index
    %c0_2 = arith.constant 0 : index
    %3 = vector.load %arg14[%c0, %c0_1, %c0_2] : memref<2x16x256xf32, #tpu.memory_space<vmem>>, vector<2x16x256xf32>
    %4 = vector.shape_cast %3 : vector<2x16x256xf32> to vector<32x256xf32>
    %c0_3 = arith.constant 0 : index
    %c0_4 = arith.constant 0 : index
    %c0_5 = arith.constant 0 : index
    %5 = vector.load %arg9[%c0_3, %c0_4, %c0_5] : memref<1x8x1024xf32, #tpu.memory_space<vmem>>, vector<1x8x1024xf32>
    %6 = vector.shape_cast %5 : vector<1x8x1024xf32> to vector<8x1024xf32>
    %7 = vector.extract_strided_slice %6 {offsets = [0, 0], sizes = [1, 256], strides = [1, 1]} : vector<8x1024xf32> to vector<1x256xf32>
    %8 = vector.extract_strided_slice %6 {offsets = [1, 0], sizes = [1, 256], strides = [1, 1]} : vector<8x1024xf32> to vector<1x256xf32>
    %9 = vector.extract_strided_slice %6 {offsets = [2, 0], sizes = [1, 256], strides = [1, 1]} : vector<8x1024xf32> to vector<1x256xf32>
    %10 = vector.extract_strided_slice %6 {offsets = [3, 0], sizes = [1, 256], strides = [1, 1]} : vector<8x1024xf32> to vector<1x256xf32>
    %11 = vector.extract_strided_slice %6 {offsets = [4, 0], sizes = [1, 256], strides = [1, 1]} : vector<8x1024xf32> to vector<1x256xf32>
    %12 = vector.extract_strided_slice %6 {offsets = [5, 0], sizes = [1, 256], strides = [1, 1]} : vector<8x1024xf32> to vector<1x256xf32>
    %13 = vector.extract_strided_slice %6 {offsets = [6, 0], sizes = [1, 1024], strides = [1, 1]} : vector<8x1024xf32> to vector<1x1024xf32>
    %14 = vector.extract_strided_slice %6 {offsets = [7, 0], sizes = [1, 768], strides = [1, 1]} : vector<8x1024xf32> to vector<1x768xf32>
    %cst = arith.constant dense<0.000000e+00> : vector<32xf32>
    %15 = vector.multi_reduction <add>, %4, %cst [1] : vector<32x256xf32> to vector<32xf32>
    %16 = vector.shape_cast %15 : vector<32xf32> to vector<32x1xf32>
    %cst_6 = arith.constant 2.560000e+02 : f32
    %17 = vector.broadcast %cst_6 : f32 to vector<32x1xf32>
    %18 = arith.divf %16, %17 : vector<32x1xf32>
    %19 = vector.broadcast %18 : vector<32x1xf32> to vector<32x256xf32>
    %20 = arith.subf %4, %19 : vector<32x256xf32>
    %21 = arith.mulf %20, %20 : vector<32x256xf32>
    %cst_7 = arith.constant dense<0.000000e+00> : vector<32xf32>
    %22 = vector.multi_reduction <add>, %21, %cst_7 [1] : vector<32x256xf32> to vector<32xf32>
    %23 = vector.shape_cast %22 : vector<32xf32> to vector<32x1xf32>
    %cst_8 = arith.constant 2.560000e+02 : f32
    %24 = vector.broadcast %cst_8 : f32 to vector<32x1xf32>
    %25 = arith.divf %23, %24 : vector<32x1xf32>
    %26 = vector.broadcast %18 : vector<32x1xf32> to vector<32x256xf32>
    %27 = arith.subf %4, %26 : vector<32x256xf32>
    %cst_9 = arith.constant 9.99999974E-6 : f32
    %28 = vector.broadcast %cst_9 : f32 to vector<32x1xf32>
    %29 = arith.addf %25, %28 : vector<32x1xf32>
    %30 = math.rsqrt %29 : vector<32x1xf32>
    %31 = vector.broadcast %30 : vector<32x1xf32> to vector<32x256xf32>
    %32 = arith.mulf %27, %31 : vector<32x256xf32>
    %33 = vector.broadcast %7 : vector<1x256xf32> to vector<32x256xf32>
    %34 = arith.mulf %32, %33 : vector<32x256xf32>
    %35 = vector.broadcast %8 : vector<1x256xf32> to vector<32x256xf32>
    %36 = arith.addf %34, %35 : vector<32x256xf32>
    %37 = arith.truncf %36 : vector<32x256xf32> to vector<32x256xbf16>
    %c0_10 = arith.constant 0 : index
    %c0_11 = arith.constant 0 : index
    %c0_12 = arith.constant 0 : index
    %38 = vector.load %arg5[%c0_10, %c0_11, %c0_12] : memref<1x256x768xbf16, #tpu.memory_space<vmem>>, vector<1x256x768xbf16>
    %39 = vector.shape_cast %38 : vector<1x256x768xbf16> to vector<256x768xbf16>
    %cst_13 = arith.constant dense<0.000000e+00> : vector<32x768xf32>
    %40 = tpu.matmul %37, %39, %cst_13 {dimension_numbers = #tpu.dot_dimension_numbers<[1], [0], [0], [1], [0, 0, 1, 1], [], []>} : vector<32x256xbf16>, vector<256x768xbf16>, vector<32x768xf32> -> vector<32x768xf32>
    %41 = vector.broadcast %14 : vector<1x768xf32> to vector<32x768xf32>
    %42 = arith.addf %40, %41 : vector<32x768xf32>
    %43 = vector.extract_strided_slice %42 {offsets = [0, 0], sizes = [32, 256], strides = [1, 1]} : vector<32x768xf32> to vector<32x256xf32>
    %44 = vector.shape_cast %43 : vector<32x256xf32> to vector<2x16x256xf32>
    %45 = vector.extract_strided_slice %42 {offsets = [0, 256], sizes = [32, 256], strides = [1, 1]} : vector<32x768xf32> to vector<32x256xf32>
    %46 = vector.shape_cast %45 : vector<32x256xf32> to vector<2x16x256xf32>
    %47 = vector.extract_strided_slice %42 {offsets = [0, 512], sizes = [32, 256], strides = [1, 1]} : vector<32x768xf32> to vector<32x256xf32>
    %48 = vector.shape_cast %47 : vector<32x256xf32> to vector<2x16x256xf32>
    %c0_14 = arith.constant 0 : index
    %c0_15 = arith.constant 0 : index
    %49 = vector.load %arg4[%c0_14, %c0_15] : memref<16x16xf32, #tpu.memory_space<vmem>>, vector<16x16xf32>
    %50 = vector.shape_cast %49 : vector<16x16xf32> to vector<1x16x16xf32>
    %51 = vector.extract_strided_slice %44 {offsets = [0, 0, 0], sizes = [2, 16, 128], strides = [1, 1, 1]} : vector<2x16x256xf32> to vector<2x16x128xf32>
    %52 = arith.truncf %51 : vector<2x16x128xf32> to vector<2x16x128xbf16>
    %53 = vector.extract_strided_slice %46 {offsets = [0, 0, 0], sizes = [2, 16, 128], strides = [1, 1, 1]} : vector<2x16x256xf32> to vector<2x16x128xf32>
    %54 = arith.truncf %53 : vector<2x16x128xf32> to vector<2x16x128xbf16>
    %55 = vector.extract_strided_slice %48 {offsets = [0, 0, 0], sizes = [2, 16, 128], strides = [1, 1, 1]} : vector<2x16x256xf32> to vector<2x16x128xf32>
    %56 = arith.truncf %55 : vector<2x16x128xf32> to vector<2x16x128xbf16>
    "tpu.trace_start"() <{level = 10 : i32, message = "bqd,bkd->bqk"}> : () -> ()
    %cst_16 = arith.constant dense<0.000000e+00> : vector<2x16x16xf32>
    %57 = tpu.matmul %52, %54, %cst_16 {dimension_numbers = #tpu.dot_dimension_numbers<[2], [2], [1], [1], [0, 0, 0, 1, 1, 1], [0], [0]>} : vector<2x16x128xbf16>, vector<2x16x128xbf16>, vector<2x16x16xf32> -> vector<2x16x16xf32>
    "tpu.trace_stop"() : () -> ()
    %cst_17 = arith.constant 0.0883883461 : f32
    %58 = vector.broadcast %cst_17 : f32 to vector<2x16x16xf32>
    %59 = arith.mulf %57, %58 : vector<2x16x16xf32>
    %60 = vector.broadcast %50 : vector<1x16x16xf32> to vector<2x16x16xf32>
    %61 = arith.addf %59, %60 : vector<2x16x16xf32>
    %cst_18 = arith.constant dense<0xFF800000> : vector<2x16xf32>
    %62 = vector.multi_reduction <maximumf>, %61, %cst_18 [2] : vector<2x16x16xf32> to vector<2x16xf32>
    %63 = vector.shape_cast %62 : vector<2x16xf32> to vector<2x16x1xf32>
    %64 = vector.broadcast %63 : vector<2x16x1xf32> to vector<2x16x16xf32>
    %65 = arith.subf %61, %64 : vector<2x16x16xf32>
    %66 = math.exp %65 : vector<2x16x16xf32>
    %cst_19 = arith.constant dense<0.000000e+00> : vector<2x16xf32>
    %67 = vector.multi_reduction <add>, %66, %cst_19 [2] : vector<2x16x16xf32> to vector<2x16xf32>
    %68 = vector.shape_cast %67 : vector<2x16xf32> to vector<2x16x1xf32>
    %69 = tpu.reciprocal %68 {approx = true} : vector<2x16x1xf32> -> vector<2x16x1xf32>
    %70 = vector.broadcast %69 : vector<2x16x1xf32> to vector<2x16x16xf32>
    %71 = arith.mulf %66, %70 : vector<2x16x16xf32>
    %72 = arith.truncf %71 : vector<2x16x16xf32> to vector<2x16x16xbf16>
    "tpu.trace_start"() <{level = 10 : i32, message = "bqk,bkd->bqd"}> : () -> ()
    %cst_20 = arith.constant dense<0.000000e+00> : vector<2x16x128xf32>
    %73 = tpu.matmul %72, %56, %cst_20 {dimension_numbers = #tpu.dot_dimension_numbers<[2], [1], [1], [2], [0, 0, 0, 1, 1, 2], [0], [0]>} : vector<2x16x16xbf16>, vector<2x16x128xbf16>, vector<2x16x128xf32> -> vector<2x16x128xf32>
    "tpu.trace_stop"() : () -> ()
    %74 = vector.extract_strided_slice %44 {offsets = [0, 0, 128], sizes = [2, 16, 128], strides = [1, 1, 1]} : vector<2x16x256xf32> to vector<2x16x128xf32>
    %75 = arith.truncf %74 : vector<2x16x128xf32> to vector<2x16x128xbf16>
    %76 = vector.extract_strided_slice %46 {offsets = [0, 0, 128], sizes = [2, 16, 128], strides = [1, 1, 1]} : vector<2x16x256xf32> to vector<2x16x128xf32>
    %77 = arith.truncf %76 : vector<2x16x128xf32> to vector<2x16x128xbf16>
    %78 = vector.extract_strided_slice %48 {offsets = [0, 0, 128], sizes = [2, 16, 128], strides = [1, 1, 1]} : vector<2x16x256xf32> to vector<2x16x128xf32>
    %79 = arith.truncf %78 : vector<2x16x128xf32> to vector<2x16x128xbf16>
    "tpu.trace_start"() <{level = 10 : i32, message = "bqd,bkd->bqk"}> : () -> ()
    %cst_21 = arith.constant dense<0.000000e+00> : vector<2x16x16xf32>
    %80 = tpu.matmul %75, %77, %cst_21 {dimension_numbers = #tpu.dot_dimension_numbers<[2], [2], [1], [1], [0, 0, 0, 1, 1, 1], [0], [0]>} : vector<2x16x128xbf16>, vector<2x16x128xbf16>, vector<2x16x16xf32> -> vector<2x16x16xf32>
    "tpu.trace_stop"() : () -> ()
    %cst_22 = arith.constant 0.0883883461 : f32
    %81 = vector.broadcast %cst_22 : f32 to vector<2x16x16xf32>
    %82 = arith.mulf %80, %81 : vector<2x16x16xf32>
    %83 = vector.broadcast %50 : vector<1x16x16xf32> to vector<2x16x16xf32>
    %84 = arith.addf %82, %83 : vector<2x16x16xf32>
    %cst_23 = arith.constant dense<0xFF800000> : vector<2x16xf32>
    %85 = vector.multi_reduction <maximumf>, %84, %cst_23 [2] : vector<2x16x16xf32> to vector<2x16xf32>
    %86 = vector.shape_cast %85 : vector<2x16xf32> to vector<2x16x1xf32>
    %87 = vector.broadcast %86 : vector<2x16x1xf32> to vector<2x16x16xf32>
    %88 = arith.subf %84, %87 : vector<2x16x16xf32>
    %89 = math.exp %88 : vector<2x16x16xf32>
    %cst_24 = arith.constant dense<0.000000e+00> : vector<2x16xf32>
    %90 = vector.multi_reduction <add>, %89, %cst_24 [2] : vector<2x16x16xf32> to vector<2x16xf32>
    %91 = vector.shape_cast %90 : vector<2x16xf32> to vector<2x16x1xf32>
    %92 = tpu.reciprocal %91 {approx = true} : vector<2x16x1xf32> -> vector<2x16x1xf32>
    %93 = vector.broadcast %92 : vector<2x16x1xf32> to vector<2x16x16xf32>
    %94 = arith.mulf %89, %93 : vector<2x16x16xf32>
    %95 = arith.truncf %94 : vector<2x16x16xf32> to vector<2x16x16xbf16>
    "tpu.trace_start"() <{level = 10 : i32, message = "bqk,bkd->bqd"}> : () -> ()
    %cst_25 = arith.constant dense<0.000000e+00> : vector<2x16x128xf32>
    %96 = tpu.matmul %95, %79, %cst_25 {dimension_numbers = #tpu.dot_dimension_numbers<[2], [1], [1], [2], [0, 0, 0, 1, 1, 2], [0], [0]>} : vector<2x16x16xbf16>, vector<2x16x128xbf16>, vector<2x16x128xf32> -> vector<2x16x128xf32>
    "tpu.trace_stop"() : () -> ()
    %97 = tpu.concatenate %73, %96 in 2 : vector<2x16x128xf32>, vector<2x16x128xf32> -> vector<2x16x256xf32>
    %98 = vector.shape_cast %97 : vector<2x16x256xf32> to vector<32x256xf32>
    %99 = arith.truncf %98 : vector<32x256xf32> to vector<32x256xbf16>
    %c0_26 = arith.constant 0 : index
    %c0_27 = arith.constant 0 : index
    %c0_28 = arith.constant 0 : index
    %100 = vector.load %arg6[%c0_26, %c0_27, %c0_28] : memref<1x256x256xbf16, #tpu.memory_space<vmem>>, vector<1x256x256xbf16>
    %101 = vector.shape_cast %100 : vector<1x256x256xbf16> to vector<256x256xbf16>
    %cst_29 = arith.constant dense<0.000000e+00> : vector<32x256xf32>
    %102 = tpu.matmul %99, %101, %cst_29 {dimension_numbers = #tpu.dot_dimension_numbers<[1], [0], [0], [1], [0, 0, 1, 1], [], []>} : vector<32x256xbf16>, vector<256x256xbf16>, vector<32x256xf32> -> vector<32x256xf32>
    %103 = arith.addf %4, %102 : vector<32x256xf32>
    %104 = vector.broadcast %11 : vector<1x256xf32> to vector<32x256xf32>
    %105 = arith.addf %103, %104 : vector<32x256xf32>
    %cst_30 = arith.constant dense<0.000000e+00> : vector<32xf32>
    %106 = vector.multi_reduction <add>, %105, %cst_30 [1] : vector<32x256xf32> to vector<32xf32>
    %107 = vector.shape_cast %106 : vector<32xf32> to vector<32x1xf32>
    %cst_31 = arith.constant 2.560000e+02 : f32
    %108 = vector.broadcast %cst_31 : f32 to vector<32x1xf32>
    %109 = arith.divf %107, %108 : vector<32x1xf32>
    %110 = vector.broadcast %109 : vector<32x1xf32> to vector<32x256xf32>
    %111 = arith.subf %105, %110 : vector<32x256xf32>
    %112 = arith.mulf %111, %111 : vector<32x256xf32>
    %cst_32 = arith.constant dense<0.000000e+00> : vector<32xf32>
    %113 = vector.multi_reduction <add>, %112, %cst_32 [1] : vector<32x256xf32> to vector<32xf32>
    %114 = vector.shape_cast %113 : vector<32xf32> to vector<32x1xf32>
    %cst_33 = arith.constant 2.560000e+02 : f32
    %115 = vector.broadcast %cst_33 : f32 to vector<32x1xf32>
    %116 = arith.divf %114, %115 : vector<32x1xf32>
    %117 = vector.broadcast %109 : vector<32x1xf32> to vector<32x256xf32>
    %118 = arith.subf %105, %117 : vector<32x256xf32>
    %cst_34 = arith.constant 9.99999974E-6 : f32
    %119 = vector.broadcast %cst_34 : f32 to vector<32x1xf32>
    %120 = arith.addf %116, %119 : vector<32x1xf32>
    %121 = math.rsqrt %120 : vector<32x1xf32>
    %122 = vector.broadcast %121 : vector<32x1xf32> to vector<32x256xf32>
    %123 = arith.mulf %118, %122 : vector<32x256xf32>
    %124 = vector.broadcast %9 : vector<1x256xf32> to vector<32x256xf32>
    %125 = arith.mulf %123, %124 : vector<32x256xf32>
    %126 = vector.broadcast %10 : vector<1x256xf32> to vector<32x256xf32>
    %127 = arith.addf %125, %126 : vector<32x256xf32>
    %128 = arith.truncf %127 : vector<32x256xf32> to vector<32x256xbf16>
    %c0_35 = arith.constant 0 : index
    %c0_36 = arith.constant 0 : index
    %c0_37 = arith.constant 0 : index
    %129 = vector.load %arg7[%c0_35, %c0_36, %c0_37] : memref<1x256x1024xbf16, #tpu.memory_space<vmem>>, vector<1x256x1024xbf16>
    %130 = vector.shape_cast %129 : vector<1x256x1024xbf16> to vector<256x1024xbf16>
    %cst_38 = arith.constant dense<0.000000e+00> : vector<32x1024xf32>
    %131 = tpu.matmul %128, %130, %cst_38 {dimension_numbers = #tpu.dot_dimension_numbers<[1], [0], [0], [1], [0, 0, 1, 1], [], []>} : vector<32x256xbf16>, vector<256x1024xbf16>, vector<32x1024xf32> -> vector<32x1024xf32>
    %132 = vector.broadcast %13 : vector<1x1024xf32> to vector<32x1024xf32>
    %133 = arith.addf %131, %132 : vector<32x1024xf32>
    %cst_39 = arith.constant -1.702000e+00 : f32
    %134 = vector.broadcast %cst_39 : f32 to vector<32x1024xf32>
    %135 = arith.mulf %134, %133 : vector<32x1024xf32>
    %136 = math.exp %135 : vector<32x1024xf32>
    %cst_40 = arith.constant 1.000000e+00 : f32
    %137 = vector.broadcast %cst_40 : f32 to vector<32x1024xf32>
    %138 = arith.addf %137, %136 : vector<32x1024xf32>
    %139 = tpu.reciprocal %138 {approx = true} : vector<32x1024xf32> -> vector<32x1024xf32>
    %140 = arith.mulf %133, %139 : vector<32x1024xf32>
    %141 = arith.truncf %140 : vector<32x1024xf32> to vector<32x1024xbf16>
    %c0_41 = arith.constant 0 : index
    %c0_42 = arith.constant 0 : index
    %c0_43 = arith.constant 0 : index
    %142 = vector.load %arg8[%c0_41, %c0_42, %c0_43] : memref<1x1024x256xbf16, #tpu.memory_space<vmem>>, vector<1x1024x256xbf16>
    %143 = vector.shape_cast %142 : vector<1x1024x256xbf16> to vector<1024x256xbf16>
    %cst_44 = arith.constant dense<0.000000e+00> : vector<32x256xf32>
    %144 = tpu.matmul %141, %143, %cst_44 {dimension_numbers = #tpu.dot_dimension_numbers<[1], [0], [0], [1], [0, 0, 1, 1], [], []>} : vector<32x1024xbf16>, vector<1024x256xbf16>, vector<32x256xf32> -> vector<32x256xf32>
    %145 = arith.addf %105, %144 : vector<32x256xf32>
    %146 = vector.broadcast %12 : vector<1x256xf32> to vector<32x256xf32>
    %147 = arith.addf %145, %146 : vector<32x256xf32>
    %148 = vector.shape_cast %147 : vector<32x256xf32> to vector<2x16x256xf32>
    %c0_45 = arith.constant 0 : index
    %c0_46 = arith.constant 0 : index
    %c0_47 = arith.constant 0 : index
    %149 = vector.load %arg14[%c0_45, %c0_46, %c0_47] : memref<2x16x256xf32, #tpu.memory_space<vmem>>, vector<2x16x256xf32>
    tpu.vector_store %arg14[%c0_45, %c0_46, %c0_47], %148 {strides = array<i32>} : memref<2x16x256xf32, #tpu.memory_space<vmem>>, vector<2x16x256xf32>,
    %c1_i32 = arith.constant 1 : i32
    %150 = arith.cmpi eq, %arg1, %c1_i32 : i32
    %151 = arith.extui %150 : i1 to i32
    %c0_i32_48 = arith.constant 0 : i32
    %152 = arith.cmpi ne, %151, %c0_i32_48 : i32
    scf.if %152 {
      %c2_i32 = arith.constant 2 : i32
      %153 = arith.muli %arg0, %c2_i32 : i32
      %c0_i32_49 = arith.constant 0 : i32
      %154 = arith.addi %153, %c0_i32_49 : i32
      %155 = arith.index_cast %154 : i32 to index
      %156 = memref.load %arg2[%155] : memref<2xi32, #tpu.memory_space<smem>>
      %c0_50 = arith.constant 0 : index
      %157 = arith.index_cast %156 : i32 to index
      %c0_51 = arith.constant 0 : index
      %158 = vector.load %arg14[%c0_50, %157, %c0_51] : memref<2x16x256xf32, #tpu.memory_space<vmem>>, vector<1x1x256xf32>
      %159 = vector.shape_cast %158 : vector<1x1x256xf32> to vector<1x256xf32>
      %c2_i32_52 = arith.constant 2 : i32
      %160 = arith.muli %arg0, %c2_i32_52 : i32
      %c1_i32_53 = arith.constant 1 : i32
      %161 = arith.addi %160, %c1_i32_53 : i32
      %162 = arith.index_cast %161 : i32 to index
      %163 = memref.load %arg2[%162] : memref<2xi32, #tpu.memory_space<smem>>
      %c1 = arith.constant 1 : index
      %164 = arith.index_cast %163 : i32 to index
      %c0_54 = arith.constant 0 : index
      %165 = vector.load %arg14[%c1, %164, %c0_54] : memref<2x16x256xf32, #tpu.memory_space<vmem>>, vector<1x1x256xf32>
      %166 = vector.shape_cast %165 : vector<1x1x256xf32> to vector<1x256xf32>
      %167 = tpu.concatenate %159, %166 in 0 : vector<1x256xf32>, vector<1x256xf32> -> vector<2x256xf32>
      %c0_55 = arith.constant 0 : index
      %c0_56 = arith.constant 0 : index
      %168 = vector.load %arg10[%c0_55, %c0_56] : memref<1x256xf32, #tpu.memory_space<vmem>>, vector<1x256xf32>
      %c0_57 = arith.constant 0 : index
      %c0_58 = arith.constant 0 : index
      %169 = vector.load %arg11[%c0_57, %c0_58] : memref<1x256xf32, #tpu.memory_space<vmem>>, vector<1x256xf32>
      %cst_59 = arith.constant dense<0.000000e+00> : vector<2xf32>
      %170 = vector.multi_reduction <add>, %167, %cst_59 [1] : vector<2x256xf32> to vector<2xf32>
      %171 = vector.shape_cast %170 : vector<2xf32> to vector<2x1xf32>
      %cst_60 = arith.constant 2.560000e+02 : f32
      %172 = vector.broadcast %cst_60 : f32 to vector<2x1xf32>
      %173 = arith.divf %171, %172 : vector<2x1xf32>
      %174 = vector.broadcast %173 : vector<2x1xf32> to vector<2x256xf32>
      %175 = arith.subf %167, %174 : vector<2x256xf32>
      %176 = arith.mulf %175, %175 : vector<2x256xf32>
      %cst_61 = arith.constant dense<0.000000e+00> : vector<2xf32>
      %177 = vector.multi_reduction <add>, %176, %cst_61 [1] : vector<2x256xf32> to vector<2xf32>
      %178 = vector.shape_cast %177 : vector<2xf32> to vector<2x1xf32>
      %cst_62 = arith.constant 2.560000e+02 : f32
      %179 = vector.broadcast %cst_62 : f32 to vector<2x1xf32>
      %180 = arith.divf %178, %179 : vector<2x1xf32>
      %181 = vector.broadcast %173 : vector<2x1xf32> to vector<2x256xf32>
      %182 = arith.subf %167, %181 : vector<2x256xf32>
      %cst_63 = arith.constant 9.99999974E-6 : f32
      %183 = vector.broadcast %cst_63 : f32 to vector<2x1xf32>
      %184 = arith.addf %180, %183 : vector<2x1xf32>
      %185 = math.rsqrt %184 : vector<2x1xf32>
      %186 = vector.broadcast %185 : vector<2x1xf32> to vector<2x256xf32>
      %187 = arith.mulf %182, %186 : vector<2x256xf32>
      %188 = vector.broadcast %168 : vector<1x256xf32> to vector<2x256xf32>
      %189 = arith.mulf %187, %188 : vector<2x256xf32>
      %190 = vector.broadcast %169 : vector<1x256xf32> to vector<2x256xf32>
      %191 = arith.addf %189, %190 : vector<2x256xf32>
      %192 = arith.truncf %191 : vector<2x256xf32> to vector<2x256xbf16>
      %c0_64 = arith.constant 0 : index
      %c0_65 = arith.constant 0 : index
      %193 = vector.load %arg12[%c0_64, %c0_65] : memref<256x256xbf16, #tpu.memory_space<vmem>>, vector<256x256xbf16>
      %cst_66 = arith.constant dense<0.000000e+00> : vector<2x256xf32>
      %194 = tpu.matmul %192, %193, %cst_66 {dimension_numbers = #tpu.dot_dimension_numbers<[1], [0], [0], [1], [0, 0, 1, 1], [], []>} : vector<2x256xbf16>, vector<256x256xbf16>, vector<2x256xf32> -> vector<2x256xf32>
      %195 = arith.mulf %194, %194 : vector<2x256xf32>
      %cst_67 = arith.constant dense<0.000000e+00> : vector<2xf32>
      %196 = vector.multi_reduction <add>, %195, %cst_67 [1] : vector<2x256xf32> to vector<2xf32>
      %197 = vector.shape_cast %196 : vector<2xf32> to vector<2x1xf32>
      %198 = math.rsqrt %197 : vector<2x1xf32>
      %199 = vector.broadcast %198 : vector<2x1xf32> to vector<2x256xf32>
      %200 = arith.mulf %194, %199 : vector<2x256xf32>
      %c0_68 = arith.constant 0 : index
      %c0_69 = arith.constant 0 : index
      %201 = vector.load %arg13[%c0_68, %c0_69] : memref<2x256xf32, #tpu.memory_space<vmem>>, vector<2x256xf32>
      tpu.vector_store %arg13[%c0_68, %c0_69], %200 {strides = array<i32>} : memref<2x256xf32, #tpu.memory_space<vmem>>, vector<2x256xf32>,
    } else {
    }
    return
  }
  func.func @transform_0(%arg0: i32, %arg1: i32, %arg2: memref<2xi32, #tpu.memory_space<smem>>) -> (i32, i32, i32) {
    %c0_i32 = arith.constant 0 : i32
    %c0_i32_0 = arith.constant 0 : i32
    %c0_i32_1 = arith.constant 0 : i32
    return %arg0, %c0_i32, %c0_i32_0 : i32, i32, i32
  }
  func.func @transform_1(%arg0: i32, %arg1: i32, %arg2: memref<2xi32, #tpu.memory_space<smem>>) -> (i32, i32) {
    %c0_i32 = arith.constant 0 : i32
    %c0_i32_0 = arith.constant 0 : i32
    %c0_i32_1 = arith.constant 0 : i32
    return %c0_i32, %c0_i32_0 : i32, i32
  }
  func.func @transform_2(%arg0: i32, %arg1: i32, %arg2: memref<2xi32, #tpu.memory_space<smem>>) -> (i32, i32, i32) {
    %c0_i32 = arith.constant 0 : i32
    %c0_i32_0 = arith.constant 0 : i32
    %c0_i32_1 = arith.constant 0 : i32
    return %arg1, %c0_i32, %c0_i32_0 : i32, i32, i32
  }
  func.func @transform_3(%arg0: i32, %arg1: i32, %arg2: memref<2xi32, #tpu.memory_space<smem>>) -> (i32, i32, i32) {
    %c0_i32 = arith.constant 0 : i32
    %c0_i32_0 = arith.constant 0 : i32
    %c0_i32_1 = arith.constant 0 : i32
    return %arg1, %c0_i32, %c0_i32_0 : i32, i32, i32
  }
  func.func @transform_4(%arg0: i32, %arg1: i32, %arg2: memref<2xi32, #tpu.memory_space<smem>>) -> (i32, i32, i32) {
    %c0_i32 = arith.constant 0 : i32
    %c0_i32_0 = arith.constant 0 : i32
    %c0_i32_1 = arith.constant 0 : i32
    return %arg1, %c0_i32, %c0_i32_0 : i32, i32, i32
  }
  func.func @transform_5(%arg0: i32, %arg1: i32, %arg2: memref<2xi32, #tpu.memory_space<smem>>) -> (i32, i32, i32) {
    %c0_i32 = arith.constant 0 : i32
    %c0_i32_0 = arith.constant 0 : i32
    %c0_i32_1 = arith.constant 0 : i32
    return %arg1, %c0_i32, %c0_i32_0 : i32, i32, i32
  }
  func.func @transform_6(%arg0: i32, %arg1: i32, %arg2: memref<2xi32, #tpu.memory_space<smem>>) -> (i32, i32, i32) {
    %c0_i32 = arith.constant 0 : i32
    %c0_i32_0 = arith.constant 0 : i32
    %c0_i32_1 = arith.constant 0 : i32
    return %arg1, %c0_i32, %c0_i32_0 : i32, i32, i32
  }
  func.func @transform_7(%arg0: i32, %arg1: i32, %arg2: memref<2xi32, #tpu.memory_space<smem>>) -> (i32, i32) {
    %c0_i32 = arith.constant 0 : i32
    %c0_i32_0 = arith.constant 0 : i32
    %c0_i32_1 = arith.constant 0 : i32
    return %c0_i32, %c0_i32_0 : i32, i32
  }
  func.func @transform_8(%arg0: i32, %arg1: i32, %arg2: memref<2xi32, #tpu.memory_space<smem>>) -> (i32, i32) {
    %c0_i32 = arith.constant 0 : i32
    %c0_i32_0 = arith.constant 0 : i32
    %c0_i32_1 = arith.constant 0 : i32
    return %c0_i32, %c0_i32_0 : i32, i32
  }
  func.func @transform_9(%arg0: i32, %arg1: i32, %arg2: memref<2xi32, #tpu.memory_space<smem>>) -> (i32, i32) {
    %c0_i32 = arith.constant 0 : i32
    %c0_i32_0 = arith.constant 0 : i32
    %c0_i32_1 = arith.constant 0 : i32
    return %c0_i32, %c0_i32_0 : i32, i32
  }
  func.func @transform_10(%arg0: i32, %arg1: i32, %arg2: memref<2xi32, #tpu.memory_space<smem>>) -> (i32, i32) {
    %c0_i32 = arith.constant 0 : i32
    %c0_i32_0 = arith.constant 0 : i32
    return %arg0, %c0_i32 : i32, i32
  }
}

</mosaic_0001>

<bundles_post_ra>
// kernel: tpu_custom_call.1
= control target key start
LH: loop header
LB: loop body
LE: loop exit
PB: predicated region body
PF: predicated region fallthrough
CT: control target
= control target key end

     0   :  { %s8088_s20 = smov [#allocation4]   ;;  %s9915_s0 = inlined_call_operand.hbm [shape: s32[2], index: 0, kind: input, shape index: {}]   ;;  %s9916_s1 = inlined_call_operand.hbm [shape: f32[2,16,256], index: 1, kind: input, shape index: {}]   ;;  %s9917_s2 = inlined_call_operand.hbm [shape: f32[16,16], index: 2, kind: input, shape index: {}]   ;;  %s9918_s3 = inlined_call_operand.hbm [shape: bf16[2,256,768], index: 3, kind: input, shape index: {}]   ;;  %s9919_s4 = inlined_call_operand.hbm [shape: bf16[2,256,256], index: 4, kind: input, shape index: {}]   ;;  %s9920_s5 = inlined_call_operand.hbm [shape: bf16[2,256,1024], index: 5, kind: input, shape index: {}]   ;;  %s9921_s6 = inlined_call_operand.hbm [shape: bf16[2,1024,256], index: 6, kind: input, shape index: {}]   ;;  %s9922_s7 = inlined_call_operand.hbm [shape: f32[2,8,1024], index: 7, kind: input, shape index: {}]   ;;  %s9923_s8 = inlined_call_operand.vmem [shape: f32[1,256], index: 8, kind: input, shape index: {}]   ;;  %s9924_s9 = inlined_call_operand.vmem [shape: f32[1,256], index: 9, kind: input, shape index: {}]   ;;  %s9925_s10 = inlined_call_operand.hbm [shape: bf16[256,256], index: 10, kind: input, shape index: {}]   ;;  %s9926_s11 = inlined_call_operand.hbm [shape: f32[2,256], index: 11, kind: output, shape index: {}]  }
   0x1   :  { %9930 = sst [smem:[#allocation28_spill]] %s9916_s1  ;;  %s17_s19 = sshll.u32 %s9915_s0, 4  ;;  %s18_s19 = int_to_ptr.hbm [resolvable:$true] %s17_s19 }
   0x2   :  { %9931 = sst [smem:[#allocation29_spill]] %s9918_s3 }
   0x3   :  { %9932 = sst [smem:[#allocation30_spill]] %s9919_s4 }
   0x4   :  { %9933 = sst [smem:[#allocation31_spill]] %s9923_s8 }
   0x5   :  { %9934 = sst [smem:[#allocation32_spill]] %s9924_s9 }
   0x6   :  { %9935 = sst [smem:[#allocation33_spill]] %s9926_s11 }
   0x7   :  { %20 = dma.hbm_to_smem %s18_s19, 16, %s8088_s20, [#allocation3] }
   0x8   :  { %8042 = dma.done.wait [#allocation3], 16 }
   0x9   :  { %8043 = vsyncadd [#allocation3], 4294967280 }
   0xa   :  { %23 = sfence }
   0xb   :  { %24 = vsyncpa [#allocation6], 0 }
   0xc   :  { %25 = vsyncpa [#allocation9], 0 }
   0xd   :  { %26 = vsyncpa [#allocation7], 0  ;;  %s8165_s21 = smov 0   ;;  %s8167_s22 = smov 0  }
   0xe   :  { %s8169_s23 = smov 0   ;;  %s8171_s24 = smov 0  }
   0xf   :  { %s8173_s25 = smov 0   ;;  %s8175_s0 = smov 0  }
  0x10 LB: > { %9936 = sst [smem:[#allocation23_spill]] %s8074_s23  ;;  %s8194_s26 = sadd.s32 4294967295, %s8086_s0   ;;  %s8086_s0 = sphi %s8175_s0, %s32_s0   ;;  %s8082_s25 = sphi %s8173_s25, %s9966_s25   ;;  %s8078_s24 = sphi %s8171_s24, %s9965_s24   ;;  %s8074_s23 = sphi %s8169_s23, %s9961_s23   ;;  %s8070_s22 = sphi %s8167_s22, %s9964_s22   ;;  %s8066_s21 = sphi %s8165_s21, %s9963_s21  }
  0x11   : > { %9937 = sst [smem:[#allocation24_spill]] %s8078_s24  ;;  %p105_p0 = scmp.ne.s32.totalorder %s8074_s23, %s8070_s22 }
  0x12   : > { %9938 = sst [smem:[#allocation25_spill]] %s8086_s0  ;;  %p106_p1 = scmp.eq.s32.totalorder %s8086_s0, 0 }
  0x13   : > { %p111_p2 = scmp.ne.s32.totalorder %s8070_s22, %s8066_s21  ;;  %p112_p3 = scmp.eq.s32.totalorder %s8194_s26, 0 }
  0x14   : > { %p8202_p4 = por %p106_p1, %p105_p0  ;;  %p5286_p5 = scmp.ge.s32.totalorder %s8086_s0, 1 }
  0x15   : > { %p8209_p6 = por %p112_p3, %p111_p2  ;;  %p315_p7 = scmp.lt.s32.totalorder %s8086_s0, 3 }
  0x16   : > { %s9941_s1 = sld [smem:[#allocation28_spill]]  ;;  %s8089_s15 = smov [#allocation5]  }
  0x17   : > { %p8217_p8 = pnand %p5286_p5, %p315_p7  ;;  %s332_s16 = sshll.u32 %s8089_s15, 4  ;;  %s333_s16 = int_to_ptr.vmem [resolvable:$true] %s332_s16 }
  0x18   : > { %p7470_p11 = scmp.lt.s32.totalorder %s8086_s0, 2  ;;  %s8090_s18 = smov 256  }
  0x19   : > { %p7441_p9 = pneg %p8217_p8  ;;  %s8091_s19 = smov 16  }
  0x1a   : > { %s41_s20 = sadd.s32 1, %s8082_s25  ;;  %s380_s21 = sand.u32 1, %s8086_s0  }
  0x1b   : > { %p8225_p10 = pnand %p7441_p9, %p112_p3  ;;  %p42_p12 = scmp.ge.s32.totalorder %s41_s20, 2 }
  0x1c   : > { %s330_s13 = sshll.u32 %s9941_s1, 4  ;;  %s8235_s30 = sand.u32 1, %s8074_s23   ;;  %s331_s13 = int_to_ptr.hbm [resolvable:$true] %s330_s13 }
  0x1d   : > { %7444 = dma.hbm_to_vmem [thread:$0]  (!%p8225_p10), %s331_s13, 1024, %s333_s16, [#allocation6], %s8090_s18, %s8090_s18, %s8091_s19  }
  0x1e   : > { %s7413_s12 = smul.u32 768, %s8082_s25  ;;  %s9968_s20 = smov (%p42_p12, %s41_s20), 0 }
  0x1f   : > { %9944 = sst [smem:[#allocation26_spill]] %s9968_s20  ;;  %s7412_s15 = smul.u32 768, %s8235_s30 }
  0x20   : > { %s9945_s3 = sld [smem:[#allocation29_spill]]  ;;  %s95_s13 = ssub.s32 %s8082_s25, %s9968_s20 }
  0x21   : > { %p96_p13 = scmp.eq.s32.totalorder %s95_s13, 0  ;;  %s384_s18 = scalar_lea.vmem [#allocation10], %s7412_s15 }
  0x22   : > { %s392_s19 = sshll.u32 %s384_s18, 4  ;;  %s9946_s9 = sadd.s32 1, %s8074_s23  ;;  %s393_s19 = int_to_ptr.vmem [resolvable:$true] %s392_s19 }
  0x23   : > { %s8249_s8 = scalar_select %p96_p13, %s8074_s23, %s9946_s9  }
  0x24   : > { %p8255_p0 = pnand %p7470_p11, %p8202_p4  ;;  %s8259_s1 = scalar_lea.sflag [#allocation6], %s380_s21 }
  0x25   : > { %9947 = sst [smem:[#allocation27_spill]] %s8249_s8  ;;  %s8093_s27 = smov 24  }
  0x26   : > { %s389_s11 = scalar_lea.hbm %s9945_s3, %s7413_s12  ;;  %s5292_s9 = sshll.u32 %s8235_s30, 8 }
  0x27   : > { %s390_s16 = sshll.u32 %s389_s11, 4  ;;  %s8092_s11 = smov 384   ;;  %s391_s16 = int_to_ptr.hbm [resolvable:$true] %s390_s16 }
  0x28   : > { %7454 = dma.hbm_to_vmem [thread:$0]  (!%p8255_p0), %s391_s16, 12288, %s393_s19, %s8259_s1, %s8092_s11, %s8092_s11, %s8093_s27  }
  0x29   : > { %s6991_s12 = sshll.u32 %s8082_s25, 8  ;;  %s9949_s4 = sld [smem:[#allocation30_spill]] }
  0x2a   : > { %s406_s18 = scalar_lea.vmem [#allocation11], %s5292_s9  ;;  %s5295_s21 = sshll.u32 %s8235_s30, 10 }
  0x2b   : > { %s414_s3 = sshll.u32 %s406_s18, 4  ;;  %s8094_s8 = smov 128   ;;  %s415_s3 = int_to_ptr.vmem [resolvable:$true] %s414_s3 }
  0x2c   : > { %s8095_s23 = smov 8   ;;  %s6992_s16 = sshll.u32 %s8082_s25, 10 }
  0x2d   : > { %s433_s27 = scalar_lea.hbm %s9920_s5, %s6992_s16  ;;  %s428_s9 = scalar_lea.vmem [#allocation12], %s5295_s21 }
  0x2e   : > { %s434_s15 = sshll.u32 %s433_s27, 4  ;;  %s344_s18 = sshll.u32 %s9917_s2, 4  ;;  %s435_s15 = int_to_ptr.hbm [resolvable:$true] %s434_s15  ;;  %s345_s18 = int_to_ptr.hbm [resolvable:$true] %s344_s18 }
  0x2f   : > { %s411_s13 = scalar_lea.hbm %s9949_s4, %s6991_s12  ;;  %s436_s12 = sshll.u32 %s428_s9, 4  ;;  %s437_s12 = int_to_ptr.vmem [resolvable:$true] %s436_s12 }
  0x30   : > { %s412_s20 = sshll.u32 %s411_s13, 4  ;;  %s8096_s4 = smov 512   ;;  %s413_s20 = int_to_ptr.hbm [resolvable:$true] %s412_s20 }
  0x31   : > { %7457 = dma.hbm_to_vmem [thread:$0]  (!%p8255_p0), %s413_s20, 4096, %s415_s3, %s8259_s1, %s8094_s8, %s8094_s8, %s8095_s23  }
  0x32   : > { %s8097_s0 = smov 32   ;;  %s8098_s3 = smov [#allocation8]  }
  0x33   : > { %7460 = dma.hbm_to_vmem [thread:$0]  (!%p8255_p0), %s435_s15, 16384, %s437_s12, %s8259_s1, %s8096_s4, %s8096_s4, %s8097_s0  }
  0x34   : > { %s346_s20 = sshll.u32 %s8098_s3, 4  ;;  %s455_s27 = scalar_lea.hbm %s9921_s6, %s6992_s16  ;;  %s347_s20 = int_to_ptr.vmem [resolvable:$true] %s346_s20 }
  0x35   : > { %7447 = dma.hbm_to_vmem [thread:$0]  (!%p8225_p10), %s345_s18, 256, %s347_s20, [#allocation9], %s8094_s8, %s8094_s8, %s8095_s23  }
  0x36   : > { %s456_s9 = sshll.u32 %s455_s27, 4  ;;  %s450_s28 = scalar_lea.vmem [#allocation13], %s5295_s21  ;;  %s457_s9 = int_to_ptr.hbm [resolvable:$true] %s456_s9 }
  0x37   : > { %s458_s13 = sshll.u32 %s450_s28, 4  ;;  %s364_s16 = sshll.u32 %s9925_s10, 4  ;;  %s459_s13 = int_to_ptr.vmem [resolvable:$true] %s458_s13  ;;  %s365_s16 = int_to_ptr.hbm [resolvable:$true] %s364_s16 }
  0x38   : > { %7463 = dma.hbm_to_vmem [thread:$0]  (!%p8255_p0), %s457_s9, 16384, %s459_s13, %s8259_s1, %s8094_s8, %s8094_s8, %s8095_s23  }
  0x39   : > { %s8099_s12 = smov [#allocation15]   ;;  %s5301_s18 = sshll.u32 %s8235_s30, 6 }
  0x3a   : > { %s366_s15 = sshll.u32 %s8099_s12, 4  ;;  %s6994_s21 = sshll.u32 %s8082_s25, 6  ;;  %s367_s15 = int_to_ptr.vmem [resolvable:$true] %s366_s15 }
  0x3b   : > { %7450 = dma.hbm_to_vmem [thread:$0]  (!%p8225_p10), %s365_s16, 4096, %s367_s15, [#allocation9], %s8094_s8, %s8094_s8, %s8095_s23  }
  0x3c   : > { %s477_s19 = scalar_lea.hbm %s9922_s7, %s6994_s21  ;;  %s472_s11 = scalar_lea.vmem [#allocation14], %s5301_s18 }
  0x3d   : > { %s481_s27 = sshll.u32 %s472_s11, 4  ;;  %s479_s9 = sshll.u32 %s477_s19, 4  ;;  %s482_s27 = int_to_ptr.vmem [resolvable:$true] %s481_s27  ;;  %s480_s9 = int_to_ptr.hbm [resolvable:$true] %s479_s9 }
  0x3e   : > { %7466 = dma.hbm_to_vmem [thread:$0]  (!%p8255_p0), %s480_s9, 1024, %s482_s27, %s8259_s1  }
  0x3f   : > { %490 = sbr.rel (%p8217_p8) target bundleno = 2615 (0xa37), region = 60 }
  0x44   : > { %8045 = dma.done.wait (%p112_p3), [#allocation6], 1024  }
  0x45   : > { %8047 = vsyncadd (%p112_p3), [#allocation6], 4294966272 }
  0x46   : > { %8049 = dma.done.wait (%p112_p3), [#allocation9], 256  }
  0x47   : > { %8051 = vsyncadd (%p112_p3), [#allocation9], 4294967040  ;;  %s502_s8 = sand.u32 1, %s8194_s26   ;;  %s504_s23 = sand.u32 1, %s8070_s22  }
  0x48   : > { %s7414_s24 = smul.u32 768, %s504_s23  ;;  %s503_s14 = scalar_lea.sflag [#allocation6], %s502_s8 }
  0x4a   : > { %s8328_s17 = scalar_lea.vmem [#allocation10], %s7414_s24 }
  0x4b   : > { %8053 = dma.done.wait (%p8209_p6), %s503_s14, 50176  }
  0x4c   : > { %8055 = vsyncadd (%p8209_p6), %s503_s14, 4294917120  ;;  %s5307_s30 = sshll.u32 %s504_s23, 8  ;;  %s5308_s1 = sshll.u32 %s504_s23, 10 }
  0x4d   : > { %s5310_s28 = sshll.u32 %s504_s23, 6  ;;  %s8334_s13 = scalar_lea.vmem [#allocation11], %s5307_s30 }
  0x4e   : > { %s8336_s4 = scalar_lea.vmem [#allocation12], %s5308_s1  ;;  %s8338_s0 = scalar_lea.vmem [#allocation13], %s5308_s1 }
  0x4f   : > { %s8340_s16 = scalar_lea.vmem [#allocation14], %s5310_s28 }
  0x50   : > { %8057 = dma.done.wait (%p112_p3), [#allocation9], 4096  }
  0x51   : > { %8059 = vsyncadd (%p112_p3), [#allocation9], 4294963200  ;;  %s9950_s12 = sld [smem:[#allocation24_spill]] }
  0x57   : > { %p5312_p1 = scmp.ne.s32.totalorder %s9950_s12, 0 }
  0x59   : > { %609 = sbr.rel (%p5312_p1) target bundleno = 103 (0x67), region = 96 }
  0x5e   : > { %v610_v0 = vld [vmem:[#allocation5] sm:$0xff]  ;;  %v611_v1 = vld [vmem:[#allocation5 + $0x8] sm:$0xff]  ;;  %v612_v2 = vld [vmem:[#allocation5 + $0x10] sm:$0xff] }
  0x5f   : > { %618 = vst [vmem:[#allocation2] sm:$0xff] %v610_v0  ;;  %v613_v3 = vld [vmem:[#allocation5 + $0x18] sm:$0xff]  ;;  %v614_v4 = vld [vmem:[#allocation5 + $0x20] sm:$0xff]  ;;  %v615_v5 = vld [vmem:[#allocation5 + $0x28] sm:$0xff] }
  0x60   : > { %619 = vst [vmem:[#allocation2 + $0x8] sm:$0xff] %v611_v1  ;;  %v616_v6 = vld [vmem:[#allocation5 + $0x30] sm:$0xff]  ;;  %v617_v7 = vld [vmem:[#allocation5 + $0x38] sm:$0xff] }
  0x61   : > { %620 = vst [vmem:[#allocation2 + $0x10] sm:$0xff] %v612_v2 }
  0x62   : > { %621 = vst [vmem:[#allocation2 + $0x18] sm:$0xff] %v613_v3 }
  0x63   : > { %622 = vst [vmem:[#allocation2 + $0x20] sm:$0xff] %v614_v4 }
  0x64   : > { %623 = vst [vmem:[#allocation2 + $0x28] sm:$0xff] %v615_v5 }
  0x65   : > { %624 = vst [vmem:[#allocation2 + $0x30] sm:$0xff] %v616_v6 }
  0x66   : > { %625 = vst [vmem:[#allocation2 + $0x38] sm:$0xff] %v617_v7 }
  0x67 PF: > { %v626_v10 = vld [vmem:[#allocation2] sm:$0xff]  ;;  %v627_v12 = vld [vmem:[#allocation2 + $0x8] sm:$0xff]  ;;  %v8100_v20 = vmov 256.0   ;;  %v7040_v56 = vld [vmem:[%s8328_s17 + $0x164] sm:$0xf0]  ;;  %vm1657_vm13 = vcmask 130048  }
  0x68   : > { %v642_v13 = vadd.f32 %v627_v12, %v626_v10  ;;  %v628_v16 = vld [vmem:[#allocation2 + $0x10] sm:$0xff]  ;;  %7538 = vrcp.f32 %v8100_v20  ;;  %v5483_v55 = vld [vmem:[%s8328_s17 + $0x150] sm:$0xf]  ;;  %v7088_v59 = vld [vmem:[%s8328_s17 + $0x2e4] sm:$0xf0]  ;;  %s9955_s29 = sld [smem:[#allocation24_spill]] }
  0x69   : > { %v629_v17 = vld [vmem:[#allocation2 + $0x18] sm:$0xff]  ;;  %v5675_v57 = vld [vmem:[%s8328_s17 + $0x2d0] sm:$0xf]  ;;  %v5484_v58 = vor.u32 %v7040_v56, %v5483_v55  ;;  %v7037_v60 = vld [vmem:[%s8328_s17 + $0x154] sm:$0xf] }
  0x6a   : > { %v630_v8 = vld [vmem:[#allocation2 + $0x20] sm:$0xff]  ;;  %643 = vadd.xlane.f32.xlu0 %v642_v13  ;;  %v645_v19 = vadd.f32 %v629_v17, %v628_v16  ;;  %v5485_v61 = vld [vmem:[%s8328_s17 + $0x168] sm:$0xf0]  ;;  %v5676_v62 = vor.u32 %v7088_v59, %v5675_v57  ;;  %v5459_v3 = vld [vmem:[%s8328_s17 + $0x120] sm:$0xf] }
  0x6b   : > { %v631_v9 = vld [vmem:[#allocation2 + $0x28] sm:$0xff]  ;;  %v5488_v63 = vor.u32 %v7037_v60, %v5485_v61  ;;  %v7085_v0 = vld [vmem:[%s8328_s17 + $0x2d4] sm:$0xf]  ;;  %v5677_v1 = vld [vmem:[%s8328_s17 + $0x2e8] sm:$0xf0]  ;;  %1355 = vmatpush.bf16.msra.mxu0 %v5484_v58 }
  0x6c   : > { %v648_v11 = vadd.f32 %v631_v9, %v630_v8  ;;  %v632_v14 = vld [vmem:[#allocation2 + $0x30] sm:$0xff]  ;;  %v5680_v2 = vor.u32 %v7085_v0, %v5677_v1  ;;  %1374 = vmatpush.bf16.msra.mxu1 %v5676_v62  ;;  %v7034_v4 = vld [vmem:[%s8328_s17 + $0x134] sm:$0xf0]  ;;  %v5653_v13 = vld [vmem:[%s8328_s17 + $0x2b8] sm:$0xf0] }
  0x6d   : > { %v633_v15 = vld [vmem:[#allocation2 + $0x38] sm:$0xff]  ;;  %1393 = vmatpush.bf16.msra.mxu2 %v5488_v63  ;;  %v5651_v5 = vld [vmem:[%s8328_s17 + $0x2a0] sm:$0xf]  ;;  %v5460_v6 = vor.u32 %v7034_v4, %v5459_v3  ;;  %v7082_v7 = vld [vmem:[%s8328_s17 + $0x2b4] sm:$0xf0] }
  0x6e   : > { %649 = vadd.xlane.f32.xlu1 %v648_v11  ;;  %v651_v18 = vadd.f32 %v633_v15, %v632_v14  ;;  %v7539_v21 = vpop.eup %7538  ;;  %1412 = vmatpush.bf16.msra.mxu3 %v5680_v2  ;;  %v7025_v20 = vld [vmem:[%s8328_s17 + $0xf4] sm:$0xf]  ;;  %v5581_v58 = vld [vmem:[%s8328_s17 + $0x228] sm:$0xf0]  ;;  %v5363_v60 = vld [vmem:[%s8328_s17 + $0x60] sm:$0xf] }
  0x6f   : > { %v655_v22 = vmul.f32 256.0, %v7539_v21  ;;  %vm659_vm0 = vweird.f32 %v7539_v21  ;;  %1356 = vmatpush.bf16.msra.mxu0 %v5460_v6  ;;  %v7061_v57 = vld [vmem:[%s8328_s17 + $0x214] sm:$0xf]  ;;  %v7010_v61 = vld [vmem:[%s8328_s17 + $0x74] sm:$0xf0]  ;;  %p6853_p2 = scmp.ne.s32.totalorder %s9955_s29, 1 }
  0x70   : > { %v5584_v59 = vor.u32 %v7061_v57, %v5581_v58  ;;  %v5555_v62 = vld [vmem:[%s8328_s17 + $0x1e0] sm:$0xf]  ;;  %v5364_v63 = vor.u32 %v7010_v61, %v5363_v60  ;;  %v7058_v0 = vld [vmem:[%s8328_s17 + $0x1f4] sm:$0xf0]  ;;  %v7007_v1 = vld [vmem:[%s8328_s17 + $0x64] sm:$0xf] }
  0x71   : > { %v656_v23 = vsub.f32 1.0, %v655_v22  ;;  %v5365_v2 = vld [vmem:[%s8328_s17 + $0x78] sm:$0xf0]  ;;  %v5556_v3 = vor.u32 %v7058_v0, %v5555_v62  ;;  %v5685_v60 = vld [vmem:[%s8328_s17 + $0x2f0] sm:$0xf0]  ;;  %s4743_s15 = sld [smem:[#allocation4]] (!%p6853_p2) }
  0x72   : > { %646 = vadd.xlane.f32.xlu0 %v645_v19  ;;  %v7076_v19 = vld [vmem:[%s8328_s17 + $0x284] sm:$0xf0]  ;;  %v5368_v4 = vor.u32 %v7007_v1, %v5365_v2  ;;  %v5557_v6 = vld [vmem:[%s8328_s17 + $0x1f8] sm:$0xf0]  ;;  %v7035_v0 = vld [vmem:[%s8328_s17 + $0x13c] sm:$0xf0] }
  0x73   : > { %v657_v24 = vmul.f32 %v7539_v21, %v656_v23  ;;  %v5467_v61 = vld [vmem:[%s8328_s17 + $0x128] sm:$0xf]  ;;  %v7083_v2 = vld [vmem:[%s8328_s17 + $0x2bc] sm:$0xf0]  ;;  %s6856_s18 = sld [smem:[#allocation4 + $0x1]] (!%p6853_p2) }
  0x74   : > { %v5659_v1 = vld [vmem:[%s8328_s17 + $0x2a8] sm:$0xf]  ;;  %s9956_s30 = sld [smem:[#allocation31_spill]] (!%p6853_p2) }
  0x75   : > { %v658_v25 = vadd.f32 %v7539_v21, %v657_v24  ;;  %v7073_v24 = vld [vmem:[%s8328_s17 + $0x274] sm:$0xf] }
  0x76   : > { %652 = vadd.xlane.f32.xlu1 %v651_v18 }
  0x77   : > { %v8347_v26 = vsel %vm659_vm0, %v7539_v21, %v658_v25  ;;  %v5437_v21 = vld [vmem:[%s8328_s17 + $0x108] sm:$0xf0]  ;;  %s4744_s21 = sshra.s32 (!%p6853_p2), %s4743_s15, 3  ;;  %s4747_s3 = sand.u32 (!%p6853_p2), 7, %s4743_s15 }
  0x78   : > { %v5440_v23 = vor.u32 %v7025_v20, %v5437_v21  ;;  %v5629_v25 = vld [vmem:[%s8328_s17 + $0x288] sm:$0xf0]  ;;  %s7379_s20 = sshll.u32 (!%p6853_p2), %s4744_s21, 4 }
  0x79   : > { %s4755_s19 = sshra.s32 (!%p6853_p2), %s6856_s18, 3  ;;  %s4750_s11 = sadd.s32 (!%p6853_p2), %s7379_s20, %s4747_s3 }
  0x7a   : > { %s4758_s27 = sand.u32 (!%p6853_p2), 7, %s6856_s18  ;;  %s6857_s9 = sshll.u32 (!%p6853_p2), %s4755_s19, 4 }
  0x7b   : > { %s4751_s8 = scalar_lea.vmem (!%p6853_p2), [#allocation2], %s4750_s11  ;;  %s5188_s23 = sadd.s32 (!%p6853_p2), %s6857_s9, %s4758_s27 }
  0x7c   : > { %s5189_s24 = scalar_lea.vmem (!%p6853_p2), [#allocation2], %s5188_s23 }
  0xdd   : > { %v644_v29 = vpop.xlane.xlu0 %643 }
  0xde   : > { %v661_v30 = vmul.f32 %v8347_v26, %v644_v29  ;;  %v7022_v29 = vld [vmem:[%s8328_s17 + $0xd4] sm:$0xf0] }
  0xe0   : > { %v8355_v33 = vsub.f32 %v626_v10, %v661_v30  ;;  %v8357_v34 = vsub.f32 %v627_v12, %v661_v30  ;;  %v5652_v10 = vor.u32 %v7082_v7, %v5651_v5  ;;  %v7079_v12 = vld [vmem:[%s8328_s17 + $0x2a4] sm:$0xf]  ;;  %v5603_v30 = vld [vmem:[%s8328_s17 + $0x240] sm:$0xf] }
  0xe1   : > { %v650_v27 = vpop.xlane.xlu1 %649  ;;  %v7055_v5 = vld [vmem:[%s8328_s17 + $0x1e4] sm:$0xf] }
  0xe2   : > { %v663_v28 = vmul.f32 %v8347_v26, %v650_v27  ;;  %v673_v37 = vmul.f32 %v8355_v33, %v8355_v33  ;;  %v674_v38 = vmul.f32 %v8357_v34, %v8357_v34  ;;  %1375 = vmatpush.bf16.msra.mxu1 %v5652_v10  ;;  %v5632_v27 = vor.u32 %v7073_v24, %v5629_v25  ;;  %v5531_v10 = vld [vmem:[%s8328_s17 + $0x1b0] sm:$0xf]  ;;  %v5315_v24 = vld [vmem:[%s8328_s17] sm:$0xf]  ;;  %v6998_v25 = vld [vmem:[%s8328_s17 + $0x14] sm:$0xf0] }
  0xe3   : > { %v5560_v7 = vor.u32 %v7055_v5, %v5557_v6  ;;  %v5468_v5 = vor.u32 %v7035_v0, %v5467_v61  ;;  %v5660_v6 = vor.u32 %v7083_v2, %v5659_v1 }
  0xe4   : > { %v8351_v31 = vsub.f32 %v630_v8, %v663_v28  ;;  %v8353_v32 = vsub.f32 %v631_v9, %v663_v28  ;;  %v681_v41 = vadd.f32 %v674_v38, %v673_v37  ;;  %v7031_v8 = vld [vmem:[%s8328_s17 + $0x124] sm:$0xf]  ;;  %v5461_v9 = vld [vmem:[%s8328_s17 + $0x138] sm:$0xf0]  ;;  %v5411_v28 = vld [vmem:[%s8328_s17 + $0xc0] sm:$0xf] }
  0xe5   : > { %v647_v43 = vpop.xlane.xlu0 %646  ;;  %v5464_v11 = vor.u32 %v7031_v8, %v5461_v9  ;;  %v7019_v37 = vld [vmem:[%s8328_s17 + $0xc4] sm:$0xf]  ;;  %v5413_v38 = vld [vmem:[%s8328_s17 + $0xd8] sm:$0xf0]  ;;  %v5339_v8 = vld [vmem:[%s8328_s17 + $0x30] sm:$0xf] }
  0xe6   : > { %v677_v35 = vmul.f32 %v8351_v31, %v8351_v31  ;;  %v678_v36 = vmul.f32 %v8353_v32, %v8353_v32  ;;  %v662_v44 = vmul.f32 %v8347_v26, %v647_v43  ;;  %682 = vadd.xlane.f32.xlu2 %v681_v41  ;;  %v7067_v41 = vld [vmem:[%s8328_s17 + $0x244] sm:$0xf]  ;;  %v7004_v9 = vld [vmem:[%s8328_s17 + $0x44] sm:$0xf0] }
  0xe7   : > { %1394 = vmatpush.bf16.msra.mxu2 %v5464_v11  ;;  %v5340_v11 = vor.u32 %v7004_v9, %v5339_v8  ;;  %v5469_v8 = vld [vmem:[%s8328_s17 + $0x140] sm:$0xf0] }
  0xe8   : > { %v687_v39 = vadd.f32 %v678_v36, %v677_v35  ;;  %v8373_v47 = vsub.f32 %v628_v16, %v662_v44  ;;  %v8375_v48 = vsub.f32 %v629_v17, %v662_v44  ;;  %v7028_v16 = vld [vmem:[%s8328_s17 + $0x104] sm:$0xf0]  ;;  %v5627_v17 = vld [vmem:[%s8328_s17 + $0x270] sm:$0xf]  ;;  %v5412_v35 = vor.u32 %v7022_v29, %v5411_v28  ;;  %v7070_v36 = vld [vmem:[%s8328_s17 + $0x254] sm:$0xf0] }
  0xe9   : > { %v653_v40 = vpop.xlane.xlu1 %652  ;;  %v5628_v22 = vor.u32 %v7076_v19, %v5627_v17  ;;  %v5387_v44 = vld [vmem:[%s8328_s17 + $0x90] sm:$0xf]  ;;  %v5533_v19 = vld [vmem:[%s8328_s17 + $0x1c8] sm:$0xf0]  ;;  %v5316_v29 = vor.u32 %v6998_v25, %v5315_v24  ;;  %v7026_v24 = vld [vmem:[%s8328_s17 + $0xfc] sm:$0xf] }
  0xea   : > { %v664_v42 = vmul.f32 %v8347_v26, %v653_v40  ;;  %688 = vadd.xlane.f32.xlu0 %v687_v39  ;;  %v675_v51 = vmul.f32 %v8373_v47, %v8373_v47  ;;  %v676_v52 = vmul.f32 %v8375_v48, %v8375_v48  ;;  %v5604_v39 = vor.u32 %v7070_v36, %v5603_v30  ;;  %v7046_v30 = vld [vmem:[%s8328_s17 + $0x194] sm:$0xf0]  ;;  %v5445_v25 = vld [vmem:[%s8328_s17 + $0x110] sm:$0xf0] }
  0xeb   : > { %1376 = vmatpush.bf16.msra.mxu1 %v5628_v22  ;;  %1395 = vmatpush.bf16.msra.mxu2 %v5440_v23  ;;  %v5416_v40 = vor.u32 %v7019_v37, %v5413_v38  ;;  %v5317_v38 = vld [vmem:[%s8328_s17 + $0x18] sm:$0xf0] }
  0xec   : > { %v8369_v45 = vsub.f32 %v632_v14, %v664_v42  ;;  %v8371_v46 = vsub.f32 %v633_v15, %v664_v42  ;;  %v684_v54 = vadd.f32 %v676_v52, %v675_v51  ;;  %v5656_v14 = vor.u32 %v7079_v12, %v5653_v13  ;;  %v5435_v15 = vld [vmem:[%s8328_s17 + $0xf0] sm:$0xf]  ;;  %v5605_v42 = vld [vmem:[%s8328_s17 + $0x258] sm:$0xf0]  ;;  %v7064_v52 = vld [vmem:[%s8328_s17 + $0x224] sm:$0xf0] }
  0xed   : > { %v5436_v18 = vor.u32 %v7028_v16, %v5435_v15  ;;  %v5608_v43 = vor.u32 %v7067_v41, %v5605_v42  ;;  %v7052_v12 = vld [vmem:[%s8328_s17 + $0x1c4] sm:$0xf0]  ;;  %v7001_v13 = vld [vmem:[%s8328_s17 + $0x34] sm:$0xf]  ;;  %v5509_v41 = vld [vmem:[%s8328_s17 + $0x198] sm:$0xf0] }
  0xee   : > { %v679_v49 = vmul.f32 %v8369_v45, %v8369_v45  ;;  %v680_v50 = vmul.f32 %v8371_v46, %v8371_v46  ;;  %685 = vadd.xlane.f32.xlu2 %v684_v54  ;;  %1413 = vmatpush.bf16.msra.mxu3 %v5656_v14  ;;  %v5389_v54 = vld [vmem:[%s8328_s17 + $0xa8] sm:$0xf0]  ;;  %v5532_v16 = vor.u32 %v7052_v12, %v5531_v10 }
  0xef   : > { %1357 = vmatpush.bf16.msra.mxu0 %v5436_v18  ;;  %1377 = vmatpush.bf16.msra.mxu1 %v5604_v39  ;;  %v5341_v14 = vld [vmem:[%s8328_s17 + $0x48] sm:$0xf0]  ;;  %v7049_v18 = vld [vmem:[%s8328_s17 + $0x1b4] sm:$0xf]  ;;  %v7043_v39 = vld [vmem:[%s8328_s17 + $0x184] sm:$0xf] }
  0xf0   : > { %v690_v53 = vadd.f32 %v680_v50, %v679_v49  ;;  %1396 = vmatpush.bf16.msra.mxu2 %v5416_v40  ;;  %v7016_v49 = vld [vmem:[%s8328_s17 + $0xa4] sm:$0xf0]  ;;  %v5579_v50 = vld [vmem:[%s8328_s17 + $0x210] sm:$0xf]  ;;  %v5344_v17 = vor.u32 %v7001_v13, %v5341_v14  ;;  %v5536_v22 = vor.u32 %v7049_v18, %v5533_v19  ;;  %v5512_v42 = vor.u32 %v7043_v39, %v5509_v41  ;;  %v7080_v12 = vld [vmem:[%s8328_s17 + $0x2ac] sm:$0xf] }
  0xf1   : > { %v5388_v51 = vor.u32 %v7016_v49, %v5387_v44  ;;  %v5580_v55 = vor.u32 %v7064_v52, %v5579_v50  ;;  %v7041_v44 = vld [vmem:[%s8328_s17 + $0x16c] sm:$0xf0]  ;;  %v5683_v49 = vld [vmem:[%s8328_s17 + $0x2d8] sm:$0xf]  ;;  %v5661_v13 = vld [vmem:[%s8328_s17 + $0x2c0] sm:$0xf0] }
  0xf2   : > { %691 = vadd.xlane.f32.xlu1 %v690_v53  ;;  %1414 = vmatpush.bf16.msra.mxu3 %v5632_v27  ;;  %v7013_v53 = vld [vmem:[%s8328_s17 + $0x94] sm:$0xf]  ;;  %v5507_v27 = vld [vmem:[%s8328_s17 + $0x180] sm:$0xf]  ;;  %v7089_v52 = vld [vmem:[%s8328_s17 + $0x2ec] sm:$0xf0]  ;;  %v5664_v18 = vor.u32 %v7080_v12, %v5661_v13 }
  0xf3   : > { %1358 = vmatpush.bf16.msra.mxu0 %v5412_v35  ;;  %v5392_v56 = vor.u32 %v7013_v53, %v5389_v54  ;;  %1378 = vmatpush.bf16.msra.mxu1 %v5580_v55  ;;  %v6995_v35 = vld [vmem:[%s8328_s17 + $0x4] sm:$0xf]  ;;  %v5508_v37 = vor.u32 %v7046_v30, %v5507_v27  ;;  %v7038_v53 = vld [vmem:[%s8328_s17 + $0x15c] sm:$0xf]  ;;  %v5493_v54 = vld [vmem:[%s8328_s17 + $0x170] sm:$0xf0]  ;;  %v5684_v57 = vor.u32 %v7089_v52, %v5683_v49 }
  0xf4   : > { %v5320_v40 = vor.u32 %v6995_v35, %v5317_v38  ;;  %v5496_v58 = vor.u32 %v7038_v53, %v5493_v54  ;;  %v5635_v19 = vld [vmem:[%s8328_s17 + $0x278] sm:$0xf]  ;;  %v7074_v27 = vld [vmem:[%s8328_s17 + $0x27c] sm:$0xf]  ;;  %v5637_v30 = vld [vmem:[%s8328_s17 + $0x290] sm:$0xf0] }
  0xf5   : > { %1397 = vmatpush.bf16.msra.mxu2 %v5392_v56  ;;  %v5419_v35 = vld [vmem:[%s8328_s17 + $0xc8] sm:$0xf]  ;;  %v5640_v38 = vor.u32 %v7074_v27, %v5637_v30  ;;  %v7023_v39 = vld [vmem:[%s8328_s17 + $0xdc] sm:$0xf0]  ;;  %v7020_v49 = vld [vmem:[%s8328_s17 + $0xcc] sm:$0xf] }
  0xf6   : > { %1415 = vmatpush.bf16.msra.mxu3 %v5608_v43  ;;  %v5491_v43 = vld [vmem:[%s8328_s17 + $0x158] sm:$0xf]  ;;  %v8502_v41 = vld [vmem:[%s8340_s16] sm:$0xff]  ;;  %v7065_v13 = vld [vmem:[%s8328_s17 + $0x22c] sm:$0xf0] }
  0xf7   : > { %1359 = vmatpush.bf16.msra.mxu0 %v5388_v51  ;;  %1379 = vmatpush.bf16.msra.mxu1 %v5556_v3  ;;  %v5492_v51 = vor.u32 %v7041_v44, %v5491_v43  ;;  %v5420_v43 = vor.u32 %v7023_v39, %v5419_v35  ;;  %v7071_v44 = vld [vmem:[%s8328_s17 + $0x25c] sm:$0xf0]  ;;  %v5421_v54 = vld [vmem:[%s8328_s17 + $0xe0] sm:$0xf0]  ;;  %v5563_v35 = vld [vmem:[%s8328_s17 + $0x1e8] sm:$0xf] }
  0xf8   : > { %v7011_v30 = vld [vmem:[%s8328_s17 + $0x7c] sm:$0xf0]  ;;  %v5373_v39 = vld [vmem:[%s8328_s17 + $0x80] sm:$0xf0] }
  0xf9   : > { %1398 = vmatpush.bf16.msra.mxu2 %v5368_v4 }
  0xfa   : > { %1416 = vmatpush.bf16.msra.mxu3 %v5584_v59  ;;  %v7086_v59 = vld [vmem:[%s8328_s17 + $0x2dc] sm:$0xf] }
  0xfb   : > { %1360 = vmatpush.bf16.msra.mxu0 %v5364_v63  ;;  %1380 = vmatpush.bf16.msra.mxu1 %v5532_v16  ;;  %v5688_v63 = vor.u32 %v7086_v59, %v5685_v60  ;;  %v7029_v16 = vld [vmem:[%s8328_s17 + $0x10c] sm:$0xf0]  ;;  %v5613_v59 = vld [vmem:[%s8328_s17 + $0x260] sm:$0xf0] }
  0xfd   : > { %1399 = vmatpush.bf16.msra.mxu2 %v5344_v17 }
  0xfe   : > { %1417 = vmatpush.bf16.msra.mxu3 %v5560_v7  ;;  %v7032_v7 = vld [vmem:[%s8328_s17 + $0x12c] sm:$0xf] }
  0xff   : > { %1361 = vmatpush.bf16.msra.mxu0 %v5340_v11  ;;  %1381 = vmatpush.bf16.msra.mxu1 %v5508_v37  ;;  %v5472_v11 = vor.u32 %v7032_v7, %v5469_v8  ;;  %v7017_v7 = vld [vmem:[%s8328_s17 + $0xac] sm:$0xf0]  ;;  %v5587_v8 = vld [vmem:[%s8328_s17 + $0x218] sm:$0xf] }
 0x101   : > { %1400 = vmatpush.bf16.msra.mxu2 %v5320_v40  ;;  %v5611_v40 = vld [vmem:[%s8328_s17 + $0x248] sm:$0xf] }
 0x102   : > { %1418 = vmatpush.bf16.msra.mxu3 %v5536_v22  ;;  %v5612_v53 = vor.u32 %v7071_v44, %v5611_v40  ;;  %v7056_v44 = vld [vmem:[%s8328_s17 + $0x1ec] sm:$0xf] }
 0x103   : > { %1362 = vmatpush.bf16.msra.mxu0 %v5316_v29  ;;  %1450 = vmatpush.bf16.msrb.mxu1 %v5684_v57  ;;  %v5448_v29 = vor.u32 %v7026_v24, %v5445_v25  ;;  %v5371_v24 = vld [vmem:[%s8328_s17 + $0x68] sm:$0xf] }
 0x105   : > { %1469 = vmatpush.bf16.msrb.mxu2 %v5496_v58  ;;  %v5424_v58 = vor.u32 %v7020_v49, %v5421_v54  ;;  %v5565_v49 = vld [vmem:[%s8328_s17 + $0x200] sm:$0xf0]  ;;  %v7005_v54 = vld [vmem:[%s8328_s17 + $0x4c] sm:$0xf0] }
 0x106   : > { %1419 = vmatpush.bf16.msra.mxu3 %v5512_v42 }
 0x107   : > { %1431 = vmatpush.bf16.msrb.mxu0 %v5492_v51  ;;  %1451 = vmatpush.bf16.msrb.mxu1 %v5660_v6  ;;  %v8510_v51 = vld [vmem:[%s8340_s16 + $0x8] sm:$0xff]  ;;  %v5395_v6 = vld [vmem:[%s8328_s17 + $0x98] sm:$0xf] }
 0x108   : > { %v8528_v0 = vperm.slane %v8510_v51, 0 }
 0x109   : > { %1470 = vmatpush.bf16.msrb.mxu2 %v5472_v11  ;;  %v8541_v11 = vperm.slane %v8502_v41, 1 }
 0x10a   : > { %1488 = vmatpush.bf16.msrb.mxu3 %v5688_v63  ;;  %v8525_v63 = vperm.slane %v8502_v41, 0 }
 0x10b   : > { %1432 = vmatpush.bf16.msrb.mxu0 %v5468_v5 }
 0x10d   : > { %1471 = vmatpush.bf16.msrb.mxu2 %v5448_v29 }
 0x10e   : > { %1489 = vmatpush.bf16.msrb.mxu3 %v5664_v18  ;;  %v5397_v18 = vld [vmem:[%s8328_s17 + $0xb0] sm:$0xf0] }
 0x111   : > { %1472 = vmatpush.bf16.msrb.mxu2 %v5424_v58 }
 0x112   : > { %1490 = vmatpush.bf16.msrb.mxu3 %v5640_v38  ;;  %v7008_v38 = vld [vmem:[%s8328_s17 + $0x6c] sm:$0xf] }
 0x159   : > { %v683_v20 = vpop.xlane.xlu2 %682 }
 0x15a   : > { %v693_v23 = vmul.f32 %v683_v20, %v8347_v26  ;;  %v7077_v20 = vld [vmem:[%s8328_s17 + $0x28c] sm:$0xf0] }
 0x15c   : > { %v8450_v36 = vadd.f32 1e-05, %v693_v23  ;;  %v5636_v23 = vor.u32 %v7077_v20, %v5635_v19  ;;  %v7062_v19 = vld [vmem:[%s8328_s17 + $0x21c] sm:$0xf] }
 0x15d   : > { %v689_v15 = vpop.xlane.xlu0 %688 }
 0x15e   : > { %v695_v21 = vmul.f32 %v689_v15, %v8347_v26  ;;  %v5443_v15 = vld [vmem:[%s8328_s17 + $0xf8] sm:$0xf]  ;;  %1452 = vmatpush.bf16.msrb.mxu1 %v5636_v23  ;;  %vm707_vm2 = vweird.f32 %v8450_v36  ;;  %v5589_v23 = vld [vmem:[%s8328_s17 + $0x230] sm:$0xf0] }
 0x15f   : > { %v5444_v22 = vor.u32 %v7029_v16, %v5443_v15  ;;  %v8549_v15 = vperm.slane %v8510_v51, 1 }
 0x160   : > { %v8446_v28 = vadd.f32 1e-05, %v695_v21 }
 0x161   : > { %v686_v56 = vpop.xlane.xlu2 %685  ;;  %1433 = vmatpush.bf16.msrb.mxu0 %v5444_v22 }
 0x162   : > { %7540 = vrsqrt.f32 %v8446_v28  ;;  %v694_v62 = vmul.f32 %v686_v56, %v8347_v26  ;;  %1453 = vmatpush.bf16.msrb.mxu1 %v5612_v53  ;;  %v5568_v53 = vor.u32 %v7056_v44, %v5565_v49  ;;  %vm727_vm7 = vweird.f32 %v8446_v28  ;;  %v7087_v49 = vld [vmem:[%s8328_s17 + $0x2e4] sm:$0xf] }
 0x163   : > { %7542 = vrsqrt.f32 %v8450_v36 }
 0x164   : > { %v8479_v10 = vadd.f32 1e-05, %v694_v62 }
 0x165   : > { %v692_v50 = vpop.xlane.xlu1 %691  ;;  %1434 = vmatpush.bf16.msrb.mxu0 %v5420_v43  ;;  %v5376_v43 = vor.u32 %v7008_v38, %v5373_v39 }
 0x166   : > { %v696_v55 = vmul.f32 %v692_v50, %v8347_v26  ;;  %vm717_vm5 = vweird.f32 %v8479_v10 }
 0x168   : > { %v8471_v3 = vpop.eup %7540  ;;  %v8473_v4 = vadd.f32 1e-05, %v696_v55  ;;  %v7068_v55 = vld [vmem:[%s8328_s17 + $0x24c] sm:$0xf] }
 0x169   : > { %v8477_v9 = vpop.eup %7542  ;;  %v722_v17 = vmul.f32 %v8471_v3, %v8446_v28  ;;  %v5616_v62 = vor.u32 %v7068_v55, %v5613_v59  ;;  %v5539_v55 = vld [vmem:[%s8328_s17 + $0x1b8] sm:$0xf]  ;;  %vm728_vm10 = vweird.f32 %v8471_v3 }
 0x16a   : > { %v702_v14 = vmul.f32 %v8477_v9, %v8450_v36  ;;  %7544 = vrsqrt.f32 %v8473_v4  ;;  %vm708_vm1 = vweird.f32 %v8477_v9  ;;  %vm737_vm8 = vweird.f32 %v8473_v4  ;;  %vm729_vm12 = vmor %vm727_vm7, %vm728_vm10  ;;  %v7042_v28 = vld [vmem:[%s8328_s17 + $0x174] sm:$0xf0] }
 0x16b   : > { %7546 = vrsqrt.f32 %v8479_v10  ;;  %v723_v42 = vmul.f32 %v8471_v3, %v722_v17  ;;  %vm709_vm3 = vmor %vm707_vm2, %vm708_vm1  ;;  %1491 = vmatpush.bf16.msrb.mxu3 %v5616_v62  ;;  %v5588_v17 = vor.u32 %v7065_v13, %v5587_v8  ;;  %v7002_v62 = vld [vmem:[%s8328_s17 + $0x3c] sm:$0xf]  ;;  %v5541_v8 = vld [vmem:[%s8328_s17 + $0x1d0] sm:$0xf0] }
 0x16c   : > { %v703_v21 = vmul.f32 %v8477_v9, %v702_v14  ;;  %v7014_v14 = vld [vmem:[%s8328_s17 + $0x9c] sm:$0xf] }
 0x16d   : > { %v8532_v1 = vmul.f32 0.5, %v723_v42  ;;  %v5400_v22 = vor.u32 %v7014_v14, %v5397_v18  ;;  %1454 = vmatpush.bf16.msrb.mxu1 %v5588_v17  ;;  %v6996_v17 = vld [vmem:[%s8328_s17 + $0xc] sm:$0xf] }
 0x16e   : > { %v704_v37 = vmul.f32 0.5, %v703_v21 }
 0x16f   : > { %v725_v21 = vsub.f32 1.5, %v8532_v1  ;;  %1473 = vmatpush.bf16.msrb.mxu2 %v5400_v22  ;;  %v5349_v1 = vld [vmem:[%s8328_s17 + $0x50] sm:$0xf0]  ;;  %v5325_v22 = vld [vmem:[%s8328_s17 + $0x20] sm:$0xf0] }
 0x170   : > { %v8507_v50 = vpop.eup %7544  ;;  %v705_v52 = vsub.f32 1.5, %v704_v37  ;;  %v7059_v37 = vld [vmem:[%s8328_s17 + $0x1fc] sm:$0xf0] }
 0x171   : > { %v8515_v56 = vpop.eup %7546  ;;  %v732_v57 = vmul.f32 %v8507_v50, %v8473_v4  ;;  %v5564_v42 = vor.u32 %v7059_v37, %v5563_v35  ;;  %vm738_vm9 = vweird.f32 %v8507_v50  ;;  %v726_v18 = vmul.f32 %v8471_v3, %v725_v21  ;;  %v5691_v37 = vld [vmem:[%s8328_s17 + $0x2e0] sm:$0xf] }
 0x172   : > { %v706_v60 = vmul.f32 %v8477_v9, %v705_v52  ;;  %v712_v61 = vmul.f32 %v8515_v56, %v8479_v10  ;;  %vm718_vm4 = vweird.f32 %v8515_v56  ;;  %v5592_v10 = vor.u32 %v7062_v19, %v5589_v23  ;;  %v5347_v52 = vld [vmem:[%s8328_s17 + $0x38] sm:$0xf]  ;;  %v7044_v23 = vld [vmem:[%s8328_s17 + $0x18c] sm:$0xf]  ;;  %vm739_vm11 = vmor %vm737_vm8, %vm738_vm9 }
 0x173   : > { %v733_v2 = vmul.f32 %v8507_v50, %v732_v57  ;;  %vm8562_vm6 = vmor %vm717_vm5, %vm718_vm4  ;;  %v7053_v57 = vld [vmem:[%s8328_s17 + $0x1cc] sm:$0xf0]  ;;  %1455 = vmatpush.bf16.msrb.mxu1 %v5564_v42  ;;  %1474 = vmatpush.bf16.msrb.mxu2 %v5376_v43  ;;  %v5328_v4 = vor.u32 %v6996_v17, %v5325_v22  ;;  %v730_v38 = vsel %vm729_vm12, %v8471_v3, %v726_v18  ;;  %v7039_v42 = vld [vmem:[%s8328_s17 + $0x164] sm:$0xf] }
 0x174   : > { %v710_v36 = vsel %vm709_vm3, %v8477_v9, %v706_v60  ;;  %v713_v5 = vmul.f32 %v8515_v56, %v712_v61  ;;  %v5396_v9 = vor.u32 %v7017_v7, %v5395_v6  ;;  %1492 = vmatpush.bf16.msrb.mxu3 %v5592_v10  ;;  %v5348_v61 = vor.u32 %v7005_v54, %v5347_v52  ;;  %v5693_v3 = vld [vmem:[%s8328_s17 + $0x2f8] sm:$0xf0]  ;;  %v5475_v52 = vld [vmem:[%s8328_s17 + $0x130] sm:$0xf] }
 0x175   : > { %v8543_v12 = vmul.f32 0.5, %v733_v2  ;;  %v741_v20 = vmul.f32 %v710_v36, %v8355_v33  ;;  %v742_v25 = vmul.f32 %v710_v36, %v8357_v34  ;;  %v5372_v34 = vor.u32 %v7011_v30, %v5371_v24  ;;  %v7050_v2 = vld [vmem:[%s8328_s17 + $0x1bc] sm:$0xf]  ;;  %v5517_v24 = vld [vmem:[%s8328_s17 + $0x1a0] sm:$0xf0] }
 0x176   : > { %v714_v16 = vmul.f32 0.5, %v713_v5  ;;  %1435 = vmatpush.bf16.msrb.mxu0 %v5396_v9  ;;  %v5540_v6 = vor.u32 %v7053_v57, %v5539_v55  ;;  %v5352_v7 = vor.u32 %v7002_v62, %v5349_v1  ;;  %v6999_v9 = vld [vmem:[%s8328_s17 + $0x1c] sm:$0xf0]  ;;  %v5520_v30 = vor.u32 %v7044_v23, %v5517_v24  ;;  %v7036_v57 = vld [vmem:[%s8328_s17 + $0x144] sm:$0xf0] }
 0x177   : > { %v735_v27 = vsub.f32 1.5, %v8543_v12  ;;  %v751_v58 = vmul.f32 %v8525_v63, %v741_v20  ;;  %v752_v59 = vmul.f32 %v8528_v0, %v742_v25  ;;  %v5323_v12 = vld [vmem:[%s8328_s17 + $0x8] sm:$0xf]  ;;  %v5696_v55 = vor.u32 %v7087_v49, %v5693_v3  ;;  %v7033_v62 = vld [vmem:[%s8328_s17 + $0x134] sm:$0xf] }
 0x178   : > { %v715_v29 = vsub.f32 1.5, %v714_v16  ;;  %1493 = vmatpush.bf16.msrb.mxu3 %v5568_v53  ;;  %v5324_v16 = vor.u32 %v6999_v9, %v5323_v12  ;;  %1456 = vmatpush.bf16.msrb.mxu1 %v5540_v6  ;;  %v7081_v1 = vld [vmem:[%s8328_s17 + $0x2b4] sm:$0xf]  ;;  %v7030_v6 = vld [vmem:[%s8328_s17 + $0x114] sm:$0xf0] }
 0x179   : > { %v736_v19 = vmul.f32 %v8507_v50, %v735_v27  ;;  %v761_v25 = vadd.f32 %v8541_v11, %v751_v58  ;;  %1475 = vmatpush.bf16.msrb.mxu2 %v5352_v7  ;;  %v5667_v58 = vld [vmem:[%s8328_s17 + $0x2b0] sm:$0xf]  ;;  %v7078_v12 = vld [vmem:[%s8328_s17 + $0x294] sm:$0xf0]  ;;  %v7027_v9 = vld [vmem:[%s8328_s17 + $0x104] sm:$0xf] }
 0x17a   : > { %v716_v40 = vmul.f32 %v8515_v56, %v715_v29  ;;  %1436 = vmatpush.bf16.msrb.mxu0 %v5372_v34  ;;  %v762_v29 = vadd.f32 %v8549_v15, %v752_v59  ;;  %v5499_v34 = vld [vmem:[%s8328_s17 + $0x160] sm:$0xf]  ;;  %v7084_v59 = vld [vmem:[%s8328_s17 + $0x2c4] sm:$0xf0]  ;;  %v5427_v18 = vld [vmem:[%s8328_s17 + $0xd0] sm:$0xf] }
 0x17b   : > { %v740_v35 = vsel %vm739_vm11, %v8507_v50, %v736_v19  ;;  %v5500_v39 = vor.u32 %v7042_v28, %v5499_v34  ;;  %v5501_v50 = vld [vmem:[%s8328_s17 + $0x178] sm:$0xf0]  ;;  %v7024_v23 = vld [vmem:[%s8328_s17 + $0xe4] sm:$0xf0]  ;;  %v5619_v24 = vld [vmem:[%s8328_s17 + $0x250] sm:$0xf] }
 0x17c   : > { %v720_v60 = vsel %vm8562_vm6, %v8515_v56, %v716_v40  ;;  %v5515_v56 = vld [vmem:[%s8328_s17 + $0x188] sm:$0xf]  ;;  %v7090_v40 = vld [vmem:[%s8328_s17 + $0x2f4] sm:$0xf0]  ;;  %v5504_v44 = vor.u32 %v7039_v42, %v5501_v50  ;;  %v747_v53 = vmul.f32 %v740_v35, %v8369_v45  ;;  %v748_v54 = vmul.f32 %v740_v35, %v8371_v46  ;;  %v5477_v46 = vld [vmem:[%s8328_s17 + $0x148] sm:$0xf0] }
 0x17d   : > { %v743_v36 = vmul.f32 %v720_v60, %v8373_v47  ;;  %v744_v5 = vmul.f32 %v720_v60, %v8375_v48  ;;  %v5544_v47 = vor.u32 %v7050_v2, %v5541_v8  ;;  %v7047_v48 = vld [vmem:[%s8328_s17 + $0x19c] sm:$0xf0]  ;;  %v5692_v43 = vor.u32 %v7090_v40, %v5691_v37  ;;  %1476 = vmatpush.bf16.msrb.mxu2 %v5328_v4  ;;  %v5429_v4 = vld [vmem:[%s8328_s17 + $0xe8] sm:$0xf0]  ;;  %v5405_v49 = vld [vmem:[%s8328_s17 + $0xb8] sm:$0xf0] }
 0x17e   : > { %1437 = vmatpush.bf16.msrb.mxu0 %v5348_v61  ;;  %v5516_v20 = vor.u32 %v7047_v48, %v5515_v56  ;;  %v745_v60 = vmul.f32 %v730_v38, %v8351_v31  ;;  %v5476_v61 = vor.u32 %v7036_v57, %v5475_v52  ;;  %v5668_v45 = vor.u32 %v7084_v59, %v5667_v58  ;;  %v5451_v31 = vld [vmem:[%s8328_s17 + $0x100] sm:$0xf]  ;;  %v5453_v48 = vld [vmem:[%s8328_s17 + $0x118] sm:$0xf0]  ;;  %v5621_v35 = vld [vmem:[%s8328_s17 + $0x268] sm:$0xf0] }
 0x17f   : > { %v753_v13 = vmul.f32 %v8525_v63, %v743_v36  ;;  %v754_v14 = vmul.f32 %v8528_v0, %v744_v5  ;;  %1494 = vmatpush.bf16.msrb.mxu3 %v5544_v47  ;;  %v746_v2 = vmul.f32 %v730_v38, %v8353_v32  ;;  %v5480_v36 = vor.u32 %v7033_v62, %v5477_v46  ;;  %v5669_v5 = vld [vmem:[%s8328_s17 + $0x2c8] sm:$0xf0]  ;;  %v5643_v8 = vld [vmem:[%s8328_s17 + $0x280] sm:$0xf]  ;;  %v7075_v32 = vld [vmem:[%s8328_s17 + $0x284] sm:$0xf] }
 0x180   : > { %1457 = vmatpush.bf16.msrb.mxu1 %v5516_v20  ;;  %v5672_v7 = vor.u32 %v7081_v1, %v5669_v5  ;;  %v757_v47 = vmul.f32 %v8525_v63, %v747_v53  ;;  %v758_v56 = vmul.f32 %v8528_v0, %v748_v54  ;;  %v5644_v17 = vor.u32 %v7078_v12, %v5643_v8  ;;  %v5403_v42 = vld [vmem:[%s8328_s17 + $0xa0] sm:$0xf]  ;;  %v7063_v52 = vld [vmem:[%s8328_s17 + $0x224] sm:$0xf]  ;;  %v5597_v53 = vld [vmem:[%s8328_s17 + $0x238] sm:$0xf0] }
 0x181   : > { %v763_v21 = vadd.f32 %v8541_v11, %v753_v13  ;;  %v764_v27 = vadd.f32 %v8549_v15, %v754_v14  ;;  %v5645_v13 = vld [vmem:[%s8328_s17 + $0x298] sm:$0xf0]  ;;  %v755_v14 = vmul.f32 %v8525_v63, %v745_v60  ;;  %v756_v19 = vmul.f32 %v8528_v0, %v746_v2  ;;  %v5595_v50 = vld [vmem:[%s8328_s17 + $0x220] sm:$0xf]  ;;  %v5379_v54 = vld [vmem:[%s8328_s17 + $0x70] sm:$0xf] }
 0x182   : > { %1438 = vmatpush.bf16.msrb.mxu0 %v5324_v16  ;;  %v5452_v16 = vor.u32 %v7030_v6, %v5451_v31  ;;  %v5456_v20 = vor.u32 %v7027_v9, %v5453_v48  ;;  %v5648_v22 = vor.u32 %v7075_v32, %v5645_v13  ;;  %v767_v63 = vadd.f32 %v8541_v11, %v757_v47  ;;  %v7012_v58 = vld [vmem:[%s8328_s17 + $0x84] sm:$0xf0]  ;;  %v5571_v59 = vld [vmem:[%s8328_s17 + $0x1f0] sm:$0xf]  ;;  %v7009_v62 = vld [vmem:[%s8328_s17 + $0x74] sm:$0xf] }
 0x183   : > { %v8617_v33 = vpack.c.bf16 %v763_v21, %v761_v25  ;;  %v8619_v10 = vpack.c.bf16 %v764_v27, %v762_v29  ;;  %1495 = vmatpush.bf16.msrb.mxu3 %v5520_v30  ;;  %v7072_v25 = vld [vmem:[%s8328_s17 + $0x264] sm:$0xf0]  ;;  %v768_v29 = vadd.f32 %v8549_v15, %v758_v56  ;;  %v7021_v21 = vld [vmem:[%s8328_s17 + $0xd4] sm:$0xf]  ;;  %v5428_v27 = vor.u32 %v7024_v23, %v5427_v18  ;;  %v5381_v46 = vld [vmem:[%s8328_s17 + $0x88] sm:$0xf0] }
 0x184   : > { %v5620_v0 = vor.u32 %v7072_v25, %v5619_v24  ;;  %v7069_v30 = vld [vmem:[%s8328_s17 + $0x254] sm:$0xf]  ;;  %v765_v34 = vadd.f32 %v8541_v11, %v755_v14  ;;  %v766_v28 = vadd.f32 %v8549_v15, %v756_v19  ;;  %v7018_v11 = vld [vmem:[%s8328_s17 + $0xb4] sm:$0xf0]  ;;  %v5600_v57 = vor.u32 %v7063_v52, %v5597_v53  ;;  %v7060_v60 = vld [vmem:[%s8328_s17 + $0x204] sm:$0xf0] }
 0x185   : > { %1363 = vmatmul.bf16.vlgmr.msra.gmra.mxu0 %v8617_v33  ;;  %1382 = vmatmul.bf16.vlgmr.msra.gmra.mxu1 %v8619_v10  ;;  %v5624_v40 = vor.u32 %v7069_v30, %v5621_v35  ;;  %v5404_v15 = vor.u32 %v7018_v11, %v5403_v42  ;;  %v7057_v1 = vld [vmem:[%s8328_s17 + $0x1f4] sm:$0xf]  ;;  %v5573_v2 = vld [vmem:[%s8328_s17 + $0x208] sm:$0xf0]  ;;  %v7006_v5 = vld [vmem:[%s8328_s17 + $0x54] sm:$0xf0] }
 0x186   : > { %1401 = vmatmul.bf16.vlgmr.msra.gmra.mxu2 %v8617_v33  ;;  %1420 = vmatmul.bf16.vlgmr.msra.gmra.mxu3 %v8619_v10  ;;  %v8671_v37 = vpack.c.bf16 %v767_v63, %v765_v34  ;;  %v8673_v38 = vpack.c.bf16 %v768_v29, %v766_v28  ;;  %v5547_v31 = vld [vmem:[%s8328_s17 + $0x1c0] sm:$0xf]  ;;  %v7054_v6 = vld [vmem:[%s8328_s17 + $0x1d4] sm:$0xf0]  ;;  %v5576_v8 = vor.u32 %v7057_v1, %v5573_v2  ;;  %v7003_v12 = vld [vmem:[%s8328_s17 + $0x44] sm:$0xf] }
 0x187   : > { %1507 = vmatpush.bf16.msra.mxu0 %v5500_v39  ;;  %1526 = vmatpush.bf16.msra.mxu1 %v5692_v43  ;;  %v5432_v39 = vor.u32 %v7021_v21, %v5429_v4  ;;  %v7066_v43 = vld [vmem:[%s8328_s17 + $0x234] sm:$0xf0]  ;;  %v5357_v9 = vld [vmem:[%s8328_s17 + $0x58] sm:$0xf0]  ;;  %v5548_v56 = vor.u32 %v7054_v6, %v5547_v31  ;;  %v7051_v48 = vld [vmem:[%s8328_s17 + $0x1c4] sm:$0xf] }
 0x188   : > { %1545 = vmatpush.bf16.msra.mxu2 %v5504_v44  ;;  %1564 = vmatpush.bf16.msra.mxu3 %v5696_v55  ;;  %v7015_v44 = vld [vmem:[%s8328_s17 + $0xa4] sm:$0xf]  ;;  %v5596_v3 = vor.u32 %v7066_v43, %v5595_v50  ;;  %v5549_v32 = vld [vmem:[%s8328_s17 + $0x1d8] sm:$0xf0]  ;;  %v5331_v13 = vld [vmem:[%s8328_s17 + $0x10] sm:$0xf]  ;;  %v5360_v18 = vor.u32 %v7003_v12, %v5357_v9 }
 0x189   : > { %v5408_v55 = vor.u32 %v7015_v44, %v5405_v49  ;;  %v7000_v14 = vld [vmem:[%s8328_s17 + $0x24] sm:$0xf0]  ;;  %v5552_v19 = vor.u32 %v7051_v48, %v5549_v32  ;;  %v5333_v24 = vld [vmem:[%s8328_s17 + $0x28] sm:$0xf0]  ;;  %v7045_v25 = vld [vmem:[%s8328_s17 + $0x194] sm:$0xf] }
 0x18a   : > { %v5525_v63 = vld [vmem:[%s8328_s17 + $0x1a8] sm:$0xf0]  ;;  %v636_v11 = vld [vmem:[%s8340_s16 + $0x10] sm:$0xff]  ;;  %v637_v52 = vld [vmem:[%s8340_s16 + $0x18] sm:$0xff] }
 0x18b   : > { %1508 = vmatpush.bf16.msra.mxu0 %v5476_v61  ;;  %1527 = vmatpush.bf16.msra.mxu1 %v5668_v45  ;;  %v5380_v61 = vor.u32 %v7012_v58, %v5379_v54  ;;  %v5572_v45 = vor.u32 %v7060_v60, %v5571_v59  ;;  %v5528_v21 = vor.u32 %v7045_v25, %v5525_v63  ;;  %v871_v43 = vperm.slane %v636_v11, 7 }
 0x18c   : > { %1546 = vmatpush.bf16.msra.mxu2 %v5480_v36  ;;  %1565 = vmatpush.bf16.msra.mxu3 %v5672_v7  ;;  %v5355_v36 = vld [vmem:[%s8328_s17 + $0x40] sm:$0xf]  ;;  %v5384_v7 = vor.u32 %v7009_v62, %v5381_v46  ;;  %v8749_v53 = vperm.slane %v637_v52, 7  ;;  %v869_v54 = vperm.slane %v8502_v41, 7 }
 0x18d   : > { %v5356_v47 = vor.u32 %v7006_v5, %v5355_v36 }
 0x18f   : > { %1509 = vmatpush.bf16.msra.mxu0 %v5452_v16  ;;  %1528 = vmatpush.bf16.msra.mxu1 %v5644_v17  ;;  %v5523_v16 = vld [vmem:[%s8328_s17 + $0x190] sm:$0xf]  ;;  %v7048_v17 = vld [vmem:[%s8328_s17 + $0x1a4] sm:$0xf0] }
 0x190   : > { %1547 = vmatpush.bf16.msra.mxu2 %v5456_v20  ;;  %1566 = vmatpush.bf16.msra.mxu3 %v5648_v22  ;;  %v6997_v20 = vld [vmem:[%s8328_s17 + $0x14] sm:$0xf]  ;;  %v5332_v22 = vor.u32 %v7000_v14, %v5331_v13  ;;  %v5524_v23 = vor.u32 %v7048_v17, %v5523_v16 }
 0x191   : > { %v5336_v29 = vor.u32 %v6997_v20, %v5333_v24  ;;  %v8755_v20 = vperm.slane %v8510_v51, 7 }
 0x193   : > { %1510 = vmatpush.bf16.msra.mxu0 %v5428_v27  ;;  %1529 = vmatpush.bf16.msra.mxu1 %v5620_v0 }
 0x194   : > { %1548 = vmatpush.bf16.msra.mxu2 %v5432_v39  ;;  %1567 = vmatpush.bf16.msra.mxu3 %v5624_v40 }
 0x195   : > { %1368 = vmatmul.bf16.gmra.mxu0 %v8671_v37  ;;  %1387 = vmatmul.bf16.gmra.mxu1 %v8673_v38 }
 0x196   : > { %1406 = vmatmul.bf16.gmra.mxu2 %v8671_v37  ;;  %1425 = vmatmul.bf16.gmra.mxu3 %v8673_v38 }
 0x197   : > { %1511 = vmatpush.bf16.msra.mxu0 %v5404_v15  ;;  %1530 = vmatpush.bf16.msra.mxu1 %v5596_v3 }
 0x198   : > { %1549 = vmatpush.bf16.msra.mxu2 %v5408_v55  ;;  %1568 = vmatpush.bf16.msra.mxu3 %v5600_v57 }
 0x19b   : > { %1512 = vmatpush.bf16.msra.mxu0 %v5380_v61  ;;  %1531 = vmatpush.bf16.msra.mxu1 %v5572_v45 }
 0x19c   : > { %1550 = vmatpush.bf16.msra.mxu2 %v5384_v7  ;;  %1569 = vmatpush.bf16.msra.mxu3 %v5576_v8 }
 0x19f   : > { %1513 = vmatpush.bf16.msra.mxu0 %v5356_v47  ;;  %1532 = vmatpush.bf16.msra.mxu1 %v5548_v56 }
 0x1a0   : > { %1551 = vmatpush.bf16.msra.mxu2 %v5360_v18  ;;  %1570 = vmatpush.bf16.msra.mxu3 %v5552_v19 }
 0x1a3   : > { %1514 = vmatpush.bf16.msra.mxu0 %v5332_v22  ;;  %1533 = vmatpush.bf16.msra.mxu1 %v5524_v23 }
 0x1a4   : > { %1552 = vmatpush.bf16.msra.mxu2 %v5336_v29  ;;  %1571 = vmatpush.bf16.msra.mxu3 %v5528_v21 }
 0x1a5   : > { %1439 = vmatmul.bf16.vlgmr.msrb.gmra.mxu0 %v8617_v33  ;;  %1458 = vmatmul.bf16.vlgmr.msrb.gmra.mxu1 %v8619_v10 }
 0x1a6   : > { %1477 = vmatmul.bf16.vlgmr.msrb.gmra.mxu2 %v8617_v33  ;;  %1496 = vmatmul.bf16.vlgmr.msrb.gmra.mxu3 %v8619_v10 }
 0x1b5   : > { %1444 = vmatmul.bf16.gmra.mxu0 %v8671_v37  ;;  %1463 = vmatmul.bf16.gmra.mxu1 %v8673_v38 }
 0x1b6   : > { %1482 = vmatmul.bf16.gmra.mxu2 %v8671_v37  ;;  %1501 = vmatmul.bf16.gmra.mxu3 %v8673_v38 }
 0x1c5   : > { %1515 = vmatmul.bf16.vlgmr.msra.gmra.mxu0 %v8617_v33  ;;  %1534 = vmatmul.bf16.vlgmr.msra.gmra.mxu1 %v8619_v10 }
 0x1c6   : > { %1553 = vmatmul.bf16.vlgmr.msra.gmra.mxu2 %v8617_v33  ;;  %1572 = vmatmul.bf16.vlgmr.msra.gmra.mxu3 %v8619_v10 }
 0x1d5   : > { %1520 = vmatmul.bf16.gmra.mxu0 %v8671_v37  ;;  %1539 = vmatmul.bf16.gmra.mxu1 %v8673_v38 }
 0x1d6   : > { %1558 = vmatmul.bf16.gmra.mxu2 %v8671_v37  ;;  %1577 = vmatmul.bf16.gmra.mxu3 %v8673_v38 }
 0x202   : > { %v1364_v27 = vpop.f32.mrf.mxu0  ;;  %v1383_v0 = vpop.f32.mrf.mxu1 }
 0x203   : > { %v1365_v46 = vadd.f32 %v1364_v27, %v869_v54 }
 0x205   : > { %v1384_v6 = vadd.f32 %v1383_v0, %v1365_v46 }
 0x207   : > { %v1585_v16 = vpack.c.bf16 %v1384_v6, %v1384_v6  ;;  %v639_v6 = vld [vmem:[%s8340_s16 + $0x28] sm:$0xff] }
 0x209   : > { %v8727_v4 = vpop.f32.mrf.mxu2  ;;  %v8729_v30 = vpop.f32.mrf.mxu3  ;;  %v1599_v24 = vunpack.c.l.b16 %v1585_v16 }
 0x20a   : > { %v1366_v35 = vpop.f32.mrf.mxu0  ;;  %v1385_v34 = vpop.f32.mrf.mxu1 }
 0x20b   : > { %v1367_v61 = vadd.f32 %v1366_v35, %v869_v54 }
 0x20d   : > { %v1386_v36 = vadd.f32 %v1385_v34, %v1367_v61 }
 0x20f   : > { %v1586_v48 = vpack.c.bf16 %v1386_v36, %v1386_v36 }
 0x211   : > { %v1404_v33 = vpop.f32.mrf.mxu2  ;;  %v8731_v10 = vpop.f32.mrf.mxu3  ;;  %v1600_v19 = vunpack.c.l.b16 %v1586_v48 }
 0x212   : > { %v8733_v28 = vpop.f32.mrf.mxu0  ;;  %v8735_v39 = vpop.f32.mrf.mxu1  ;;  %v1405_v34 = vadd.f32 %v1404_v33, %v8755_v20 }
 0x213   : > { %v1601_v35 = vpack.c.b16 %v1600_v19, %v1599_v24 }
 0x219   : > { %v8737_v37 = vpop.f32.mrf.mxu2  ;;  %v8739_v40 = vpop.f32.mrf.mxu3 }
 0x21a   : > { %v1371_v38 = vpop.f32.mrf.mxu0  ;;  %v8741_v42 = vpop.f32.mrf.mxu1 }
 0x21b   : > { %v1372_v11 = vadd.f32 %v1371_v38, %v869_v54 }
 0x221   : > { %v8744_v50 = vpop.f32.mrf.mxu2  ;;  %v8746_v15 = vpop.f32.mrf.mxu3 }
 0x222   : > { %v1440_v44 = vpop.f32.mrf.mxu0  ;;  %v1459_v49 = vpop.f32.mrf.mxu1 }
 0x223   : > { %v1441_v3 = vadd.f32 %v1440_v44, %v871_v43 }
 0x225   : > { %v1460_v55 = vadd.f32 %v1459_v49, %v1441_v3  ;;  %v1403_v49 = vadd.f32 %v8727_v4, %v8755_v20  ;;  %v1370_v3 = vadd.f32 %v8733_v28, %v869_v54 }
 0x227   : > { %v1589_v1 = vpack.c.bf16 %v1460_v55, %v1460_v55  ;;  %v1422_v33 = vadd.f32 %v8729_v30, %v1403_v49 }
 0x229   : > { %v1478_v57 = vpop.f32.mrf.mxu2  ;;  %v1497_v58 = vpop.f32.mrf.mxu3  ;;  %v1605_v7 = vunpack.c.l.b16 %v1589_v1  ;;  %v1762_v30 = vpack.c.bf16 %v1422_v33, %v1422_v33 }
 0x22a   : > { %v1442_v59 = vpop.f32.mrf.mxu0  ;;  %v1461_v60 = vpop.f32.mrf.mxu1  ;;  %v1479_v62 = vadd.f32 %v1478_v57, %v8749_v53  ;;  %v638_v57 = vld [vmem:[%s8340_s16 + $0x20] sm:$0xff] }
 0x22b   : > { %v1443_v45 = vadd.f32 %v1442_v59, %v871_v43  ;;  %v1391_v59 = vadd.f32 %v8741_v42, %v1372_v11  ;;  %v8767_v28 = vperm.slane %v638_v57, 7 }
 0x22c   : > { %v1498_v31 = vadd.f32 %v1497_v58, %v1479_v62  ;;  %v1424_v58 = vadd.f32 %v8731_v10, %v1405_v34 }
 0x22d   : > { %v1462_v2 = vadd.f32 %v1461_v60, %v1443_v45 }
 0x22e   : > { %v1766_v13 = vpack.c.bf16 %v1498_v31, %v1498_v31  ;;  %v1763_v10 = vpack.c.bf16 %v1424_v58, %v1424_v58 }
 0x22f   : > { %v1590_v5 = vpack.c.bf16 %v1462_v2, %v1462_v2  ;;  %v1588_v2 = vpack.c.bf16 %v1391_v59, %v1391_v59 }
 0x230   : > { %v1782_v22 = vunpack.c.l.b16 %v1766_v13 }
 0x231   : > { %v1606_v8 = vunpack.c.l.b16 %v1590_v5  ;;  %v1480_v12 = vpop.f32.mrf.mxu2  ;;  %v1499_v41 = vpop.f32.mrf.mxu3 }
 0x232   : > { %v1481_v9 = vadd.f32 %v1480_v12, %v8749_v53  ;;  %v1445_v47 = vpop.f32.mrf.mxu0  ;;  %v1464_v56 = vpop.f32.mrf.mxu1  ;;  %v1626_v12 = vunpack.c.l.b16 %v1588_v2 }
 0x233   : > { %v1607_v32 = vpack.c.b16 %v1606_v8, %v1605_v7  ;;  %v1446_v17 = vadd.f32 %v1445_v47, %v871_v43  ;;  %v1777_v8 = vunpack.c.l.b16 %v1763_v10  ;;  %v874_v47 = vperm.slane %v639_v6, 7 }
 0x234   : > { %v1500_v14 = vadd.f32 %v1499_v41, %v1481_v9 }
 0x235   : > { %1616 = vmatpush.bf16.xpose.msrb.mxu0 %v1607_v32  ;;  %v1465_v25 = vadd.f32 %v1464_v56, %v1446_v17 }
 0x236   : > { %v1767_v18 = vpack.c.bf16 %v1500_v14, %v1500_v14 }
 0x237   : > { %v1591_v52 = vpack.c.bf16 %v1465_v25, %v1465_v25  ;;  %v1408_v25 = vadd.f32 %v8737_v37, %v8755_v20 }
 0x238   : > { %v1783_v23 = vunpack.c.l.b16 %v1767_v18 }
 0x239   : > { %v1483_v63 = vpop.f32.mrf.mxu2  ;;  %v1502_v29 = vpop.f32.mrf.mxu3  ;;  %v1631_v4 = vunpack.c.l.b16 %v1591_v52 }
 0x23a   : > { %v1784_v21 = vpack.c.b16 %v1783_v23, %v1782_v22  ;;  %v1447_v27 = vpop.f32.mrf.mxu0  ;;  %v1466_v0 = vpop.f32.mrf.mxu1  ;;  %v1484_v51 = vadd.f32 %v1483_v63, %v8749_v53  ;;  %v1410_v22 = vadd.f32 %v8744_v50, %v8755_v20 }
 0x23b   : > { %v1448_v44 = vadd.f32 %v1447_v27, %v871_v43  ;;  %v1389_v43 = vadd.f32 %v8735_v39, %v1370_v3 }
 0x23c   : > { %1617 = vmatmul.bf16.vlgmr.msrb.gmra.mxu0 %v1601_v35  ;;  %v1503_v38 = vadd.f32 %v1502_v29, %v1484_v51  ;;  %v1427_v35 = vadd.f32 %v8739_v40, %v1408_v25 }
 0x23d   : > { %1793 = vmatpush.bf16.xpose.msra.mxu0 %v1784_v21  ;;  %v1467_v55 = vadd.f32 %v1466_v0, %v1448_v44  ;;  %v1587_v31 = vpack.c.bf16 %v1389_v43, %v1389_v43  ;;  %v1429_v21 = vadd.f32 %v8746_v15, %v1410_v22 }
 0x23e   : > { %v1768_v36 = vpack.c.bf16 %v1503_v38, %v1503_v38  ;;  %v1764_v57 = vpack.c.bf16 %v1427_v35, %v1427_v35 }
 0x23f   : > { %v1592_v60 = vpack.c.bf16 %v1467_v55, %v1467_v55  ;;  %v1625_v56 = vunpack.c.l.b16 %v1587_v31  ;;  %v1765_v52 = vpack.c.bf16 %v1429_v21, %v1429_v21 }
 0x240   : > { %v1808_v41 = vunpack.c.l.b16 %v1768_v36  ;;  %v1802_v40 = vunpack.c.l.b16 %v1764_v57 }
 0x241   : > { %v1632_v61 = vunpack.c.l.b16 %v1592_v60  ;;  %v1485_v45 = vpop.f32.mrf.mxu2  ;;  %v1504_v62 = vpop.f32.mrf.mxu3  ;;  %v1627_v19 = vpack.c.b16 %v1626_v12, %v1625_v56  ;;  %v1803_v59 = vunpack.c.l.b16 %v1765_v52 }
 0x242   : > { %v1486_v54 = vadd.f32 %v1485_v45, %v8749_v53  ;;  %v1516_v46 = vpop.f32.mrf.mxu0  ;;  %v1535_v1 = vpop.f32.mrf.mxu1  ;;  %v1776_v53 = vunpack.c.l.b16 %v1762_v30 }
 0x243   : > { %v1633_v42 = vpack.c.b16 %v1632_v61, %v1631_v4  ;;  %v1517_v39 = vadd.f32 %v1516_v46, %v8767_v28 }
 0x244   : > { %v1505_v5 = vadd.f32 %v1504_v62, %v1486_v54  ;;  %v1778_v18 = vpack.c.b16 %v1777_v8, %v1776_v53  ;;  %v1804_v62 = vpack.c.b16 %v1803_v59, %v1802_v40 }
 0x245   : > { %1642 = vmatpush.bf16.xpose.msrb.mxu1 %v1633_v42  ;;  %v1536_v48 = vadd.f32 %v1535_v1, %v1517_v39 }
 0x246   : > { %v1769_v7 = vpack.c.bf16 %v1505_v5, %v1505_v5 }
 0x247   : > { %v1593_v63 = vpack.c.bf16 %v1536_v48, %v1536_v48  ;;  %v1583_v48 = vld [vmem:[#allocation8] sm:$0xff] }
 0x248   : > { %v1809_v9 = vunpack.c.l.b16 %v1769_v7 }
 0x249   : > { %v1554_v32 = vpop.f32.mrf.mxu2  ;;  %v1573_v13 = vpop.f32.mrf.mxu3  ;;  %v1713_v34 = vunpack.c.l.b16 %v1593_v63 }
 0x24a   : > { %v1810_v14 = vpack.c.b16 %v1809_v9, %v1808_v41  ;;  %v1518_v16 = vpop.f32.mrf.mxu0  ;;  %v1537_v17 = vpop.f32.mrf.mxu1  ;;  %v1555_v24 = vadd.f32 %v1554_v32, %v874_v47 }
 0x24b   : > { %v1519_v23 = vadd.f32 %v1518_v16, %v8767_v28 }
 0x24c   : > { %1643 = vmatmul.bf16.vlgmr.msrb.gmra.mxu1 %v1627_v19  ;;  %1794 = vmatmul.bf16.vlgmr.msra.gmra.mxu0 %v1778_v18  ;;  %v1574_v0 = vadd.f32 %v1573_v13, %v1555_v24 }
 0x24d   : > { %1819 = vmatpush.bf16.xpose.msra.mxu1 %v1810_v14  ;;  %v1538_v29 = vadd.f32 %v1537_v17, %v1519_v23 }
 0x24e   : > { %v1770_v37 = vpack.c.bf16 %v1574_v0, %v1574_v0 }
 0x24f   : > { %v1594_v27 = vpack.c.bf16 %v1538_v29, %v1538_v29 }
 0x250   : > { %v1889_v60 = vunpack.c.l.b16 %v1770_v37 }
 0x251   : > { %v1714_v11 = vunpack.c.l.b16 %v1594_v27  ;;  %v1556_v50 = vpop.f32.mrf.mxu2  ;;  %v1575_v44 = vpop.f32.mrf.mxu3 }
 0x252   : > { %v1557_v49 = vadd.f32 %v1556_v50, %v874_v47  ;;  %v1521_v51 = vpop.f32.mrf.mxu0  ;;  %v1540_v3 = vpop.f32.mrf.mxu1 }
 0x253   : > { %v1715_v55 = vpack.c.b16 %v1714_v11, %v1713_v34  ;;  %v1522_v58 = vadd.f32 %v1521_v51, %v8767_v28 }
 0x254   : > { %v1576_v20 = vadd.f32 %v1575_v44, %v1557_v49 }
 0x255   : > { %1727 = vmatpush.bf16.msrb.mxu2 %v1715_v55  ;;  %v1541_v38 = vadd.f32 %v1540_v3, %v1522_v58 }
 0x256   : > { %v1771_v15 = vpack.c.bf16 %v1576_v20, %v1576_v20 }
 0x257   : > { %v1595_v10 = vpack.c.bf16 %v1541_v38, %v1541_v38 }
 0x258   : > { %v1890_v33 = vunpack.c.l.b16 %v1771_v15 }
 0x259   : > { %v1559_v43 = vpop.f32.mrf.mxu2  ;;  %v1578_v4 = vpop.f32.mrf.mxu3  ;;  %v1741_v5 = vunpack.c.l.b16 %v1595_v10 }
 0x25a   : > { %v1891_v61 = vpack.c.b16 %v1890_v33, %v1889_v60  ;;  %v1523_v45 = vpop.f32.mrf.mxu0  ;;  %v1560_v46 = vadd.f32 %v1559_v43, %v874_v47  ;;  %v1542_v1 = vpop.f32.mrf.mxu1 }
 0x25b   : > { %v1524_v54 = vadd.f32 %v1523_v45, %v8767_v28 }
 0x25c   : > { %1903 = vmatpush.bf16.msra.mxu2 %v1891_v61  ;;  %1820 = vmatmul.bf16.vlgmr.msra.gmra.mxu1 %v1804_v62  ;;  %v1579_v36 = vadd.f32 %v1578_v4, %v1560_v46 }
 0x25d   : > { %v1543_v2 = vadd.f32 %v1542_v1, %v1524_v54 }
 0x25e   : > { %v1772_v8 = vpack.c.bf16 %v1579_v36, %v1579_v36 }
 0x25f   : > { %v1596_v42 = vpack.c.bf16 %v1543_v2, %v1543_v2 }
 0x260   : > { %v1917_v9 = vunpack.c.l.b16 %v1772_v8 }
 0x261   : > { %v1742_v30 = vunpack.c.l.b16 %v1596_v42  ;;  %v1561_v31 = vpop.f32.mrf.mxu2  ;;  %v1580_v7 = vpop.f32.mrf.mxu3 }
 0x262   : > { %v1562_v39 = vadd.f32 %v1561_v31, %v874_v47  ;;  %v1584_v47 = vld [vmem:[#allocation8 + $0x8] sm:$0xff] }
 0x263   : > { %v1743_v6 = vpack.c.b16 %v1742_v30, %v1741_v5 }
 0x264   : > { %v1581_v12 = vadd.f32 %v1580_v7, %v1562_v39 }
 0x265   : > { %1755 = vmatpush.bf16.msrb.mxu3 %v1743_v6 }
 0x266   : > { %v1773_v41 = vpack.c.bf16 %v1581_v12, %v1581_v12 }
 0x268   : > { %v1918_v28 = vunpack.c.l.b16 %v1773_v41 }
 0x26a   : > { %v1919_v53 = vpack.c.b16 %v1918_v28, %v1917_v9 }
 0x26c   : > { %1931 = vmatpush.bf16.msra.mxu3 %v1919_v53 }
 0x2b9   : > { %v1618_v56 = vpop.f32.mrf.mxu0 }
 0x2ba   : > { %v1649_v32 = vmul.f32 0.088388346, %v1618_v56 }
 0x2bc   : > { %v1653_v13 = vadd.f32 %v1649_v32, %v1583_v48 }
 0x2be   : > { %v1658_v14 = vsel %vm1657_vm13, %v1653_v13, -inf }
 0x2bf   : > { %1659 = vmax.xlane.f32.xlu2 %v1658_v14 }
 0x2c1   : > { %v1620_v16 = vpop.f32.mrf.mxu0 }
 0x2c2   : > { %v1650_v17 = vmul.f32 0.088388346, %v1620_v16 }
 0x2c4   : > { %v1654_v18 = vadd.f32 %v1650_v17, %v1584_v47 }
 0x2c6   : > { %v1661_v19 = vsel %vm1657_vm13, %v1654_v18, -inf }
 0x2c7   : > { %1662 = vmax.xlane.f32.xlu0 %v1661_v19 }
 0x2c9   : > { %v1644_v22 = vpop.f32.mrf.mxu1  ;;  %v1795_v23 = vpop.f32.mrf.mxu0 }
 0x2ca   : > { %v1651_v24 = vmul.f32 0.088388346, %v1644_v22  ;;  %v1826_v25 = vmul.f32 0.088388346, %v1795_v23 }
 0x2cc   : > { %v1830_v63 = vadd.f32 %v1826_v25, %v1583_v48  ;;  %v1655_v29 = vadd.f32 %v1651_v24, %v1583_v48 }
 0x2ce   : > { %v1834_v21 = vsel %vm1657_vm13, %v1830_v63, -inf  ;;  %v1664_v27 = vsel %vm1657_vm13, %v1655_v29, -inf }
 0x2cf   : > { %1835 = vmax.xlane.f32.xlu0 %v1834_v21  ;;  %1665 = vmax.xlane.f32.xlu1 %v1664_v27 }
 0x2d1   : > { %v1646_v0 = vpop.f32.mrf.mxu1  ;;  %v1797_v35 = vpop.f32.mrf.mxu0 }
 0x2d2   : > { %v1652_v34 = vmul.f32 0.088388346, %v1646_v0  ;;  %v1827_v11 = vmul.f32 0.088388346, %v1797_v35 }
 0x2d4   : > { %v1831_v50 = vadd.f32 %v1827_v11, %v1584_v47  ;;  %v1656_v44 = vadd.f32 %v1652_v34, %v1584_v47 }
 0x2d6   : > { %v1837_v49 = vsel %vm1657_vm13, %v1831_v50, -inf  ;;  %v1667_v51 = vsel %vm1657_vm13, %v1656_v44, -inf }
 0x2d7   : > { %1838 = vmax.xlane.f32.xlu1 %v1837_v49  ;;  %1668 = vmax.xlane.f32.xlu2 %v1667_v51 }
 0x2d9   : > { %v1821_v3 = vpop.f32.mrf.mxu1 }
 0x2da   : > { %v1828_v52 = vmul.f32 0.088388346, %v1821_v3 }
 0x2dc   : > { %v1832_v55 = vadd.f32 %v1828_v52, %v1583_v48  ;;  %v5759_v52 = vld [vmem:[%s8334_s13 + $0x70] sm:$0xf] }
 0x2de   : > { %v1840_v37 = vsel %vm1657_vm13, %v1832_v55, -inf }
 0x2df   : > { %1841 = vmax.xlane.f32.xlu2 %v1840_v37  ;;  %v7105_v37 = vld [vmem:[%s8334_s13 + $0x74] sm:$0xf] }
 0x2e1   : > { %v1823_v20 = vpop.f32.mrf.mxu1 }
 0x2e2   : > { %v1829_v57 = vmul.f32 0.088388346, %v1823_v20 }
 0x2e4   : > { %v1833_v58 = vadd.f32 %v1829_v57, %v1584_v47 }
 0x2e6   : > { %v1843_v15 = vsel %vm1657_vm13, %v1833_v58, -inf }
 0x2e7   : > { %1844 = vmax.xlane.f32.xlu0 %v1843_v15  ;;  %v5751_v15 = vld [vmem:[%s8334_s13 + $0x60] sm:$0xf] }
 0x332   : > { %v1660_v59 = vpop.xlane.xlu2 %1659 }
 0x333   : > { %v1670_v60 = vsub.f32 %v1653_v13, %v1660_v59  ;;  %v7104_v59 = vld [vmem:[%s8334_s13 + $0x64] sm:$0xf0] }
 0x335   : > { %v1674_v33 = vmul.f32 1.442695, %v1670_v60 }
 0x337   : > { %7548 = vpow2.f32 %v1674_v33  ;;  %v7103_v33 = vld [vmem:[%s8334_s13 + $0x64] sm:$0xf] }
 0x33a   : > { %v1663_v40 = vpop.xlane.xlu0 %1662 }
 0x33b   : > { %v1671_v38 = vsub.f32 %v1654_v18, %v1663_v40  ;;  %v5753_v40 = vld [vmem:[%s8334_s13 + $0x68] sm:$0xf0] }
 0x33d   : > { %v7549_v43 = vpop.eup %7548  ;;  %v1676_v4 = vmul.f32 1.442695, %v1671_v38 }
 0x33e   : > { %v1682_v61 = vsel %vm1657_vm13, %v7549_v43, 0.0 }
 0x33f   : > { %7550 = vpow2.f32 %v1676_v4  ;;  %1683 = vadd.xlane.f32.xlu1 %v1682_v61  ;;  %v5756_v61 = vor.u32 %v7103_v33, %v5753_v40  ;;  %v7119_v40 = vld [vmem:[%s8334_s13 + $0xe4] sm:$0xf] }
 0x342   : > { %v1836_v45 = vpop.xlane.xlu0 %1835  ;;  %v1666_v62 = vpop.xlane.xlu1 %1665 }
 0x343   : > { %v1846_v54 = vsub.f32 %v1830_v63, %v1836_v45  ;;  %v1672_v46 = vsub.f32 %v1655_v29, %v1666_v62  ;;  %v5743_v45 = vld [vmem:[%s8334_s13 + $0x50] sm:$0xf]  ;;  %v7102_v62 = vld [vmem:[%s8334_s13 + $0x54] sm:$0xf0] }
 0x345   : > { %v7551_v1 = vpop.eup %7550  ;;  %v1850_v10 = vmul.f32 1.442695, %v1846_v54  ;;  %v1678_v2 = vmul.f32 1.442695, %v1672_v46  ;;  %v7101_v54 = vld [vmem:[%s8334_s13 + $0x54] sm:$0xf] }
 0x346   : > { %v1685_v42 = vsel %vm1657_vm13, %v7551_v1, 0.0  ;;  %v5745_v46 = vld [vmem:[%s8334_s13 + $0x58] sm:$0xf0] }
 0x347   : > { %7552 = vpow2.f32 %v1850_v10  ;;  %1686 = vadd.xlane.f32.xlu2 %v1685_v42  ;;  %v5823_v10 = vld [vmem:[%s8334_s13 + $0xf0] sm:$0xf] }
 0x348   : > { %7554 = vpow2.f32 %v1678_v2  ;;  %v7122_v2 = vld [vmem:[%s8334_s13 + $0xf4] sm:$0xf0] }
 0x34a   : > { %v1839_v36 = vpop.xlane.xlu1 %1838  ;;  %v1669_v5 = vpop.xlane.xlu2 %1668 }
 0x34b   : > { %v1847_v30 = vsub.f32 %v1831_v50, %v1839_v36  ;;  %v1673_v31 = vsub.f32 %v1656_v44, %v1669_v5 }
 0x34d   : > { %v8791_v39 = vpop.eup %7552  ;;  %v1852_v6 = vmul.f32 1.442695, %v1847_v30  ;;  %v1680_v7 = vmul.f32 1.442695, %v1673_v31  ;;  %v5744_v31 = vor.u32 %v7102_v62, %v5743_v45  ;;  %v5807_v45 = vld [vmem:[%s8334_s13 + $0xd0] sm:$0xf] }
 0x34e   : > { %v8793_v8 = vpop.eup %7554  ;;  %v1858_v12 = vsel %vm1657_vm13, %v8791_v39, 0.0  ;;  %v7118_v62 = vld [vmem:[%s8334_s13 + $0xd4] sm:$0xf0] }
 0x34f   : > { %7556 = vpow2.f32 %v1852_v6  ;;  %v1688_v41 = vsel %vm1657_vm13, %v8793_v8, 0.0  ;;  %1859 = vadd.xlane.f32.xlu2 %v1858_v12  ;;  %v5735_v12 = vld [vmem:[%s8334_s13 + $0x40] sm:$0xf] }
 0x350   : > { %7558 = vpow2.f32 %v1680_v7  ;;  %1689 = vadd.xlane.f32.xlu0 %v1688_v41  ;;  %v7100_v41 = vld [vmem:[%s8334_s13 + $0x44] sm:$0xf0] }
 0x352   : > { %v1842_v9 = vpop.xlane.xlu2 %1841 }
 0x353   : > { %v1848_v28 = vsub.f32 %v1832_v55, %v1842_v9  ;;  %v7106_v55 = vld [vmem:[%s8334_s13 + $0x74] sm:$0xf0] }
 0x354   : > { %v5760_v57 = vor.u32 %v7106_v55, %v5759_v52 }
 0x355   : > { %v8799_v53 = vpop.eup %7556  ;;  %v1854_v56 = vmul.f32 1.442695, %v1848_v28  ;;  %v7099_v28 = vld [vmem:[%s8334_s13 + $0x44] sm:$0xf] }
 0x356   : > { %v8801_v48 = vpop.eup %7558  ;;  %v1861_v32 = vsel %vm1657_vm13, %v8799_v53, 0.0  ;;  %2134 = vmatpush.bf16.msrb.mxu0 %v5760_v57  ;;  %v5815_v57 = vld [vmem:[%s8334_s13 + $0xe0] sm:$0xf] }
 0x357   : > { %7560 = vpow2.f32 %v1854_v56  ;;  %v1691_v13 = vsel %vm1657_vm13, %v8801_v48, 0.0  ;;  %v5737_v56 = vld [vmem:[%s8334_s13 + $0x48] sm:$0xf0] }
 0x358   : > { %1862 = vadd.xlane.f32.xlu0 %v1861_v32  ;;  %1692 = vadd.xlane.f32.xlu1 %v1691_v13  ;;  %v7121_v32 = vld [vmem:[%s8334_s13 + $0xf4] sm:$0xf]  ;;  %v5825_v13 = vld [vmem:[%s8334_s13 + $0xf8] sm:$0xf0] }
 0x35a   : > { %v1845_v14 = vpop.xlane.xlu0 %1844 }
 0x35b   : > { %v1849_v16 = vsub.f32 %v1833_v58, %v1845_v14  ;;  %v5761_v58 = vld [vmem:[%s8334_s13 + $0x78] sm:$0xf0] }
 0x35c   : > { %v5764_v60 = vor.u32 %v7105_v37, %v5761_v58 }
 0x35d   : > { %v8807_v47 = vpop.eup %7560  ;;  %v1856_v17 = vmul.f32 1.442695, %v1849_v16 }
 0x35e   : > { %v1864_v18 = vsel %vm1657_vm13, %v8807_v47, 0.0 }
 0x35f   : > { %7562 = vpow2.f32 %v1856_v17 }
 0x360   : > { %1865 = vadd.xlane.f32.xlu1 %v1864_v18 }
 0x365   : > { %v8811_v19 = vpop.eup %7562 }
 0x366   : > { %v1867_v22 = vsel %vm1657_vm13, %v8811_v19, 0.0 }
 0x367   : > { %1868 = vadd.xlane.f32.xlu2 %v1867_v22  ;;  %v5740_v22 = vor.u32 %v7099_v28, %v5737_v56  ;;  %v7115_v28 = vld [vmem:[%s8334_s13 + $0xc4] sm:$0xf]  ;;  %v5801_v56 = vld [vmem:[%s8334_s13 + $0xc8] sm:$0xf0] }
 0x3b2   : > { %v1684_v23 = vpop.xlane.xlu1 %1683 }
 0x3b3   : > { %7564 = vrcp.f32 %v1684_v23  ;;  %v5727_v23 = vld [vmem:[%s8334_s13 + $0x30] sm:$0xf] }
 0x3b9   : > { %v7565_v25 = vpop.eup %7564 }
 0x3ba   : > { %v1687_v24 = vpop.xlane.xlu2 %1686  ;;  %v1698_v63 = vmul.f32 %v7565_v25, %v7549_v43  ;;  %v5752_v43 = vor.u32 %v7104_v59, %v5751_v15  ;;  %v7120_v15 = vld [vmem:[%s8334_s13 + $0xe4] sm:$0xf0]  ;;  %v7095_v59 = vld [vmem:[%s8334_s13 + $0x24] sm:$0xf] }
 0x3bb   : > { %7566 = vrcp.f32 %v1687_v24  ;;  %v7098_v24 = vld [vmem:[%s8334_s13 + $0x34] sm:$0xf0] }
 0x3bc   : > { %v1702_v21 = vpack.c.bf16 %v1698_v63, %v1698_v63  ;;  %2135 = vmatpush.bf16.msrb.mxu0 %v5752_v43  ;;  %v7097_v63 = vld [vmem:[%s8334_s13 + $0x34] sm:$0xf]  ;;  %v5711_v43 = vld [vmem:[%s8334_s13 + $0x10] sm:$0xf] }
 0x3be   : > { %v1708_v11 = vunpack.c.l.b16 %v1702_v21  ;;  %v5828_v21 = vor.u32 %v7121_v32, %v5825_v13  ;;  %v5791_v32 = vld [vmem:[%s8334_s13 + $0xb0] sm:$0xf]  ;;  %v7114_v13 = vld [vmem:[%s8334_s13 + $0xb4] sm:$0xf0] }
 0x3c0   : > { %2136 = vmatpush.bf16.msrb.mxu0 %v5744_v31  ;;  %v7092_v31 = vld [vmem:[%s8334_s13 + $0x4] sm:$0xf0] }
 0x3c1   : > { %v7567_v29 = vpop.eup %7566 }
 0x3c2   : > { %v1699_v27 = vmul.f32 %v7567_v29, %v7551_v1  ;;  %v1860_v35 = vpop.xlane.xlu2 %1859  ;;  %v5729_v29 = vld [vmem:[%s8334_s13 + $0x38] sm:$0xf0] }
 0x3c3   : > { %v1690_v0 = vpop.xlane.xlu0 %1689  ;;  %7568 = vrcp.f32 %v1860_v35 }
 0x3c4   : > { %v1703_v34 = vpack.c.bf16 %v1699_v27, %v1699_v27  ;;  %7570 = vrcp.f32 %v1690_v0 }
 0x3c6   : > { %v1709_v50 = vunpack.c.l.b16 %v1703_v34  ;;  %v5728_v34 = vor.u32 %v7098_v24, %v5727_v23  ;;  %v7111_v23 = vld [vmem:[%s8334_s13 + $0xa4] sm:$0xf] }
 0x3c8   : > { %v1710_v44 = vpack.c.b16 %v1709_v50, %v1708_v11  ;;  %v5732_v11 = vor.u32 %v7097_v63, %v5729_v29  ;;  %v5775_v29 = vld [vmem:[%s8334_s13 + $0x90] sm:$0xf] }
 0x3c9   : > { %v7569_v3 = vpop.eup %7568 }
 0x3ca   : > { %5697 = vmatmul.msk.bf16.vlgmr.msrb.gmra.mxu2 %vm1657_vm13, %v1710_v44  ;;  %v7571_v20 = vpop.eup %7570  ;;  %v1874_v38 = vmul.f32 %v7569_v3, %v8791_v39  ;;  %v5824_v39 = vor.u32 %v7122_v2, %v5823_v10  ;;  %v5713_v10 = vld [vmem:[%s8334_s13 + $0x18] sm:$0xf0]  ;;  %v7117_v2 = vld [vmem:[%s8334_s13 + $0xd4] sm:$0xf] }
 0x3cb   : > { %v1863_v49 = vpop.xlane.xlu0 %1862  ;;  %v1693_v51 = vpop.xlane.xlu1 %1692  ;;  %v1700_v4 = vmul.f32 %v7571_v20, %v8793_v8  ;;  %2172 = vmatpush.bf16.msrb.mxu2 %v5764_v60  ;;  %v5748_v8 = vor.u32 %v7101_v54, %v5745_v46  ;;  %v7096_v20 = vld [vmem:[%s8334_s13 + $0x24] sm:$0xf0]  ;;  %v5721_v60 = vld [vmem:[%s8334_s13 + $0x28] sm:$0xf0]  ;;  %v5808_v46 = vor.u32 %v7118_v62, %v5807_v45  ;;  %v7716_v62 = vld [vmem:[#allocation2] sm:$0xff] }
 0x3cc   : > { %7572 = vrcp.f32 %v1863_v49  ;;  %v1878_v36 = vpack.c.bf16 %v1874_v38, %v1874_v38  ;;  %2153 = vmatpush.bf16.msrb.mxu1 %v5824_v39  ;;  %v5724_v33 = vor.u32 %v7095_v59, %v5721_v60  ;;  %v5817_v38 = vld [vmem:[%s8334_s13 + $0xe8] sm:$0xf0]  ;;  %v5799_v39 = vld [vmem:[%s8334_s13 + $0xc0] sm:$0xf] }
 0x3cd   : > { %7574 = vrcp.f32 %v1693_v51  ;;  %v1704_v6 = vpack.c.bf16 %v1700_v4, %v1700_v4  ;;  %v5820_v4 = vor.u32 %v7119_v40, %v5817_v38 }
 0x3ce   : > { %v1884_v14 = vunpack.c.l.b16 %v1878_v36  ;;  %v5809_v36 = vld [vmem:[%s8334_s13 + $0xd8] sm:$0xf0] }
 0x3cf   : > { %2173 = vmatpush.bf16.msrb.mxu2 %v5756_v61  ;;  %v1736_v17 = vunpack.c.l.b16 %v1704_v6  ;;  %v7094_v61 = vld [vmem:[%s8334_s13 + $0x14] sm:$0xf0] }
 0x3d0   : > { %v5712_v54 = vor.u32 %v7094_v61, %v5711_v43 }
 0x3d2   : > { %v7573_v1 = vpop.eup %7572 }
 0x3d3   : > { %v7575_v42 = vpop.eup %7574  ;;  %v1875_v5 = vmul.f32 %v7573_v1, %v8799_v53  ;;  %v1866_v30 = vpop.xlane.xlu1 %1865  ;;  %2174 = vmatpush.bf16.msrb.mxu2 %v5748_v8  ;;  %v7093_v1 = vld [vmem:[%s8334_s13 + $0x14] sm:$0xf]  ;;  %v7091_v8 = vld [vmem:[%s8334_s13 + $0x4] sm:$0xf] }
 0x3d4   : > { %v1701_v7 = vmul.f32 %v7575_v42, %v8801_v48  ;;  %7576 = vrcp.f32 %v1866_v30  ;;  %v5736_v48 = vor.u32 %v7100_v41, %v5735_v12  ;;  %v5716_v42 = vor.u32 %v7093_v1, %v5713_v10  ;;  %v5703_v30 = vld [vmem:[%s8334_s13] sm:$0xf]  ;;  %v5705_v12 = vld [vmem:[%s8334_s13 + $0x8] sm:$0xf0] }
 0x3d5   : > { %v1879_v9 = vpack.c.bf16 %v1875_v5, %v1875_v5  ;;  %v5812_v5 = vor.u32 %v7117_v2, %v5809_v36  ;;  %v5704_v6 = vor.u32 %v7092_v31, %v5703_v30  ;;  %v8894_v2 = vld [vmem:[%s8340_s16 + $0x8] sm:$0xff] }
 0x3d6   : > { %v1705_v53 = vpack.c.bf16 %v1701_v7, %v1701_v7  ;;  %2137 = vmatpush.bf16.msrb.mxu0 %v5736_v48  ;;  %v7116_v7 = vld [vmem:[%s8334_s13 + $0xc4] sm:$0xf0]  ;;  %v5793_v48 = vld [vmem:[%s8334_s13 + $0xb8] sm:$0xf0] }
 0x3d7   : > { %v1885_v16 = vunpack.c.l.b16 %v1879_v9  ;;  %2175 = vmatpush.bf16.msrb.mxu2 %v5740_v22  ;;  %v5800_v41 = vor.u32 %v7116_v7, %v5799_v39  ;;  %v5708_v9 = vor.u32 %v7091_v8, %v5705_v12  ;;  %v7112_v22 = vld [vmem:[%s8334_s13 + $0xa4] sm:$0xf0] }
 0x3d8   : > { %v1737_v18 = vunpack.c.l.b16 %v1705_v53  ;;  %v5804_v53 = vor.u32 %v7115_v28, %v5801_v56 }
 0x3d9   : > { %v1886_v25 = vpack.c.b16 %v1885_v16, %v1884_v14  ;;  %v7113_v14 = vld [vmem:[%s8334_s13 + $0xb4] sm:$0xf]  ;;  %v5792_v16 = vor.u32 %v7114_v13, %v5791_v32 }
 0x3da   : > { %v1738_v27 = vpack.c.b16 %v1737_v18, %v1736_v17  ;;  %v1869_v0 = vpop.xlane.xlu2 %1868  ;;  %v7577_v35 = vpop.eup %7576  ;;  %2138 = vmatpush.bf16.msrb.mxu0 %v5728_v34  ;;  %v5796_v17 = vor.u32 %v7113_v14, %v5793_v48  ;;  %v5783_v18 = vld [vmem:[%s8334_s13 + $0xa0] sm:$0xf] }
 0x3db   : > { %5699 = vmatmul.msk.bf16.vlgmr.msra.gmra.mxu2 %vm1657_vm13, %v1886_v25  ;;  %7578 = vrcp.f32 %v1869_v0  ;;  %v1876_v50 = vmul.f32 %v7577_v35, %v8807_v47  ;;  %v5719_v47 = vld [vmem:[%s8334_s13 + $0x20] sm:$0xf]  ;;  %v5784_v24 = vor.u32 %v7112_v22, %v5783_v18  ;;  %v5785_v25 = vld [vmem:[%s8334_s13 + $0xa8] sm:$0xf0]  ;;  %v5777_v35 = vld [vmem:[%s8334_s13 + $0x98] sm:$0xf0] }
 0x3dc   : > { %5698 = vmatmul.msk.bf16.vlgmr.msrb.gmra.mxu3 %vm1657_vm13, %v1738_v27  ;;  %2176 = vmatpush.bf16.msrb.mxu2 %v5732_v11  ;;  %v5720_v58 = vor.u32 %v7096_v20, %v5719_v47  ;;  %v5788_v63 = vor.u32 %v7111_v23, %v5785_v25  ;;  %v7109_v27 = vld [vmem:[%s8334_s13 + $0x94] sm:$0xf]  ;;  %v5767_v11 = vld [vmem:[%s8334_s13 + $0x80] sm:$0xf] }
 0x3dd   : > { %2191 = vmatpush.bf16.msrb.mxu3 %v5828_v21  ;;  %v1880_v49 = vpack.c.bf16 %v1876_v50, %v1876_v50  ;;  %v7110_v21 = vld [vmem:[%s8334_s13 + $0x94] sm:$0xf0]  ;;  %v5780_v34 = vor.u32 %v7109_v27, %v5777_v35  ;;  %v7108_v50 = vld [vmem:[%s8334_s13 + $0x84] sm:$0xf0]  ;;  %v7722_v23 = vld [vmem:[#allocation2 + $0x20] sm:$0xff] }
 0x3de   : > { %2139 = vmatpush.bf16.msrb.mxu0 %v5720_v58  ;;  %v5776_v0 = vor.u32 %v7110_v21, %v5775_v29  ;;  %v7723_v29 = vld [vmem:[#allocation2 + $0x28] sm:$0xff] }
 0x3df   : > { %v1912_v52 = vunpack.c.l.b16 %v1880_v49  ;;  %v5768_v49 = vor.u32 %v7108_v50, %v5767_v11 }
 0x3e0   : > { %2177 = vmatpush.bf16.msrb.mxu2 %v5724_v33 }
 0x3e1   : > { %v7579_v44 = vpop.eup %7578  ;;  %2192 = vmatpush.bf16.msrb.mxu3 %v5820_v4 }
 0x3e2   : > { %v1877_v51 = vmul.f32 %v7579_v44, %v8811_v19  ;;  %v5816_v19 = vor.u32 %v7120_v15, %v5815_v57  ;;  %2140 = vmatpush.bf16.msrb.mxu0 %v5712_v54  ;;  %v7107_v44 = vld [vmem:[%s8334_s13 + $0x84] sm:$0xf] }
 0x3e4   : > { %v1881_v3 = vpack.c.bf16 %v1877_v51, %v1877_v51  ;;  %2154 = vmatpush.bf16.msrb.mxu1 %v5816_v19  ;;  %2178 = vmatpush.bf16.msrb.mxu2 %v5716_v42  ;;  %v5769_v51 = vld [vmem:[%s8334_s13 + $0x88] sm:$0xf0]  ;;  %v2219_v42 = vperm.slane %v8894_v2, 4  ;;  %s9957_s13 = sld [smem:[#allocation32_spill]] (!%p6853_p2) }
 0x3e5   : > { %2193 = vmatpush.bf16.msrb.mxu3 %v5812_v5  ;;  %v7719_v5 = vld [vmem:[#allocation2 + $0x8] sm:$0xff] }
 0x3e6   : > { %v1913_v55 = vunpack.c.l.b16 %v1881_v3  ;;  %2141 = vmatpush.bf16.msrb.mxu0 %v5704_v6  ;;  %v5772_v3 = vor.u32 %v7107_v44, %v5769_v51 }
 0x3e8   : > { %v1914_v37 = vpack.c.b16 %v1913_v55, %v1912_v52  ;;  %2155 = vmatpush.bf16.msrb.mxu1 %v5808_v46  ;;  %2179 = vmatpush.bf16.msrb.mxu2 %v5708_v9  ;;  %v8890_v46 = vld [vmem:[%s8340_s16] sm:$0xff] }
 0x3e9   : > { %2194 = vmatpush.bf16.msrb.mxu3 %v5804_v53  ;;  %v2218_v1 = vperm.slane %v8890_v46, 4  ;;  %v7721_v53 = vld [vmem:[#allocation2 + $0x18] sm:$0xff] }
 0x3ec   : > { %5700 = vmatmul.msk.bf16.vlgmr.msra.gmra.mxu3 %vm1657_vm13, %v1914_v37  ;;  %2156 = vmatpush.bf16.msrb.mxu1 %v5800_v41  ;;  %v7720_v41 = vld [vmem:[#allocation2 + $0x10] sm:$0xff] }
 0x3ed   : > { %2195 = vmatpush.bf16.msrb.mxu3 %v5796_v17 }
 0x3f0   : > { %2157 = vmatpush.bf16.msrb.mxu1 %v5792_v16 }
 0x3f1   : > { %2196 = vmatpush.bf16.msrb.mxu3 %v5788_v63 }
 0x3f4   : > { %2158 = vmatpush.bf16.msrb.mxu1 %v5784_v24 }
 0x3f5   : > { %2197 = vmatpush.bf16.msrb.mxu3 %v5780_v34 }
 0x3f8   : > { %2159 = vmatpush.bf16.msrb.mxu1 %v5776_v0 }
 0x3f9   : > { %2198 = vmatpush.bf16.msrb.mxu3 %v5772_v3 }
 0x3fc   : > { %2160 = vmatpush.bf16.msrb.mxu1 %v5768_v49  ;;  %v7724_v49 = vld [vmem:[#allocation2 + $0x30] sm:$0xff] }
 0x44d   : > { %v1729_v52 = vpop.f32.mrf.mxu2 }
 0x455   : > { %v1731_v55 = vpop.f32.mrf.mxu2 }
 0x456   : > { %v1938_v37 = vpack.c.bf16 %v1731_v55, %v1729_v52  ;;  %v7725_v52 = vld [vmem:[#allocation2 + $0x38] sm:$0xff] }
 0x458   : > { %2142 = vmatmul.bf16.vlgmr.msrb.gmra.mxu0 %v1938_v37  ;;  %2180 = vmatmul.bf16.vlgmr.msrb.gmra.mxu2 %v1938_v37 }
 0x45e   : > { %v1905_v47 = vpop.f32.mrf.mxu2 }
 0x45f   : > { %v1757_v20 = vpop.f32.mrf.mxu3 }
 0x466   : > { %v1907_v57 = vpop.f32.mrf.mxu2 }
 0x467   : > { %v1759_v58 = vpop.f32.mrf.mxu3  ;;  %v1939_v15 = vpack.c.bf16 %v1907_v57, %v1905_v47 }
 0x468   : > { %v1940_v59 = vpack.c.bf16 %v1759_v58, %v1757_v20 }
 0x469   : > { %2161 = vmatmul.bf16.vlgmr.msrb.gmra.mxu1 %v1939_v15  ;;  %2199 = vmatmul.bf16.vlgmr.msrb.gmra.mxu3 %v1939_v15 }
 0x46a   : > { %2147 = vmatmul.bf16.gmra.mxu0 %v1940_v59  ;;  %2185 = vmatmul.bf16.gmra.mxu2 %v1940_v59 }
 0x46f   : > { %v1933_v60 = vpop.f32.mrf.mxu3 }
 0x477   : > { %v1935_v19 = vpop.f32.mrf.mxu3 }
 0x478   : > { %v1941_v33 = vpack.c.bf16 %v1935_v19, %v1933_v60 }
 0x47a   : > { %2166 = vmatmul.bf16.gmra.mxu1 %v1941_v33  ;;  %2204 = vmatmul.bf16.gmra.mxu3 %v1941_v33 }
 0x4d5   : > { %v2143_v40 = vpop.f32.mrf.mxu0 }
 0x4db   : > { %v2181_v43 = vpop.f32.mrf.mxu2 }
 0x4dd   : > { %v2145_v45 = vpop.f32.mrf.mxu0 }
 0x4e3   : > { %v2183_v31 = vpop.f32.mrf.mxu2 }
 0x4e6   : > { %v2162_v38 = vpop.f32.mrf.mxu1 }
 0x4e7   : > { %v2163_v4 = vadd.f32 %v2162_v38, %v2143_v40  ;;  %v2148_v56 = vpop.f32.mrf.mxu0 }
 0x4e9   : > { %v2210_v54 = vadd.f32 %v7716_v62, %v2163_v4 }
 0x4eb   : > { %v8897_v39 = vadd.f32 %v2218_v1, %v2210_v54 }
 0x4ec   : > { %v2200_v61 = vpop.f32.mrf.mxu3 }
 0x4ed   : > { %v2201_v10 = vadd.f32 %v2200_v61, %v2181_v43  ;;  %v2186_v17 = vpop.f32.mrf.mxu2 }
 0x4ee   : > { %v2164_v36 = vpop.f32.mrf.mxu1 }
 0x4ef   : > { %v2211_v30 = vadd.f32 %v7719_v5, %v2201_v10  ;;  %v2165_v7 = vadd.f32 %v2164_v36, %v2145_v45  ;;  %v2150_v27 = vpop.f32.mrf.mxu0 }
 0x4f1   : > { %v8899_v6 = vadd.f32 %v2219_v42, %v2211_v30  ;;  %v2212_v9 = vadd.f32 %v7720_v41, %v2165_v7 }
 0x4f3   : > { %v2228_v8 = vadd.f32 %v8899_v6, %v8897_v39  ;;  %v8903_v14 = vadd.f32 %v2218_v1, %v2212_v9 }
 0x4f4   : > { %v2202_v12 = vpop.f32.mrf.mxu3 }
 0x4f5   : > { %v2203_v28 = vadd.f32 %v2202_v12, %v2183_v31  ;;  %2229 = vadd.xlane.f32.xlu0 %v2228_v8  ;;  %v2188_v50 = vpop.f32.mrf.mxu2 }
 0x4f7   : > { %v2213_v32 = vadd.f32 %v7721_v53, %v2203_v28  ;;  %v2167_v13 = vpop.f32.mrf.mxu1  ;;  %v7183_v53 = vld [vmem:[%s8336_s4 + $0x1dc] sm:$0xf0] }
 0x4f8   : > { %v2168_v48 = vadd.f32 %v2167_v13, %v2148_v56  ;;  %v6055_v56 = vld [vmem:[%s8336_s4 + $0x1c0] sm:$0xf] }
 0x4f9   : > { %v8905_v16 = vadd.f32 %v2219_v42, %v2213_v32  ;;  %v6311_v32 = vld [vmem:[%s8336_s4 + $0x3c0] sm:$0xf]  ;;  %v6056_v13 = vor.u32 %v7183_v53, %v6055_v56  ;;  %v7219_v56 = vld [vmem:[%s8336_s4 + $0x304] sm:$0xf] }
 0x4fa   : > { %v2214_v24 = vadd.f32 %v7722_v23, %v2168_v48  ;;  %v7247_v48 = vld [vmem:[%s8336_s4 + $0x3dc] sm:$0xf0]  ;;  %v6217_v53 = vld [vmem:[%s8336_s4 + $0x320] sm:$0xf0] }
 0x4fb   : > { %v2231_v18 = vadd.f32 %v8905_v16, %v8903_v14  ;;  %3128 = vmatpush.bf16.msra.mxu0 %v6056_v13  ;;  %v5927_v13 = vld [vmem:[%s8336_s4 + $0xc0] sm:$0xf] }
 0x4fc   : > { %v8909_v0 = vadd.f32 %v2218_v1, %v2214_v24  ;;  %v7243_v24 = vld [vmem:[%s8336_s4 + $0x3c4] sm:$0xf] }
 0x4fd   : > { %v2205_v22 = vpop.f32.mrf.mxu3  ;;  %2232 = vadd.xlane.f32.xlu1 %v2231_v18  ;;  %v6057_v18 = vld [vmem:[%s8336_s4 + $0x1e0] sm:$0xf0] }
 0x4fe   : > { %v2206_v25 = vadd.f32 %v2205_v22, %v2186_v17  ;;  %v7179_v17 = vld [vmem:[%s8336_s4 + $0x1c4] sm:$0xf]  ;;  %v6312_v22 = vor.u32 %v7247_v48, %v6311_v32  ;;  %v6220_v32 = vor.u32 %v7219_v56, %v6217_v53  ;;  %v7151_v48 = vld [vmem:[%s8336_s4 + $0xdc] sm:$0xf0] }
 0x4ff   : > { %v2169_v63 = vpop.f32.mrf.mxu1  ;;  %v6060_v23 = vor.u32 %v7179_v17, %v6057_v18  ;;  %v6183_v17 = vld [vmem:[%s8336_s4 + $0x2c0] sm:$0xf]  ;;  %v5928_v18 = vor.u32 %v7151_v48, %v5927_v13  ;;  %v5833_v48 = vld [vmem:[%s8336_s4 + $0x20] sm:$0xf0] }
 0x500   : > { %v2215_v21 = vadd.f32 %v7723_v29, %v2206_v25  ;;  %v2170_v34 = vadd.f32 %v2169_v63, %v2150_v27  ;;  %v6313_v25 = vld [vmem:[%s8336_s4 + $0x3e0] sm:$0xf0]  ;;  %3147 = vmatpush.bf16.msra.mxu1 %v6312_v22  ;;  %v6023_v29 = vld [vmem:[%s8336_s4 + $0x180] sm:$0xf] }
 0x501   : > { %v6316_v63 = vor.u32 %v7243_v24, %v6313_v25  ;;  %3166 = vmatpush.bf16.msra.mxu2 %v6060_v23  ;;  %v6279_v27 = vld [vmem:[%s8336_s4 + $0x380] sm:$0xf]  ;;  %v7147_v23 = vld [vmem:[%s8336_s4 + $0xc4] sm:$0xf] }
 0x502   : > { %v8911_v35 = vadd.f32 %v2219_v42, %v2215_v21  ;;  %v2216_v51 = vadd.f32 %v7724_v49, %v2170_v34  ;;  %v7175_v21 = vld [vmem:[%s8336_s4 + $0x19c] sm:$0xf0]  ;;  %v5929_v24 = vld [vmem:[%s8336_s4 + $0xe0] sm:$0xf0] }
 0x503   : > { %3185 = vmatpush.bf16.msra.mxu3 %v6316_v63  ;;  %v6024_v34 = vor.u32 %v7175_v21, %v6023_v29  ;;  %v7215_v22 = vld [vmem:[%s8336_s4 + $0x2dc] sm:$0xf0]  ;;  %v5932_v63 = vor.u32 %v7147_v23, %v5929_v24  ;;  %v7211_v29 = vld [vmem:[%s8336_s4 + $0x2c4] sm:$0xf]  ;;  %v6063_v24 = vld [vmem:[%s8336_s4 + $0x1c8] sm:$0xf] }
 0x504   : > { %v2234_v11 = vadd.f32 %v8911_v35, %v8909_v0  ;;  %v8915_v37 = vadd.f32 %v2218_v1, %v2216_v51  ;;  %v6184_v25 = vor.u32 %v7215_v22, %v6183_v17  ;;  %v6185_v21 = vld [vmem:[%s8336_s4 + $0x2e0] sm:$0xf0]  ;;  %v6087_v56 = vld [vmem:[%s8336_s4 + $0x200] sm:$0xf] }
 0x505   : > { %v2207_v44 = vpop.f32.mrf.mxu3  ;;  %3129 = vmatpush.bf16.msra.mxu0 %v6024_v34  ;;  %v5895_v34 = vld [vmem:[%s8336_s4 + $0x80] sm:$0xf]  ;;  %v7187_v17 = vld [vmem:[%s8336_s4 + $0x204] sm:$0xf] }
 0x506   : > { %v2208_v3 = vadd.f32 %v2207_v44, %v2188_v50  ;;  %2235 = vadd.xlane.f32.xlu2 %v2234_v11  ;;  %v7239_v11 = vld [vmem:[%s8336_s4 + $0x39c] sm:$0xf0]  ;;  %v7171_v50 = vld [vmem:[%s8336_s4 + $0x184] sm:$0xf] }
 0x507   : > { %v6025_v44 = vld [vmem:[%s8336_s4 + $0x1a0] sm:$0xf0]  ;;  %v6280_v49 = vor.u32 %v7239_v11, %v6279_v27  ;;  %v6188_v27 = vor.u32 %v7211_v29, %v6185_v21  ;;  %v7143_v11 = vld [vmem:[%s8336_s4 + $0x9c] sm:$0xf0] }
 0x508   : > { %v2217_v55 = vadd.f32 %v7725_v52, %v2208_v3  ;;  %v6028_v51 = vor.u32 %v7171_v50, %v6025_v44  ;;  %v7235_v3 = vld [vmem:[%s8336_s4 + $0x384] sm:$0xf]  ;;  %v6151_v50 = vld [vmem:[%s8336_s4 + $0x280] sm:$0xf]  ;;  %v5896_v44 = vor.u32 %v7143_v11, %v5895_v34  ;;  %v7180_v34 = vld [vmem:[%s8336_s4 + $0x1cc] sm:$0xf] }
 0x509   : > { %v6281_v52 = vld [vmem:[%s8336_s4 + $0x3a0] sm:$0xf0]  ;;  %3148 = vmatpush.bf16.msra.mxu1 %v6280_v49  ;;  %v7207_v49 = vld [vmem:[%s8336_s4 + $0x29c] sm:$0xf0]  ;;  %v6065_v11 = vld [vmem:[%s8336_s4 + $0x1e8] sm:$0xf0] }
 0x50a   : > { %v8917_v47 = vadd.f32 %v2219_v42, %v2217_v55  ;;  %v6284_v55 = vor.u32 %v7235_v3, %v6281_v52  ;;  %3167 = vmatpush.bf16.msra.mxu2 %v6028_v51  ;;  %v7139_v51 = vld [vmem:[%s8336_s4 + $0x84] sm:$0xf]  ;;  %v6152_v52 = vor.u32 %v7207_v49, %v6151_v50  ;;  %v7191_v53 = vld [vmem:[%s8336_s4 + $0x21c] sm:$0xf0]  ;;  %v6068_v49 = vor.u32 %v7180_v34, %v6065_v11 }
 0x50b   : > { %v5897_v3 = vld [vmem:[%s8336_s4 + $0xa0] sm:$0xf0]  ;;  %v6088_v13 = vor.u32 %v7191_v53, %v6087_v56  ;;  %v7232_v56 = vld [vmem:[%s8336_s4 + $0x364] sm:$0xf0]  ;;  %v7164_v53 = vld [vmem:[%s8336_s4 + $0x14c] sm:$0xf] }
 0x50c   : > { %v2237_v20 = vadd.f32 %v8917_v47, %v8915_v37  ;;  %3186 = vmatpush.bf16.msra.mxu3 %v6284_v55  ;;  %v5900_v55 = vor.u32 %v7139_v51, %v5897_v3  ;;  %v7244_v51 = vld [vmem:[%s8336_s4 + $0x3cc] sm:$0xf] }
 0x50d   : > { %v6321_v3 = vld [vmem:[%s8336_s4 + $0x3e8] sm:$0xf0] }
 0x50e   : > { %2238 = vadd.xlane.f32.xlu0 %v2237_v20  ;;  %v5991_v20 = vld [vmem:[%s8336_s4 + $0x140] sm:$0xf] }
 0x568   : > { %v2230_v57 = vpop.xlane.xlu0 %2229 }
 0x569   : > { %v2240_v58 = vmul.f32 %v2230_v57, %v8347_v26  ;;  %v7167_v57 = vld [vmem:[%s8336_s4 + $0x15c] sm:$0xf0] }
 0x56b   : > { %v8923_v15 = vsub.f32 %v8897_v39, %v2240_v58  ;;  %v8926_v59 = vsub.f32 %v8899_v6, %v2240_v58  ;;  %v6247_v58 = vld [vmem:[%s8336_s4 + $0x340] sm:$0xf] }
 0x56d   : > { %v2252_v60 = vmul.f32 %v8923_v15, %v8923_v15  ;;  %v2253_v19 = vmul.f32 %v8926_v59, %v8926_v59 }
 0x56f   : > { %v2260_v33 = vadd.f32 %v2253_v19, %v2252_v60  ;;  %v5992_v60 = vor.u32 %v7167_v57, %v5991_v20  ;;  %v7231_v19 = vld [vmem:[%s8336_s4 + $0x35c] sm:$0xf0]  ;;  %v7203_v20 = vld [vmem:[%s8336_s4 + $0x284] sm:$0xf] }
 0x570   : > { %v2233_v40 = vpop.xlane.xlu1 %2232  ;;  %v6153_v57 = vld [vmem:[%s8336_s4 + $0x2a0] sm:$0xf0] }
 0x571   : > { %v2241_v38 = vmul.f32 %v2233_v40, %v8347_v26  ;;  %2261 = vadd.xlane.f32.xlu1 %v2260_v33  ;;  %v7163_v33 = vld [vmem:[%s8336_s4 + $0x144] sm:$0xf]  ;;  %3130 = vmatpush.bf16.msra.mxu0 %v5992_v60  ;;  %v5863_v60 = vld [vmem:[%s8336_s4 + $0x40] sm:$0xf] }
 0x572   : > { %v5993_v40 = vld [vmem:[%s8336_s4 + $0x160] sm:$0xf0] }
 0x573   : > { %v8934_v43 = vsub.f32 %v8903_v14, %v2241_v38  ;;  %v8937_v4 = vsub.f32 %v8905_v16, %v2241_v38  ;;  %v6248_v38 = vor.u32 %v7231_v19, %v6247_v58  ;;  %v6156_v58 = vor.u32 %v7203_v20, %v6153_v57  ;;  %v7135_v19 = vld [vmem:[%s8336_s4 + $0x5c] sm:$0xf0]  ;;  %v6031_v57 = vld [vmem:[%s8336_s4 + $0x188] sm:$0xf] }
 0x575   : > { %v2254_v61 = vmul.f32 %v8934_v43, %v8934_v43  ;;  %v2255_v45 = vmul.f32 %v8937_v4, %v8937_v4  ;;  %3149 = vmatpush.bf16.msra.mxu1 %v6248_v38  ;;  %v5864_v38 = vor.u32 %v7135_v19, %v5863_v60 }
 0x577   : > { %v2263_v62 = vadd.f32 %v2255_v45, %v2254_v61  ;;  %v5996_v61 = vor.u32 %v7163_v33, %v5993_v40  ;;  %v7227_v45 = vld [vmem:[%s8336_s4 + $0x344] sm:$0xf]  ;;  %v6119_v33 = vld [vmem:[%s8336_s4 + $0x240] sm:$0xf] }
 0x579   : > { %v2236_v54 = vpop.xlane.xlu2 %2235  ;;  %2264 = vadd.xlane.f32.xlu2 %v2263_v62  ;;  %v6249_v62 = vld [vmem:[%s8336_s4 + $0x360] sm:$0xf0]  ;;  %3168 = vmatpush.bf16.msra.mxu2 %v5996_v61  ;;  %v7199_v61 = vld [vmem:[%s8336_s4 + $0x25c] sm:$0xf0] }
 0x57a   : > { %v2242_v1 = vmul.f32 %v2236_v54, %v8347_v26  ;;  %v6252_v54 = vor.u32 %v7227_v45, %v6249_v62  ;;  %v7131_v45 = vld [vmem:[%s8336_s4 + $0x44] sm:$0xf] }
 0x57b   : > { %v5865_v62 = vld [vmem:[%s8336_s4 + $0x60] sm:$0xf0] }
 0x57c   : > { %v8945_v10 = vsub.f32 %v8909_v0, %v2242_v1  ;;  %v8948_v42 = vsub.f32 %v8911_v35, %v2242_v1  ;;  %v5959_v1 = vld [vmem:[%s8336_s4 + $0x100] sm:$0xf]  ;;  %3187 = vmatpush.bf16.msra.mxu3 %v6252_v54 }
 0x57e   : > { %v2256_v36 = vmul.f32 %v8945_v10, %v8945_v10  ;;  %v2257_v5 = vmul.f32 %v8948_v42, %v8948_v42 }
 0x580   : > { %v2266_v30 = vadd.f32 %v2257_v5, %v2256_v36  ;;  %v7159_v36 = vld [vmem:[%s8336_s4 + $0x11c] sm:$0xf0]  ;;  %3188 = vmatpush.bf16.msra.mxu3 %v6220_v32  ;;  %v7123_v32 = vld [vmem:[%s8336_s4 + $0x4] sm:$0xf] }
 0x581   : > { %v2239_v31 = vpop.xlane.xlu0 %2238  ;;  %v6215_v5 = vld [vmem:[%s8336_s4 + $0x300] sm:$0xf]  ;;  %v5836_v22 = vor.u32 %v7123_v32, %v5833_v48  ;;  %v6001_v48 = vld [vmem:[%s8336_s4 + $0x168] sm:$0xf0] }
 0x582   : > { %v2243_v7 = vmul.f32 %v2239_v31, %v8347_v26  ;;  %2267 = vadd.xlane.f32.xlu0 %v2266_v30  ;;  %v5960_v30 = vor.u32 %v7159_v36, %v5959_v1  ;;  %v7223_v31 = vld [vmem:[%s8336_s4 + $0x31c] sm:$0xf0]  ;;  %v6120_v1 = vor.u32 %v7199_v61, %v6119_v33  ;;  %v5868_v36 = vor.u32 %v7131_v45, %v5865_v62  ;;  %v6287_v33 = vld [vmem:[%s8336_s4 + $0x388] sm:$0xf]  ;;  %v6033_v45 = vld [vmem:[%s8336_s4 + $0x1a8] sm:$0xf0] }
 0x583   : > { %v7236_v62 = vld [vmem:[%s8336_s4 + $0x38c] sm:$0xf] }
 0x584   : > { %v8956_v8 = vsub.f32 %v8915_v37, %v2243_v7  ;;  %v8959_v12 = vsub.f32 %v8917_v47, %v2243_v7  ;;  %v7155_v7 = vld [vmem:[%s8336_s4 + $0x104] sm:$0xf]  ;;  %3131 = vmatpush.bf16.msra.mxu0 %v5960_v30  ;;  %3189 = vmatpush.bf16.msra.mxu3 %v6188_v27  ;;  %v7248_v27 = vld [vmem:[%s8336_s4 + $0x3e4] sm:$0xf0] }
 0x585   : > { %v6121_v30 = vld [vmem:[%s8336_s4 + $0x260] sm:$0xf0] }
 0x586   : > { %v2258_v41 = vmul.f32 %v8956_v8, %v8956_v8  ;;  %v2259_v9 = vmul.f32 %v8959_v12, %v8959_v12 }
 0x588   : > { %v2269_v28 = vadd.f32 %v2259_v9, %v2258_v41  ;;  %v5961_v41 = vld [vmem:[%s8336_s4 + $0x120] sm:$0xf0]  ;;  %v6216_v9 = vor.u32 %v7223_v31, %v6215_v5  ;;  %3132 = vmatpush.bf16.msra.mxu0 %v5928_v18  ;;  %3190 = vmatpush.bf16.msra.mxu3 %v6156_v58  ;;  %v7176_v58 = vld [vmem:[%s8336_s4 + $0x1a4] sm:$0xf0] }
 0x589   : > { %v7195_v5 = vld [vmem:[%s8336_s4 + $0x244] sm:$0xf]  ;;  %v6032_v19 = vor.u32 %v7176_v58, %v6031_v57  ;;  %v5969_v57 = vld [vmem:[%s8336_s4 + $0x128] sm:$0xf0] }
 0x58a   : > { %2270 = vadd.xlane.f32.xlu1 %v2269_v28  ;;  %v5964_v28 = vor.u32 %v7155_v7, %v5961_v41  ;;  %3150 = vmatpush.bf16.msra.mxu1 %v6216_v9  ;;  %v6124_v31 = vor.u32 %v7195_v5, %v6121_v30  ;;  %v5831_v41 = vld [vmem:[%s8336_s4] sm:$0xf]  ;;  %v6089_v18 = vld [vmem:[%s8336_s4 + $0x220] sm:$0xf0]  ;;  %v5999_v30 = vld [vmem:[%s8336_s4 + $0x148] sm:$0xf] }
 0x58b   : > { %v7127_v9 = vld [vmem:[%s8336_s4 + $0x1c] sm:$0xf0]  ;;  %v6092_v23 = vor.u32 %v7187_v17, %v6089_v18  ;;  %v7228_v17 = vld [vmem:[%s8336_s4 + $0x34c] sm:$0xf] }
 0x58c   : > { %3169 = vmatpush.bf16.msra.mxu2 %v5964_v28  ;;  %3133 = vmatpush.bf16.msra.mxu0 %v5896_v44  ;;  %v5832_v28 = vor.u32 %v7127_v9, %v5831_v41  ;;  %v6255_v41 = vld [vmem:[%s8336_s4 + $0x348] sm:$0xf]  ;;  %v6257_v18 = vld [vmem:[%s8336_s4 + $0x368] sm:$0xf0] }
 0x58d   : > { %3191 = vmatpush.bf16.msra.mxu3 %v6124_v31  ;;  %v7168_v31 = vld [vmem:[%s8336_s4 + $0x164] sm:$0xf0]  ;;  %v7220_v58 = vld [vmem:[%s8336_s4 + $0x30c] sm:$0xf] }
 0x58e   : > { %3151 = vmatpush.bf16.msra.mxu1 %v6184_v25  ;;  %v7184_v25 = vld [vmem:[%s8336_s4 + $0x1e4] sm:$0xf0] }
 0x58f   : > { %v6064_v21 = vor.u32 %v7184_v25, %v6063_v24  ;;  %v6004_v24 = vor.u32 %v7164_v53, %v6001_v48  ;;  %v6260_v25 = vor.u32 %v7228_v17, %v6257_v18  ;;  %v7144_v48 = vld [vmem:[%s8336_s4 + $0xa4] sm:$0xf0] }
 0x590   : > { %3170 = vmatpush.bf16.msra.mxu2 %v5932_v63  ;;  %3134 = vmatpush.bf16.msra.mxu0 %v5864_v38  ;;  %v6319_v63 = vld [vmem:[%s8336_s4 + $0x3c8] sm:$0xf]  ;;  %v7172_v38 = vld [vmem:[%s8336_s4 + $0x18c] sm:$0xf] }
 0x591   : > { %3192 = vmatpush.bf16.msra.mxu3 %v6092_v23  ;;  %v6320_v44 = vor.u32 %v7248_v27, %v6319_v63  ;;  %v6223_v27 = vld [vmem:[%s8336_s4 + $0x308] sm:$0xf] }
 0x592   : > { %3152 = vmatpush.bf16.msra.mxu1 %v6152_v52  ;;  %v6324_v52 = vor.u32 %v7244_v51, %v6321_v3  ;;  %v9082_v51 = vperm.slane %v8890_v46, 2  ;;  %v9085_v3 = vperm.slane %v8894_v2, 2  ;;  %v6159_v18 = vld [vmem:[%s8336_s4 + $0x288] sm:$0xf] }
 0x594   : > { %3171 = vmatpush.bf16.msra.mxu2 %v5900_v55  ;;  %3135 = vmatpush.bf16.msra.mxu0 %v5832_v28  ;;  %v6000_v28 = vor.u32 %v7168_v31, %v5999_v30 }
 0x595   : > { %3261 = vmatpush.bf16.msrb.mxu3 %v6324_v52 }
 0x596   : > { %3153 = vmatpush.bf16.msra.mxu1 %v6120_v1  ;;  %v6036_v1 = vor.u32 %v7172_v38, %v6033_v45  ;;  %v7152_v45 = vld [vmem:[%s8336_s4 + $0xe4] sm:$0xf0] }
 0x598   : > { %3172 = vmatpush.bf16.msra.mxu2 %v5868_v36  ;;  %3204 = vmatpush.bf16.msrb.mxu0 %v6064_v21  ;;  %v6289_v36 = vld [vmem:[%s8336_s4 + $0x3a8] sm:$0xf0]  ;;  %v7160_v21 = vld [vmem:[%s8336_s4 + $0x124] sm:$0xf0] }
 0x599   : > { %v6292_v5 = vor.u32 %v7236_v62, %v6289_v36  ;;  %v6191_v62 = vld [vmem:[%s8336_s4 + $0x2c8] sm:$0xf] }
 0x59a   : > { %3154 = vmatpush.bf16.msra.mxu1 %v6088_v13  ;;  %v6256_v13 = vor.u32 %v7232_v56, %v6255_v41  ;;  %v7216_v36 = vld [vmem:[%s8336_s4 + $0x2e4] sm:$0xf0]  ;;  %v6193_v56 = vld [vmem:[%s8336_s4 + $0x2e8] sm:$0xf0] }
 0x59b   : > { %3262 = vmatpush.bf16.msrb.mxu3 %v6292_v5  ;;  %v7148_v5 = vld [vmem:[%s8336_s4 + $0xcc] sm:$0xf] }
 0x59c   : > { %3173 = vmatpush.bf16.msra.mxu2 %v5836_v22  ;;  %3205 = vmatpush.bf16.msrb.mxu0 %v6032_v19 }
 0x59e   : > { %3223 = vmatpush.bf16.msrb.mxu1 %v6320_v44  ;;  %v7224_v44 = vld [vmem:[%s8336_s4 + $0x324] sm:$0xf0] }
 0x59f   : > { %3263 = vmatpush.bf16.msrb.mxu3 %v6260_v25  ;;  %v6224_v52 = vor.u32 %v7224_v44, %v6223_v27  ;;  %v7204_v27 = vld [vmem:[%s8336_s4 + $0x28c] sm:$0xf] }
 0x5a0   : > { %3242 = vmatpush.bf16.msrb.mxu2 %v6068_v49  ;;  %3206 = vmatpush.bf16.msrb.mxu0 %v6000_v28  ;;  %v7156_v49 = vld [vmem:[%s8336_s4 + $0x10c] sm:$0xf] }
 0x5a1   : > { %v5972_v38 = vor.u32 %v7156_v49, %v5969_v57  ;;  %v7212_v28 = vld [vmem:[%s8336_s4 + $0x2cc] sm:$0xf] }
 0x5a2   : > { %v6161_v49 = vld [vmem:[%s8336_s4 + $0x2a8] sm:$0xf0] }
 0x5a4   : > { %3243 = vmatpush.bf16.msrb.mxu2 %v6036_v1 }
 0x5a8   : > { %3244 = vmatpush.bf16.msrb.mxu2 %v6004_v24 }
 0x5ac   : > { %3245 = vmatpush.bf16.msrb.mxu2 %v5972_v38 }
 0x5e4   : > { %v2262_v40 = vpop.xlane.xlu1 %2261 }
 0x5e5   : > { %v2272_v54 = vmul.f32 %v2262_v40, %v8347_v26  ;;  %v7240_v40 = vld [vmem:[%s8336_s4 + $0x3a4] sm:$0xf0] }
 0x5e6   : > { %v6288_v61 = vor.u32 %v7240_v40, %v6287_v33  ;;  %v6225_v40 = vld [vmem:[%s8336_s4 + $0x328] sm:$0xf0] }
 0x5e7   : > { %v9022_v7 = vadd.f32 1e-05, %v2272_v54  ;;  %v6228_v1 = vor.u32 %v7220_v58, %v6225_v40  ;;  %v7200_v40 = vld [vmem:[%s8336_s4 + $0x264] sm:$0xf0] }
 0x5e8   : > { %3224 = vmatpush.bf16.msrb.mxu1 %v6288_v61  ;;  %v5935_v61 = vld [vmem:[%s8336_s4 + $0xc8] sm:$0xf] }
 0x5e9   : > { %7580 = vrsqrt.f32 %v9022_v7  ;;  %vm2286_vm15 = vweird.f32 %v9022_v7  ;;  %3264 = vmatpush.bf16.msrb.mxu3 %v6228_v1 }
 0x5ec   : > { %v2265_v29 = vpop.xlane.xlu2 %2264  ;;  %3225 = vmatpush.bf16.msrb.mxu1 %v6256_v13 }
 0x5ed   : > { %v2273_v50 = vmul.f32 %v2265_v29, %v8347_v26  ;;  %v5967_v29 = vld [vmem:[%s8336_s4 + $0x108] sm:$0xf] }
 0x5ef   : > { %v9042_v55 = vpop.eup %7580  ;;  %v9044_v20 = vadd.f32 1e-05, %v2273_v50 }
 0x5f0   : > { %v2281_v60 = vmul.f32 %v9042_v55, %v9022_v7  ;;  %vm2287_vm14 = vweird.f32 %v9042_v55  ;;  %v5968_v7 = vor.u32 %v7160_v21, %v5967_v29  ;;  %3226 = vmatpush.bf16.msrb.mxu1 %v6224_v52  ;;  %v5905_v21 = vld [vmem:[%s8336_s4 + $0xa8] sm:$0xf0]  ;;  %v7136_v52 = vld [vmem:[%s8336_s4 + $0x64] sm:$0xf0] }
 0x5f1   : > { %7582 = vrsqrt.f32 %v9044_v20  ;;  %vm2288_vm0 = vmor %vm2286_vm15, %vm2287_vm14  ;;  %vm2296_vm2 = vweird.f32 %v9044_v20 }
 0x5f2   : > { %v2282_v54 = vmul.f32 %v9042_v55, %v2281_v60  ;;  %v9092_v60 = vperm.slane %v8890_v46, 3  ;;  %3207 = vmatpush.bf16.msrb.mxu0 %v5968_v7  ;;  %v9102_v46 = vperm.slane %v8894_v2, 3  ;;  %v5937_v2 = vld [vmem:[%s8336_s4 + $0xe8] sm:$0xf0]  ;;  %v5871_v7 = vld [vmem:[%s8336_s4 + $0x48] sm:$0xf] }
 0x5f3   : > { %v5940_v13 = vor.u32 %v7148_v5, %v5937_v2  ;;  %v5872_v1 = vor.u32 %v7136_v52, %v5871_v7  ;;  %v5839_v5 = vld [vmem:[%s8336_s4 + $0x8] sm:$0xf]  ;;  %v6071_v7 = vld [vmem:[%s8336_s4 + $0x1d0] sm:$0xf] }
 0x5f4   : > { %v2283_v9 = vmul.f32 0.5, %v2282_v54  ;;  %v7192_v2 = vld [vmem:[%s8336_s4 + $0x224] sm:$0xf0]  ;;  %v7185_v52 = vld [vmem:[%s8336_s4 + $0x1ec] sm:$0xf0] }
 0x5f5   : > { %v2268_v32 = vpop.xlane.xlu0 %2267  ;;  %3246 = vmatpush.bf16.msrb.mxu2 %v5940_v13  ;;  %v5841_v13 = vld [vmem:[%s8336_s4 + $0x28] sm:$0xf0] }
 0x5f6   : > { %v2284_v22 = vsub.f32 1.5, %v2283_v9  ;;  %v2274_v23 = vmul.f32 %v2268_v32, %v8347_v26  ;;  %v6192_v9 = vor.u32 %v7216_v36, %v6191_v62  ;;  %v5873_v62 = vld [vmem:[%s8336_s4 + $0x68] sm:$0xf0] }
 0x5f7   : > { %v9068_v63 = vpop.eup %7582  ;;  %v6129_v36 = vld [vmem:[%s8336_s4 + $0x268] sm:$0xf0] }
 0x5f8   : > { %v2285_v34 = vmul.f32 %v9042_v55, %v2284_v22  ;;  %v2291_v11 = vmul.f32 %v9068_v63, %v9044_v20  ;;  %v9077_v50 = vadd.f32 1e-05, %v2274_v23  ;;  %vm2297_vm1 = vweird.f32 %v9068_v63  ;;  %3227 = vmatpush.bf16.msrb.mxu1 %v6192_v9  ;;  %v7208_v22 = vld [vmem:[%s8336_s4 + $0x2a4] sm:$0xf0]  ;;  %v7140_v23 = vld [vmem:[%s8336_s4 + $0x8c] sm:$0xf] }
 0x5f9   : > { %vm2298_vm3 = vmor %vm2296_vm2, %vm2297_vm1  ;;  %v6160_v20 = vor.u32 %v7208_v22, %v6159_v18  ;;  %v5908_v44 = vor.u32 %v7140_v23, %v5905_v21  ;;  %v6095_v9 = vld [vmem:[%s8336_s4 + $0x208] sm:$0xf]  ;;  %v6097_v18 = vld [vmem:[%s8336_s4 + $0x228] sm:$0xf0] }
 0x5fa   : > { %v2289_v19 = vsel %vm2288_vm0, %v9042_v55, %v2285_v34  ;;  %v2292_v33 = vmul.f32 %v9068_v63, %v2291_v11  ;;  %7584 = vrsqrt.f32 %v9077_v50  ;;  %v5936_v55 = vor.u32 %v7152_v45, %v5935_v61 }
 0x5fb   : > { %v2320_v30 = vmul.f32 %v2289_v19, %v8923_v15  ;;  %v2321_v31 = vmul.f32 %v2289_v19, %v8926_v59  ;;  %v6196_v15 = vor.u32 %v7212_v28, %v6193_v56  ;;  %v5903_v59 = vld [vmem:[%s8336_s4 + $0x88] sm:$0xf]  ;;  %v6164_v19 = vor.u32 %v7204_v27, %v6161_v49  ;;  %3247 = vmatpush.bf16.msrb.mxu2 %v5908_v44 }
 0x5fc   : > { %v2293_v54 = vmul.f32 0.5, %v2292_v33  ;;  %3208 = vmatpush.bf16.msrb.mxu0 %v5936_v55  ;;  %v5904_v17 = vor.u32 %v7144_v48, %v5903_v59  ;;  %v6127_v33 = vld [vmem:[%s8336_s4 + $0x248] sm:$0xf]  ;;  %3228 = vmatpush.bf16.msrb.mxu1 %v6160_v20  ;;  %vm2306_vm5 = vweird.f32 %v9077_v50 }
 0x5fd   : > { %v2271_v41 = vpop.xlane.xlu1 %2270  ;;  %v2330_v34 = vmul.f32 %v9082_v51, %v2320_v30  ;;  %v2331_v57 = vmul.f32 %v9085_v3, %v2321_v31  ;;  %3265 = vmatpush.bf16.msrb.mxu3 %v6196_v15  ;;  %v6128_v55 = vor.u32 %v7200_v40, %v6127_v33  ;;  %v7128_v30 = vld [vmem:[%s8336_s4 + $0x24] sm:$0xf0] }
 0x5fe   : > { %v2294_v53 = vsub.f32 1.5, %v2293_v54  ;;  %v2275_v32 = vmul.f32 %v2271_v41, %v8347_v26  ;;  %v7196_v54 = vld [vmem:[%s8336_s4 + $0x24c] sm:$0xf]  ;;  %v5840_v23 = vor.u32 %v7128_v30, %v5839_v5  ;;  %v6295_v5 = vld [vmem:[%s8336_s4 + $0x390] sm:$0xf] }
 0x5ff   : > { %v2340_v28 = vadd.f32 %v9092_v60, %v2330_v34  ;;  %v2341_v56 = vadd.f32 %v9102_v46, %v2331_v57  ;;  %v6072_v57 = vor.u32 %v7185_v52, %v6071_v7  ;;  %v7241_v30 = vld [vmem:[%s8336_s4 + $0x3ac] sm:$0xf0] }
 0x600   : > { %v9119_v24 = vpop.eup %7584  ;;  %v2295_v25 = vmul.f32 %v9068_v63, %v2294_v53  ;;  %v9124_v29 = vadd.f32 1e-05, %v2275_v32  ;;  %3209 = vmatpush.bf16.msrb.mxu0 %v5904_v17  ;;  %v6132_v53 = vor.u32 %v7196_v54, %v6129_v36  ;;  %v7124_v32 = vld [vmem:[%s8336_s4 + $0xc] sm:$0xf]  ;;  %3229 = vmatpush.bf16.msrb.mxu1 %v6128_v55  ;;  %v6039_v54 = vld [vmem:[%s8336_s4 + $0x190] sm:$0xf] }
 0x601   : > { %v2301_v11 = vmul.f32 %v9119_v24, %v9077_v50  ;;  %3266 = vmatpush.bf16.msrb.mxu3 %v6164_v19  ;;  %vm2307_vm4 = vweird.f32 %v9119_v24  ;;  %v7188_v17 = vld [vmem:[%s8336_s4 + $0x20c] sm:$0xf]  ;;  %v5844_v50 = vor.u32 %v7124_v32, %v5841_v13  ;;  %v7181_v19 = vld [vmem:[%s8336_s4 + $0x1d4] sm:$0xf]  ;;  %v7169_v32 = vld [vmem:[%s8336_s4 + $0x16c] sm:$0xf0] }
 0x602   : > { %v2299_v58 = vsel %vm2298_vm3, %v9068_v63, %v2295_v25  ;;  %7586 = vrsqrt.f32 %v9124_v29  ;;  %v7132_v63 = vld [vmem:[%s8336_s4 + $0x4c] sm:$0xf]  ;;  %v6096_v25 = vor.u32 %v7192_v2, %v6095_v9  ;;  %vm2308_vm6 = vmor %vm2306_vm5, %vm2307_vm4  ;;  %vm2316_vm8 = vweird.f32 %v9124_v29  ;;  %v7237_v9 = vld [vmem:[%s8336_s4 + $0x394] sm:$0xf] }
 0x603   : > { %v2322_v38 = vmul.f32 %v2299_v58, %v8934_v43  ;;  %v2323_v61 = vmul.f32 %v2299_v58, %v8937_v4  ;;  %v2302_v45 = vmul.f32 %v9119_v24, %v2301_v11  ;;  %v5876_v41 = vor.u32 %v7132_v63, %v5873_v62  ;;  %v7249_v58 = vld [vmem:[%s8336_s4 + $0x3ec] sm:$0xf0]  ;;  %v6329_v62 = vld [vmem:[%s8336_s4 + $0x3f0] sm:$0xf0] }
 0x604   : > { %3210 = vmatpush.bf16.msrb.mxu0 %v5872_v1  ;;  %v6100_v11 = vor.u32 %v7188_v17, %v6097_v18  ;;  %3230 = vmatpush.bf16.msrb.mxu1 %v6096_v25  ;;  %v7177_v1 = vld [vmem:[%s8336_s4 + $0x1ac] sm:$0xf0]  ;;  %v6009_v25 = vld [vmem:[%s8336_s4 + $0x170] sm:$0xf0] }
 0x605   : > { %v2332_v43 = vmul.f32 %v9082_v51, %v2322_v38  ;;  %v2333_v4 = vmul.f32 %v9085_v3, %v2323_v61  ;;  %v2303_v31 = vmul.f32 0.5, %v2302_v45  ;;  %3248 = vmatpush.bf16.msrb.mxu2 %v5876_v41  ;;  %3267 = vmatpush.bf16.msrb.mxu3 %v6132_v53  ;;  %v6073_v38 = vld [vmem:[%s8336_s4 + $0x1f0] sm:$0xf0]  ;;  %v6007_v53 = vld [vmem:[%s8336_s4 + $0x150] sm:$0xf] }
 0x606   : > { %v7245_v61 = vld [vmem:[%s8336_s4 + $0x3d4] sm:$0xf]  ;;  %v6076_v63 = vor.u32 %v7181_v19, %v6073_v38  ;;  %v6008_v18 = vor.u32 %v7169_v32, %v6007_v53  ;;  %v7161_v7 = vld [vmem:[%s8336_s4 + $0x12c] sm:$0xf0] }
 0x607   : > { %v2342_v15 = vadd.f32 %v9092_v60, %v2332_v43  ;;  %v2343_v59 = vadd.f32 %v9102_v46, %v2333_v4  ;;  %v2304_v48 = vsub.f32 1.5, %v2303_v31  ;;  %v6296_v4 = vor.u32 %v7241_v30, %v6295_v5  ;;  %v7173_v31 = vld [vmem:[%s8336_s4 + $0x194] sm:$0xf]  ;;  %v6231_v52 = vld [vmem:[%s8336_s4 + $0x310] sm:$0xf] }
 0x608   : > { %v9161_v22 = vpop.eup %7586  ;;  %3211 = vmatpush.bf16.msrb.mxu0 %v5840_v23  ;;  %v6041_v41 = vld [vmem:[%s8336_s4 + $0x1b0] sm:$0xf0]  ;;  %v5943_v36 = vld [vmem:[%s8336_s4 + $0xd0] sm:$0xf] }
 0x609   : > { %v9164_v20 = vpack.c.bf16 %v2342_v15, %v2340_v28  ;;  %v9166_v21 = vpack.c.bf16 %v2343_v59, %v2341_v56  ;;  %v2305_v27 = vmul.f32 %v9119_v24, %v2304_v48  ;;  %v2311_v34 = vmul.f32 %v9161_v22, %v9124_v29  ;;  %3249 = vmatpush.bf16.msrb.mxu2 %v5844_v50  ;;  %v6297_v56 = vld [vmem:[%s8336_s4 + $0x3b0] sm:$0xf0]  ;;  %v7233_v59 = vld [vmem:[%s8336_s4 + $0x36c] sm:$0xf0] }
 0x60a   : > { %vm2317_vm7 = vweird.f32 %v9161_v22  ;;  %3268 = vmatpush.bf16.msrb.mxu3 %v6100_v11  ;;  %v6040_v29 = vor.u32 %v7177_v1, %v6039_v54  ;;  %v6044_v28 = vor.u32 %v7173_v31, %v6041_v41  ;;  %v6300_v15 = vor.u32 %v7237_v9, %v6297_v56  ;;  %v7165_v48 = vld [vmem:[%s8336_s4 + $0x154] sm:$0xf]  ;;  %v5911_v41 = vld [vmem:[%s8336_s4 + $0x90] sm:$0xf] }
 0x60b   : > { %v2309_v44 = vsel %vm2308_vm6, %v9119_v24, %v2305_v27  ;;  %v2312_v49 = vmul.f32 %v9161_v22, %v2311_v34  ;;  %3136 = vmatmul.bf16.vlgmr.msra.gmra.mxu0 %v9164_v20  ;;  %3155 = vmatmul.bf16.vlgmr.msra.gmra.mxu1 %v9166_v21  ;;  %v6327_v24 = vld [vmem:[%s8336_s4 + $0x3d0] sm:$0xf]  ;;  %vm9192_vm9 = vmor %vm2316_vm8, %vm2317_vm7  ;;  %v7229_v27 = vld [vmem:[%s8336_s4 + $0x354] sm:$0xf] }
 0x60c   : > { %3174 = vmatmul.bf16.vlgmr.msra.gmra.mxu2 %v9164_v20  ;;  %3193 = vmatmul.bf16.vlgmr.msra.gmra.mxu3 %v9166_v21  ;;  %v6328_v40 = vor.u32 %v7249_v58, %v6327_v24  ;;  %v2324_v45 = vmul.f32 %v2309_v44, %v8945_v10  ;;  %v6332_v10 = vor.u32 %v7245_v61, %v6329_v62  ;;  %v6265_v34 = vld [vmem:[%s8336_s4 + $0x370] sm:$0xf0]  ;;  %v7225_v24 = vld [vmem:[%s8336_s4 + $0x32c] sm:$0xf0] }
 0x60d   : > { %v2313_v33 = vmul.f32 0.5, %v2312_v49  ;;  %3280 = vmatpush.bf16.msra.mxu0 %v6072_v57  ;;  %v2325_v43 = vmul.f32 %v2309_v44, %v8948_v42  ;;  %3318 = vmatpush.bf16.msra.mxu2 %v6076_v63  ;;  %v6263_v42 = vld [vmem:[%s8336_s4 + $0x350] sm:$0xf]  ;;  %v6012_v49 = vor.u32 %v7165_v48, %v6009_v25  ;;  %v6268_v57 = vor.u32 %v7229_v27, %v6265_v34  ;;  %v7221_v38 = vld [vmem:[%s8336_s4 + $0x314] sm:$0xf] }
 0x60e   : > { %3299 = vmatpush.bf16.msra.mxu1 %v6328_v40  ;;  %3337 = vmatpush.bf16.msra.mxu3 %v6332_v10  ;;  %v2334_v13 = vmul.f32 %v9082_v51, %v2324_v45  ;;  %v6264_v23 = vor.u32 %v7233_v59, %v6263_v42  ;;  %v5977_v40 = vld [vmem:[%s8336_s4 + $0x130] sm:$0xf0]  ;;  %v6199_v10 = vld [vmem:[%s8336_s4 + $0x2d0] sm:$0xf] }
 0x60f   : > { %v2314_v55 = vsub.f32 1.5, %v2313_v33  ;;  %v2335_v50 = vmul.f32 %v9085_v3, %v2325_v43  ;;  %v7157_v33 = vld [vmem:[%s8336_s4 + $0x114] sm:$0xf]  ;;  %v6167_v56 = vld [vmem:[%s8336_s4 + $0x290] sm:$0xf] }
 0x610   : > { %v6233_v61 = vld [vmem:[%s8336_s4 + $0x330] sm:$0xf0]  ;;  %v2344_v45 = vadd.f32 %v9092_v60, %v2334_v13  ;;  %v5980_v1 = vor.u32 %v7157_v33, %v5977_v40  ;;  %v7209_v53 = vld [vmem:[%s8336_s4 + $0x2ac] sm:$0xf0] }
 0x611   : > { %v2315_v2 = vmul.f32 %v9161_v22, %v2314_v55  ;;  %3281 = vmatpush.bf16.msra.mxu0 %v6040_v29  ;;  %3319 = vmatpush.bf16.msra.mxu2 %v6044_v28  ;;  %v2345_v63 = vadd.f32 %v9102_v46, %v2335_v50  ;;  %v6236_v55 = vor.u32 %v7221_v38, %v6233_v61  ;;  %v7217_v29 = vld [vmem:[%s8336_s4 + $0x2ec] sm:$0xf0]  ;;  %v7149_v5 = vld [vmem:[%s8336_s4 + $0xd4] sm:$0xf] }
 0x612   : > { %3300 = vmatpush.bf16.msra.mxu1 %v6296_v4  ;;  %3338 = vmatpush.bf16.msra.mxu3 %v6300_v15  ;;  %v5945_v30 = vld [vmem:[%s8336_s4 + $0xf0] sm:$0xf0]  ;;  %v6200_v43 = vor.u32 %v7217_v29, %v6199_v10  ;;  %v7145_v28 = vld [vmem:[%s8336_s4 + $0xac] sm:$0xf0]  ;;  %v6168_v13 = vor.u32 %v7209_v53, %v6167_v56  ;;  %v7182_v10 = vld [vmem:[%s8336_s4 + $0x1dc] sm:$0xf] }
 0x613   : > { %v2319_v17 = vsel %vm9192_vm9, %v9161_v22, %v2315_v2  ;;  %v5975_v22 = vld [vmem:[%s8336_s4 + $0x110] sm:$0xf]  ;;  %v7213_v4 = vld [vmem:[%s8336_s4 + $0x2d4] sm:$0xf]  ;;  %v5948_v9 = vor.u32 %v7149_v5, %v5945_v30  ;;  %v5912_v32 = vor.u32 %v7145_v28, %v5911_v41  ;;  %v7246_v30 = vld [vmem:[%s8336_s4 + $0x3dc] sm:$0xf] }
 0x614   : > { %v2326_v11 = vmul.f32 %v2319_v17, %v8956_v8  ;;  %v2327_v44 = vmul.f32 %v2319_v17, %v8959_v12  ;;  %v5976_v8 = vor.u32 %v7161_v7, %v5975_v22  ;;  %v6232_v12 = vor.u32 %v7225_v24, %v6231_v52  ;;  %v6201_v31 = vld [vmem:[%s8336_s4 + $0x2f0] sm:$0xf0]  ;;  %v5879_v17 = vld [vmem:[%s8336_s4 + $0x50] sm:$0xf]  ;;  %v7178_v41 = vld [vmem:[%s8336_s4 + $0x1b4] sm:$0xf0] }
 0x615   : > { %3282 = vmatpush.bf16.msra.mxu0 %v6008_v18  ;;  %3320 = vmatpush.bf16.msra.mxu2 %v6012_v49  ;;  %v6204_v2 = vor.u32 %v7213_v4, %v6201_v31  ;;  %v7141_v15 = vld [vmem:[%s8336_s4 + $0x94] sm:$0xf]  ;;  %v7137_v18 = vld [vmem:[%s8336_s4 + $0x6c] sm:$0xf0]  ;;  %v6047_v4 = vld [vmem:[%s8336_s4 + $0x198] sm:$0xf] }
 0x616   : > { %v2336_v58 = vmul.f32 %v9082_v51, %v2326_v11  ;;  %v2337_v19 = vmul.f32 %v9085_v3, %v2327_v44  ;;  %3301 = vmatpush.bf16.msra.mxu1 %v6264_v23  ;;  %3339 = vmatpush.bf16.msra.mxu3 %v6268_v57  ;;  %v5913_v42 = vld [vmem:[%s8336_s4 + $0xb0] sm:$0xf0]  ;;  %v6135_v23 = vld [vmem:[%s8336_s4 + $0x250] sm:$0xf]  ;;  %v5880_v44 = vor.u32 %v7137_v18, %v5879_v17  ;;  %v7174_v53 = vld [vmem:[%s8336_s4 + $0x19c] sm:$0xf] }
 0x617   : > { %v7205_v59 = vld [vmem:[%s8336_s4 + $0x294] sm:$0xf]  ;;  %v7201_v25 = vld [vmem:[%s8336_s4 + $0x26c] sm:$0xf0]  ;;  %v5916_v27 = vor.u32 %v7141_v15, %v5913_v42  ;;  %v6048_v28 = vor.u32 %v7178_v41, %v6047_v4  ;;  %v6305_v42 = vld [vmem:[%s8336_s4 + $0x3b8] sm:$0xf0] }
 0x618   : > { %v2346_v62 = vadd.f32 %v9092_v60, %v2336_v58  ;;  %v2347_v51 = vadd.f32 %v9102_v46, %v2337_v19  ;;  %v7153_v60 = vld [vmem:[%s8336_s4 + $0xec] sm:$0xf0]  ;;  %v6169_v48 = vld [vmem:[%s8336_s4 + $0x2b0] sm:$0xf0]  ;;  %v6136_v49 = vor.u32 %v7201_v25, %v6135_v23  ;;  %v6271_v18 = vld [vmem:[%s8336_s4 + $0x358] sm:$0xf] }
 0x619   : > { %3283 = vmatpush.bf16.msra.mxu0 %v5976_v8  ;;  %v5944_v46 = vor.u32 %v7153_v60, %v5943_v36  ;;  %3321 = vmatpush.bf16.msra.mxu2 %v5980_v1  ;;  %v6172_v34 = vor.u32 %v7205_v59, %v6169_v48  ;;  %v7133_v50 = vld [vmem:[%s8336_s4 + $0x54] sm:$0xf]  ;;  %v5847_v52 = vld [vmem:[%s8336_s4 + $0x10] sm:$0xf]  ;;  %v7186_v1 = vld [vmem:[%s8336_s4 + $0x1f4] sm:$0xf0] }
 0x61a   : > { %v9233_v3 = vpack.c.bf16 %v2346_v62, %v2344_v45  ;;  %v9235_v54 = vpack.c.bf16 %v2347_v51, %v2345_v63  ;;  %3302 = vmatpush.bf16.msra.mxu1 %v6232_v12  ;;  %3340 = vmatpush.bf16.msra.mxu3 %v6236_v55  ;;  %v5881_v11 = vld [vmem:[%s8336_s4 + $0x70] sm:$0xf0]  ;;  %v7129_v57 = vld [vmem:[%s8336_s4 + $0x2c] sm:$0xf0]  ;;  %v6079_v51 = vld [vmem:[%s8336_s4 + $0x1d8] sm:$0xf] }
 0x61b   : > { %v7197_v22 = vld [vmem:[%s8336_s4 + $0x254] sm:$0xf]  ;;  %v6103_v24 = vld [vmem:[%s8336_s4 + $0x210] sm:$0xf]  ;;  %v5884_v19 = vor.u32 %v7133_v50, %v5881_v11  ;;  %v5848_v12 = vor.u32 %v7129_v57, %v5847_v52  ;;  %v6335_v55 = vld [vmem:[%s8336_s4 + $0x3d8] sm:$0xf]  ;;  %v6080_v36 = vor.u32 %v7186_v1, %v6079_v51 }
 0x61c   : > { %3141 = vmatmul.bf16.gmra.mxu0 %v9233_v3  ;;  %3160 = vmatmul.bf16.gmra.mxu1 %v9235_v54  ;;  %v6137_v7 = vld [vmem:[%s8336_s4 + $0x270] sm:$0xf0]  ;;  %v7193_v58 = vld [vmem:[%s8336_s4 + $0x22c] sm:$0xf0]  ;;  %v7250_v60 = vld [vmem:[%s8336_s4 + $0x3f4] sm:$0xf0] }
 0x61d   : > { %3179 = vmatmul.bf16.gmra.mxu2 %v9233_v3  ;;  %3198 = vmatmul.bf16.gmra.mxu3 %v9235_v54  ;;  %v6140_v33 = vor.u32 %v7197_v22, %v6137_v7  ;;  %v7125_v8 = vld [vmem:[%s8336_s4 + $0x14] sm:$0xf]  ;;  %v6104_v40 = vor.u32 %v7193_v58, %v6103_v24  ;;  %v6336_v29 = vor.u32 %v7250_v60, %v6335_v55  ;;  %v6015_v59 = vld [vmem:[%s8336_s4 + $0x158] sm:$0xf]  ;;  %v7166_v25 = vld [vmem:[%s8336_s4 + $0x15c] sm:$0xf] }
 0x61e   : > { %3284 = vmatpush.bf16.msra.mxu0 %v5944_v46  ;;  %3303 = vmatpush.bf16.msra.mxu1 %v6200_v43  ;;  %v5849_v38 = vld [vmem:[%s8336_s4 + $0x30] sm:$0xf0]  ;;  %v6081_v46 = vld [vmem:[%s8336_s4 + $0x1f8] sm:$0xf0]  ;;  %v7170_v48 = vld [vmem:[%s8336_s4 + $0x174] sm:$0xf0] }
 0x61f   : > { %3322 = vmatpush.bf16.msra.mxu2 %v5948_v9  ;;  %3341 = vmatpush.bf16.msra.mxu3 %v6204_v2  ;;  %v7189_v61 = vld [vmem:[%s8336_s4 + $0x214] sm:$0xf]  ;;  %v5852_v63 = vor.u32 %v7125_v8, %v5849_v38  ;;  %v6084_v5 = vor.u32 %v7182_v10, %v6081_v46  ;;  %v6337_v43 = vld [vmem:[%s8336_s4 + $0x3f8] sm:$0xf0]  ;;  %v6303_v9 = vld [vmem:[%s8336_s4 + $0x398] sm:$0xf]  ;;  %v6016_v11 = vor.u32 %v7170_v48, %v6015_v59 }
 0x620   : > { %v6105_v45 = vld [vmem:[%s8336_s4 + $0x230] sm:$0xf0]  ;;  %v6340_v31 = vor.u32 %v7246_v30, %v6337_v43  ;;  %v7242_v2 = vld [vmem:[%s8336_s4 + $0x3b4] sm:$0xf0]  ;;  %v6273_v50 = vld [vmem:[%s8336_s4 + $0x378] sm:$0xf0] }
 0x621   : > { %v6108_v62 = vor.u32 %v7189_v61, %v6105_v45  ;;  %v6304_v56 = vor.u32 %v7242_v2, %v6303_v9  ;;  %v7234_v23 = vld [vmem:[%s8336_s4 + $0x374] sm:$0xf0]  ;;  %v7158_v58 = vld [vmem:[%s8336_s4 + $0x11c] sm:$0xf] }
 0x622   : > { %3285 = vmatpush.bf16.msra.mxu0 %v5912_v32  ;;  %3304 = vmatpush.bf16.msra.mxu1 %v6168_v13  ;;  %v6049_v32 = vld [vmem:[%s8336_s4 + $0x1b8] sm:$0xf0]  ;;  %v7162_v52 = vld [vmem:[%s8336_s4 + $0x134] sm:$0xf0] }
 0x623   : > { %3323 = vmatpush.bf16.msra.mxu2 %v5916_v27  ;;  %3342 = vmatpush.bf16.msra.mxu3 %v6172_v34  ;;  %v7238_v13 = vld [vmem:[%s8336_s4 + $0x39c] sm:$0xf]  ;;  %v6052_v15 = vor.u32 %v7174_v53, %v6049_v32  ;;  %v6239_v57 = vld [vmem:[%s8336_s4 + $0x318] sm:$0xf] }
 0x624   : > { %v6308_v17 = vor.u32 %v7238_v13, %v6305_v42  ;;  %v6017_v27 = vld [vmem:[%s8336_s4 + $0x178] sm:$0xf0]  ;;  %v7226_v24 = vld [vmem:[%s8336_s4 + $0x334] sm:$0xf0] }
 0x625   : > { %v7230_v34 = vld [vmem:[%s8336_s4 + $0x35c] sm:$0xf]  ;;  %v6020_v22 = vor.u32 %v7166_v25, %v6017_v27  ;;  %v5951_v45 = vld [vmem:[%s8336_s4 + $0xd8] sm:$0xf] }
 0x626   : > { %3286 = vmatpush.bf16.msra.mxu0 %v5880_v44  ;;  %3305 = vmatpush.bf16.msra.mxu1 %v6136_v49  ;;  %v6272_v44 = vor.u32 %v7234_v23, %v6271_v18  ;;  %v5983_v49 = vld [vmem:[%s8336_s4 + $0x118] sm:$0xf]  ;;  %v6276_v7 = vor.u32 %v7230_v34, %v6273_v50  ;;  %v5985_v8 = vld [vmem:[%s8336_s4 + $0x138] sm:$0xf0] }
 0x627   : > { %3324 = vmatpush.bf16.msra.mxu2 %v5884_v19  ;;  %3343 = vmatpush.bf16.msra.mxu3 %v6140_v33  ;;  %v5984_v19 = vor.u32 %v7162_v52, %v5983_v49  ;;  %v6240_v33 = vor.u32 %v7226_v24, %v6239_v57  ;;  %v5988_v38 = vor.u32 %v7158_v58, %v5985_v8  ;;  %v7218_v1 = vld [vmem:[%s8336_s4 + $0x2f4] sm:$0xf0]  ;;  %v7150_v55 = vld [vmem:[%s8336_s4 + $0xdc] sm:$0xf] }
 0x628   : > { %v7214_v10 = vld [vmem:[%s8336_s4 + $0x2dc] sm:$0xf]  ;;  %v7146_v43 = vld [vmem:[%s8336_s4 + $0xb4] sm:$0xf0] }
 0x629   : > { %v6209_v46 = vld [vmem:[%s8336_s4 + $0x2f8] sm:$0xf0]  ;;  %v6175_v4 = vld [vmem:[%s8336_s4 + $0x298] sm:$0xf] }
 0x62a   : > { %3287 = vmatpush.bf16.msra.mxu0 %v5848_v12  ;;  %3306 = vmatpush.bf16.msra.mxu1 %v6104_v40  ;;  %v7222_v12 = vld [vmem:[%s8336_s4 + $0x31c] sm:$0xf]  ;;  %v6212_v30 = vor.u32 %v7214_v10, %v6209_v46  ;;  %v5887_v32 = vld [vmem:[%s8336_s4 + $0x58] sm:$0xf]  ;;  %v7280_v10 = vld [vmem:[%s8338_s0 + $0xe4] sm:$0xf0] }
 0x62b   : > { %3325 = vmatpush.bf16.msra.mxu2 %v5852_v63  ;;  %3344 = vmatpush.bf16.msra.mxu3 %v6108_v62  ;;  %v6241_v40 = vld [vmem:[%s8336_s4 + $0x338] sm:$0xf0]  ;;  %v7154_v63 = vld [vmem:[%s8336_s4 + $0xf4] sm:$0xf0] }
 0x62c   : > { %3212 = vmatmul.bf16.vlgmr.msrb.gmra.mxu0 %v9164_v20  ;;  %3231 = vmatmul.bf16.vlgmr.msrb.gmra.mxu1 %v9166_v21  ;;  %v6244_v61 = vor.u32 %v7222_v12, %v6241_v40  ;;  %v6207_v62 = vld [vmem:[%s8336_s4 + $0x2d8] sm:$0xf]  ;;  %v5952_v51 = vor.u32 %v7154_v63, %v5951_v45  ;;  %v7142_v2 = vld [vmem:[%s8336_s4 + $0x9c] sm:$0xf]  ;;  %v6399_v40 = vld [vmem:[%s8338_s0 + $0x70] sm:$0xf] }
 0x62d   : > { %3250 = vmatmul.bf16.vlgmr.msrb.gmra.mxu2 %v9164_v20  ;;  %3269 = vmatmul.bf16.vlgmr.msrb.gmra.mxu3 %v9166_v21  ;;  %v6208_v60 = vor.u32 %v7218_v1, %v6207_v62  ;;  %v6177_v53 = vld [vmem:[%s8336_s4 + $0x2b8] sm:$0xf0]  ;;  %v7138_v13 = vld [vmem:[%s8336_s4 + $0x74] sm:$0xf0]  ;;  %v6391_v45 = vld [vmem:[%s8338_s0 + $0x60] sm:$0xf] }
 0x62e   : > { %3356 = vmatpush.bf16.msrb.mxu0 %v6080_v36  ;;  %3375 = vmatpush.bf16.msrb.mxu1 %v6336_v29  ;;  %v5953_v36 = vld [vmem:[%s8336_s4 + $0xf8] sm:$0xf0]  ;;  %v5919_v29 = vld [vmem:[%s8336_s4 + $0x98] sm:$0xf]  ;;  %v5888_v23 = vor.u32 %v7138_v13, %v5887_v32  ;;  %v7264_v63 = vld [vmem:[%s8338_s0 + $0x64] sm:$0xf0] }
 0x62f   : > { %3394 = vmatpush.bf16.msrb.mxu2 %v6084_v5  ;;  %3413 = vmatpush.bf16.msrb.mxu3 %v6340_v31  ;;  %v5956_v5 = vor.u32 %v7150_v55, %v5953_v36  ;;  %v7210_v31 = vld [vmem:[%s8336_s4 + $0x2b4] sm:$0xf0]  ;;  %v5920_v41 = vor.u32 %v7146_v43, %v5919_v29  ;;  %v5889_v18 = vld [vmem:[%s8336_s4 + $0x78] sm:$0xf0]  ;;  %v6392_v62 = vor.u32 %v7264_v63, %v6391_v45  ;;  %v6375_v29 = vld [vmem:[%s8338_s0 + $0x40] sm:$0xf] }
 0x630   : > { %v6176_v9 = vor.u32 %v7210_v31, %v6175_v4  ;;  %v7202_v42 = vld [vmem:[%s8336_s4 + $0x274] sm:$0xf0]  ;;  %v7198_v27 = vld [vmem:[%s8336_s4 + $0x25c] sm:$0xf]  ;;  %v6447_v43 = vld [vmem:[%s8338_s0 + $0xd0] sm:$0xf] }
 0x631   : > { %v6145_v34 = vld [vmem:[%s8336_s4 + $0x278] sm:$0xf0]  ;;  %v5855_v50 = vld [vmem:[%s8336_s4 + $0x18] sm:$0xf]  ;;  %v6359_v32 = vld [vmem:[%s8338_s0 + $0x20] sm:$0xf] }
 0x632   : > { %3357 = vmatpush.bf16.msrb.mxu0 %v6048_v28  ;;  %3376 = vmatpush.bf16.msrb.mxu1 %v6304_v56  ;;  %v5921_v28 = vld [vmem:[%s8336_s4 + $0xb8] sm:$0xf0]  ;;  %v7194_v49 = vld [vmem:[%s8336_s4 + $0x234] sm:$0xf0]  ;;  %v7256_v13 = vld [vmem:[%s8338_s0 + $0x24] sm:$0xf0] }
 0x633   : > { %3395 = vmatpush.bf16.msrb.mxu2 %v6052_v15  ;;  %3414 = vmatpush.bf16.msrb.mxu3 %v6308_v17  ;;  %v7206_v56 = vld [vmem:[%s8336_s4 + $0x29c] sm:$0xf]  ;;  %v6143_v15 = vld [vmem:[%s8336_s4 + $0x258] sm:$0xf]  ;;  %v5924_v59 = vor.u32 %v7142_v2, %v5921_v28  ;;  %v6439_v28 = vld [vmem:[%s8338_s0 + $0xc0] sm:$0xf] }
 0x634   : > { %v6180_v48 = vor.u32 %v7206_v56, %v6177_v53  ;;  %v7134_v17 = vld [vmem:[%s8336_s4 + $0x5c] sm:$0xf]  ;;  %v6144_v25 = vor.u32 %v7202_v42, %v6143_v15  ;;  %v7282_v1 = vld [vmem:[%s8338_s0 + $0xf4] sm:$0xf0]  ;;  %v7276_v56 = vld [vmem:[%s8338_s0 + $0xc4] sm:$0xf0] }
 0x635   : > { %v7126_v52 = vld [vmem:[%s8336_s4 + $0x1c] sm:$0xf]  ;;  %v7262_v36 = vld [vmem:[%s8338_s0 + $0x54] sm:$0xf0]  ;;  %v6440_v53 = vor.u32 %v7276_v56, %v6439_v28  ;;  %v6431_v15 = vld [vmem:[%s8338_s0 + $0xb0] sm:$0xf] }
 0x636   : > { %3358 = vmatpush.bf16.msrb.mxu0 %v6016_v11  ;;  %3377 = vmatpush.bf16.msrb.mxu1 %v6272_v44  ;;  %v7130_v11 = vld [vmem:[%s8336_s4 + $0x34] sm:$0xf0]  ;;  %v5857_v58 = vld [vmem:[%s8336_s4 + $0x38] sm:$0xf0]  ;;  %v7726_v42 = vld [vmem:[%s8340_s16] sm:$0xff] }
 0x637   : > { %3396 = vmatpush.bf16.msrb.mxu2 %v6020_v22  ;;  %3415 = vmatpush.bf16.msrb.mxu3 %v6276_v7  ;;  %v6111_v44 = vld [vmem:[%s8336_s4 + $0x218] sm:$0xf]  ;;  %v5892_v22 = vor.u32 %v7134_v17, %v5889_v18  ;;  %v6148_v7 = vor.u32 %v7198_v27, %v6145_v34  ;;  %v5856_v57 = vor.u32 %v7130_v11, %v5855_v50  ;;  %v6351_v17 = vld [vmem:[%s8338_s0 + $0x10] sm:$0xf]  ;;  %v6423_v34 = vld [vmem:[%s8338_s0 + $0xa0] sm:$0xf] }
 0x638   : > { %v6112_v24 = vor.u32 %v7194_v49, %v6111_v44  ;;  %v5860_v8 = vor.u32 %v7126_v52, %v5857_v58  ;;  %v7278_v4 = vld [vmem:[%s8338_s0 + $0xd4] sm:$0xf0]  ;;  %v7272_v50 = vld [vmem:[%s8338_s0 + $0xa4] sm:$0xf0]  ;;  %v6343_v49 = vld [vmem:[%s8338_s0] sm:$0xf] }
 0x639   : > { %v6448_v31 = vor.u32 %v7278_v4, %v6447_v43  ;;  %v7254_v18 = vld [vmem:[%s8338_s0 + $0x14] sm:$0xf0]  ;;  %v6424_v44 = vor.u32 %v7272_v50, %v6423_v34  ;;  %v6415_v58 = vld [vmem:[%s8338_s0 + $0x90] sm:$0xf]  ;;  %v7292_v34 = vld [vmem:[%s8338_s0 + $0x144] sm:$0xf0] }
 0x63a   : > { %3359 = vmatpush.bf16.msrb.mxu0 %v5984_v19  ;;  %3378 = vmatpush.bf16.msrb.mxu1 %v6240_v33  ;;  %v7190_v19 = vld [vmem:[%s8336_s4 + $0x21c] sm:$0xf]  ;;  %v6591_v43 = vld [vmem:[%s8338_s0 + $0x1f0] sm:$0xf]  ;;  %v7314_v4 = vld [vmem:[%s8338_s0 + $0x1f4] sm:$0xf0] }
 0x63b   : > { %3397 = vmatpush.bf16.msrb.mxu2 %v5988_v38  ;;  %3416 = vmatpush.bf16.msrb.mxu3 %v6244_v61  ;;  %v6113_v33 = vld [vmem:[%s8336_s4 + $0x238] sm:$0xf0]  ;;  %v7266_v38 = vld [vmem:[%s8338_s0 + $0x74] sm:$0xf0] }
 0x63c   : > { %3217 = vmatmul.bf16.gmra.mxu0 %v9233_v3  ;;  %3236 = vmatmul.bf16.gmra.mxu1 %v9235_v54  ;;  %v6116_v12 = vor.u32 %v7190_v19, %v6113_v33  ;;  %v6400_v61 = vor.u32 %v7266_v38, %v6399_v40  ;;  %v7270_v19 = vld [vmem:[%s8338_s0 + $0x94] sm:$0xf0] }
 0x63d   : > { %3255 = vmatmul.bf16.gmra.mxu2 %v9233_v3  ;;  %3274 = vmatmul.bf16.gmra.mxu3 %v9235_v54  ;;  %v7298_v40 = vld [vmem:[%s8338_s0 + $0x174] sm:$0xf0] }
 0x63e   : > { %3360 = vmatpush.bf16.msrb.mxu0 %v5952_v51  ;;  %3379 = vmatpush.bf16.msrb.mxu1 %v6208_v60  ;;  %v6463_v51 = vld [vmem:[%s8338_s0 + $0xf0] sm:$0xf]  ;;  %v6455_v60 = vld [vmem:[%s8338_s0 + $0xe0] sm:$0xf]  ;;  %v7294_v28 = vld [vmem:[%s8338_s0 + $0x154] sm:$0xf0] }
 0x63f   : > { %3398 = vmatpush.bf16.msrb.mxu2 %v5956_v5  ;;  %3417 = vmatpush.bf16.msrb.mxu3 %v6212_v30  ;;  %v6464_v55 = vor.u32 %v7282_v1, %v6463_v51  ;;  %v6456_v46 = vor.u32 %v7280_v10, %v6455_v60  ;;  %v7260_v5 = vld [vmem:[%s8338_s0 + $0x44] sm:$0xf0]  ;;  %v6519_v10 = vld [vmem:[%s8338_s0 + $0x160] sm:$0xf] }
 0x640   : > { %v6376_v30 = vor.u32 %v7260_v5, %v6375_v29 }
 0x642   : > { %3361 = vmatpush.bf16.msrb.mxu0 %v5920_v41  ;;  %3380 = vmatpush.bf16.msrb.mxu1 %v6176_v9  ;;  %v6367_v41 = vld [vmem:[%s8338_s0 + $0x30] sm:$0xf]  ;;  %v7258_v9 = vld [vmem:[%s8338_s0 + $0x34] sm:$0xf0] }
 0x643   : > { %3399 = vmatpush.bf16.msrb.mxu2 %v5924_v59  ;;  %3418 = vmatpush.bf16.msrb.mxu3 %v6180_v48  ;;  %v6368_v2 = vor.u32 %v7258_v9, %v6367_v41  ;;  %v9384_v59 = vperm.slane %v7726_v42, 6  ;;  %v6592_v41 = vor.u32 %v7314_v4, %v6591_v43  ;;  %v7312_v42 = vld [vmem:[%s8338_s0 + $0x1e4] sm:$0xf0] }
 0x646   : > { %3362 = vmatpush.bf16.msrb.mxu0 %v5888_v23  ;;  %3381 = vmatpush.bf16.msrb.mxu1 %v6144_v25  ;;  %v6352_v23 = vor.u32 %v7254_v18, %v6351_v17 }
 0x647   : > { %3400 = vmatpush.bf16.msrb.mxu2 %v5892_v22  ;;  %3419 = vmatpush.bf16.msrb.mxu3 %v6148_v7  ;;  %v7252_v22 = vld [vmem:[%s8338_s0 + $0x4] sm:$0xf0] }
 0x648   : > { %v6344_v52 = vor.u32 %v7252_v22, %v6343_v49  ;;  %v6575_v22 = vld [vmem:[%s8338_s0 + $0x1d0] sm:$0xf] }
 0x64a   : > { %3363 = vmatpush.bf16.msrb.mxu0 %v5856_v57  ;;  %3382 = vmatpush.bf16.msrb.mxu1 %v6112_v24  ;;  %v7727_v57 = vld [vmem:[%s8340_s16 + $0x8] sm:$0xff] }
 0x64b   : > { %3401 = vmatpush.bf16.msrb.mxu2 %v5860_v8  ;;  %3420 = vmatpush.bf16.msrb.mxu3 %v6116_v12  ;;  %v9396_v24 = vperm.slane %v7727_v57, 6  ;;  %v6416_v8 = vor.u32 %v7270_v19, %v6415_v58  ;;  %v6527_v12 = vld [vmem:[%s8338_s0 + $0x170] sm:$0xf] }
 0x64c   : > { %3288 = vmatmul.bf16.vlgmr.msra.gmra.mxu0 %v9164_v20  ;;  %3307 = vmatmul.bf16.vlgmr.msra.gmra.mxu1 %v9166_v21  ;;  %v6528_v63 = vor.u32 %v7298_v40, %v6527_v12  ;;  %v7290_v12 = vld [vmem:[%s8338_s0 + $0x134] sm:$0xf0] }
 0x64d   : > { %3326 = vmatmul.bf16.vlgmr.msra.gmra.mxu2 %v9164_v20  ;;  %3345 = vmatmul.bf16.vlgmr.msra.gmra.mxu3 %v9166_v21 }
 0x64e   : > { %4408 = vmatpush.bf16.msra.mxu0 %v6400_v61  ;;  %4427 = vmatpush.bf16.msra.mxu1 %v6464_v55  ;;  %v6407_v55 = vld [vmem:[%s8338_s0 + $0x80] sm:$0xf] }
 0x64f   : > { %4446 = vmatpush.bf16.msra.mxu2 %v6528_v63  ;;  %4465 = vmatpush.bf16.msra.mxu3 %v6592_v41  ;;  %v6559_v41 = vld [vmem:[%s8338_s0 + $0x1b0] sm:$0xf] }
 0x652   : > { %4409 = vmatpush.bf16.msra.mxu0 %v6392_v62  ;;  %4428 = vmatpush.bf16.msra.mxu1 %v6456_v46  ;;  %v7296_v46 = vld [vmem:[%s8338_s0 + $0x164] sm:$0xf0] }
 0x653   : > { %v6520_v5 = vor.u32 %v7296_v46, %v6519_v10  ;;  %v6487_v46 = vld [vmem:[%s8338_s0 + $0x120] sm:$0xf] }
 0x655   : > { %4447 = vmatpush.bf16.msra.mxu2 %v6520_v5  ;;  %v7288_v5 = vld [vmem:[%s8338_s0 + $0x124] sm:$0xf0] }
 0x656   : > { %4429 = vmatpush.bf16.msra.mxu1 %v6448_v31  ;;  %v6488_v4 = vor.u32 %v7288_v5, %v6487_v46 }
 0x65a   : > { %4430 = vmatpush.bf16.msra.mxu1 %v6440_v53 }
 0x65c   : > { %3293 = vmatmul.bf16.gmra.mxu0 %v9233_v3  ;;  %3312 = vmatmul.bf16.gmra.mxu1 %v9235_v54 }
 0x65d   : > { %3331 = vmatmul.bf16.gmra.mxu2 %v9233_v3  ;;  %3350 = vmatmul.bf16.gmra.mxu3 %v9235_v54 }
 0x66c   : > { %3364 = vmatmul.bf16.vlgmr.msrb.gmra.mxu0 %v9164_v20  ;;  %3383 = vmatmul.bf16.vlgmr.msrb.gmra.mxu1 %v9166_v21 }
 0x66d   : > { %3402 = vmatmul.bf16.vlgmr.msrb.gmra.mxu2 %v9164_v20  ;;  %3421 = vmatmul.bf16.vlgmr.msrb.gmra.mxu3 %v9166_v21  ;;  %v6383_v20 = vld [vmem:[%s8338_s0 + $0x50] sm:$0xf] }
 0x66e   : > { %v6384_v21 = vor.u32 %v7262_v36, %v6383_v20  ;;  %v7268_v20 = vld [vmem:[%s8338_s0 + $0x84] sm:$0xf0] }
 0x670   : > { %4410 = vmatpush.bf16.msra.mxu0 %v6384_v21  ;;  %v6408_v21 = vor.u32 %v7268_v20, %v6407_v55 }
 0x674   : > { %4411 = vmatpush.bf16.msra.mxu0 %v6376_v30 }
 0x678   : > { %4412 = vmatpush.bf16.msra.mxu0 %v6368_v2  ;;  %v6511_v2 = vld [vmem:[%s8338_s0 + $0x150] sm:$0xf] }
 0x67c   : > { %3369 = vmatmul.bf16.gmra.mxu0 %v9233_v3  ;;  %3388 = vmatmul.bf16.gmra.mxu1 %v9235_v54 }
 0x67d   : > { %3407 = vmatmul.bf16.gmra.mxu2 %v9233_v3  ;;  %3426 = vmatmul.bf16.gmra.mxu3 %v9235_v54  ;;  %v6360_v3 = vor.u32 %v7256_v13, %v6359_v32  ;;  %v7274_v54 = vld [vmem:[%s8338_s0 + $0xb4] sm:$0xf0]  ;;  %v6512_v13 = vor.u32 %v7294_v28, %v6511_v2 }
 0x67e   : > { %v6432_v48 = vor.u32 %v7274_v54, %v6431_v15  ;;  %v6583_v54 = vld [vmem:[%s8338_s0 + $0x1e0] sm:$0xf] }
 0x67f   : > { %4413 = vmatpush.bf16.msra.mxu0 %v6360_v3  ;;  %4448 = vmatpush.bf16.msra.mxu2 %v6512_v13  ;;  %v6584_v18 = vor.u32 %v7312_v42, %v6583_v54 }
 0x680   : > { %4431 = vmatpush.bf16.msra.mxu1 %v6432_v48 }
 0x681   : > { %4466 = vmatpush.bf16.msra.mxu3 %v6584_v18 }
 0x683   : > { %4414 = vmatpush.bf16.msra.mxu0 %v6352_v23 }
 0x684   : > { %4432 = vmatpush.bf16.msra.mxu1 %v6424_v44 }
 0x687   : > { %4415 = vmatpush.bf16.msra.mxu0 %v6344_v52  ;;  %v7310_v52 = vld [vmem:[%s8338_s0 + $0x1d4] sm:$0xf0] }
 0x688   : > { %v3137_v25 = vpop.f32.mrf.mxu0  ;;  %v3156_v27 = vpop.f32.mrf.mxu1  ;;  %4433 = vmatpush.bf16.msra.mxu1 %v6416_v8  ;;  %v6576_v57 = vor.u32 %v7310_v52, %v6575_v22 }
 0x689   : > { %v3138_v11 = vadd.f32 %v3137_v25, %v9384_v59 }
 0x68a   : > { %4467 = vmatpush.bf16.msra.mxu3 %v6576_v57 }
 0x68b   : > { %v9393_v7 = vadd.f32 %v3156_v27, %v3138_v11  ;;  %v6503_v27 = vld [vmem:[%s8338_s0 + $0x140] sm:$0xf] }
 0x68c   : > { %4434 = vmatpush.bf16.msra.mxu1 %v6408_v21  ;;  %v6504_v11 = vor.u32 %v7292_v34, %v6503_v27 }
 0x68d   : > { %v3432_v33 = vmul.f32 -1.702, %v9393_v7 }
 0x68e   : > { %4449 = vmatpush.bf16.msra.mxu2 %v6504_v11  ;;  %v7304_v11 = vld [vmem:[%s8338_s0 + $0x1a4] sm:$0xf0] }
 0x68f   : > { %v3464_v38 = vmul.f32 1.442695, %v3432_v33  ;;  %v3175_v61 = vpop.f32.mrf.mxu2  ;;  %v3194_v45 = vpop.f32.mrf.mxu3  ;;  %v6495_v33 = vld [vmem:[%s8338_s0 + $0x130] sm:$0xf] }
 0x690   : > { %v3176_v62 = vadd.f32 %v3175_v61, %v9396_v24  ;;  %v3139_v51 = vpop.f32.mrf.mxu0  ;;  %v3158_v1 = vpop.f32.mrf.mxu1 }
 0x691   : > { %v3140_v36 = vadd.f32 %v3139_v51, %v9384_v59  ;;  %7588 = vpow2.f32 %v3464_v38  ;;  %v6567_v51 = vld [vmem:[%s8338_s0 + $0x1c0] sm:$0xf] }
 0x692   : > { %v9407_v60 = vadd.f32 %v3194_v45, %v3176_v62  ;;  %v6496_v62 = vor.u32 %v7290_v12, %v6495_v33  ;;  %v6471_v33 = vld [vmem:[%s8338_s0 + $0x100] sm:$0xf] }
 0x693   : > { %v9411_v29 = vadd.f32 %v3158_v1, %v3140_v36  ;;  %v7308_v36 = vld [vmem:[%s8338_s0 + $0x1c4] sm:$0xf0] }
 0x694   : > { %v3433_v30 = vmul.f32 -1.702, %v9407_v60  ;;  %4450 = vmatpush.bf16.msra.mxu2 %v6496_v62  ;;  %v6568_v10 = vor.u32 %v7308_v36, %v6567_v51  ;;  %v7729_v51 = vld [vmem:[%s8340_s16 + $0x18] sm:$0xff]  ;;  %v6655_v36 = vld [vmem:[%s8338_s0 + $0x270] sm:$0xf] }
 0x695   : > { %v3440_v31 = vmul.f32 -1.702, %v9411_v29 }
 0x696   : > { %v3466_v9 = vmul.f32 1.442695, %v3433_v30  ;;  %4468 = vmatpush.bf16.msra.mxu3 %v6568_v10 }
 0x697   : > { %v3480_v56 = vmul.f32 1.442695, %v3440_v31  ;;  %v3177_v53 = vpop.f32.mrf.mxu2  ;;  %v3196_v32 = vpop.f32.mrf.mxu3 }
 0x698   : > { %v7589_v3 = vpop.eup %7588  ;;  %v3178_v15 = vadd.f32 %v3177_v53, %v9396_v24  ;;  %4451 = vmatpush.bf16.msra.mxu2 %v6488_v4 }
 0x699   : > { %7590 = vpow2.f32 %v3480_v56  ;;  %v3142_v48 = vpop.f32.mrf.mxu0  ;;  %v3161_v17 = vpop.f32.mrf.mxu1  ;;  %v3528_v50 = vadd.f32 1.0, %v7589_v3  ;;  %v6479_v3 = vld [vmem:[%s8338_s0 + $0x110] sm:$0xf] }
 0x69a   : > { %7592 = vpow2.f32 %v3466_v9  ;;  %v9422_v23 = vadd.f32 %v3196_v32, %v3178_v15  ;;  %v3143_v25 = vadd.f32 %v3142_v48, %v9384_v59  ;;  %v7306_v9 = vld [vmem:[%s8338_s0 + $0x1b4] sm:$0xf0] }
 0x69b   : > { %7594 = vrcp.f32 %v3528_v50  ;;  %v6560_v53 = vor.u32 %v7306_v9, %v6559_v41  ;;  %v7286_v15 = vld [vmem:[%s8338_s0 + $0x114] sm:$0xf0]  ;;  %v6551_v50 = vld [vmem:[%s8338_s0 + $0x1a0] sm:$0xf] }
 0x69c   : > { %v3441_v44 = vmul.f32 -1.702, %v9422_v23  ;;  %v9428_v49 = vadd.f32 %v3161_v17, %v3143_v25  ;;  %v6480_v48 = vor.u32 %v7286_v15, %v6479_v3  ;;  %v7300_v15 = vld [vmem:[%s8338_s0 + $0x184] sm:$0xf0] }
 0x69d   : > { %4469 = vmatpush.bf16.msra.mxu3 %v6560_v53 }
 0x69e   : > { %v3482_v58 = vmul.f32 1.442695, %v3441_v44  ;;  %v3448_v19 = vmul.f32 -1.702, %v9428_v49  ;;  %4452 = vmatpush.bf16.msra.mxu2 %v6480_v48  ;;  %v7328_v48 = vld [vmem:[%s8338_s0 + $0x264] sm:$0xf0] }
 0x69f   : > { %v7591_v8 = vpop.eup %7590 }
 0x6a0   : > { %v7593_v40 = vpop.eup %7592  ;;  %v3536_v38 = vadd.f32 1.0, %v7591_v8  ;;  %7596 = vpow2.f32 %v3482_v58  ;;  %v3496_v61 = vmul.f32 1.442695, %v3448_v19  ;;  %v3180_v45 = vpop.f32.mrf.mxu2  ;;  %v6552_v58 = vor.u32 %v7304_v11, %v6551_v50  ;;  %v7284_v8 = vld [vmem:[%s8338_s0 + $0x104] sm:$0xf0] }
 0x6a1   : > { %v3199_v63 = vpop.f32.mrf.mxu3  ;;  %v3181_v1 = vadd.f32 %v3180_v45, %v9396_v24  ;;  %v3144_v55 = vpop.f32.mrf.mxu0  ;;  %v3529_v30 = vadd.f32 1.0, %v7593_v40  ;;  %v6719_v50 = vld [vmem:[%s8338_s0 + $0x2f0] sm:$0xf]  ;;  %v7346_v11 = vld [vmem:[%s8338_s0 + $0x2f4] sm:$0xf0] }
 0x6a2   : > { %v3163_v20 = vpop.f32.mrf.mxu1  ;;  %7598 = vrcp.f32 %v3536_v38  ;;  %v3145_v21 = vadd.f32 %v3144_v55, %v9384_v59  ;;  %v7595_v2 = vpop.eup %7594  ;;  %v7728_v59 = vld [vmem:[%s8340_s16 + $0x10] sm:$0xff]  ;;  %4470 = vmatpush.bf16.msra.mxu3 %v6552_v58  ;;  %v7326_v58 = vld [vmem:[%s8338_s0 + $0x254] sm:$0xf0] }
 0x6a3   : > { %v9441_v43 = vadd.f32 %v3199_v63, %v3181_v1  ;;  %7600 = vpow2.f32 %v3496_v61  ;;  %v9449_v56 = vperm.slane %v7728_v59, 6  ;;  %v3592_v18 = vmul.f32 %v7595_v2, %v9393_v7  ;;  %v6543_v38 = vld [vmem:[%s8338_s0 + $0x190] sm:$0xf]  ;;  %v7302_v61 = vld [vmem:[%s8338_s0 + $0x194] sm:$0xf0] }
 0x6a4   : > { %v9443_v31 = vadd.f32 %v3163_v20, %v3145_v21  ;;  %7602 = vrcp.f32 %v3529_v30  ;;  %v9473_v1 = vperm.slane %v7729_v51, 6  ;;  %v6544_v55 = vor.u32 %v7302_v61, %v6543_v38  ;;  %v7330_v21 = vld [vmem:[%s8338_s0 + $0x274] sm:$0xf0]  ;;  %v6535_v59 = vld [vmem:[%s8338_s0 + $0x180] sm:$0xf] }
 0x6a5   : > { %v3449_v28 = vmul.f32 -1.702, %v9441_v43  ;;  %v6656_v5 = vor.u32 %v7330_v21, %v6655_v36  ;;  %v7344_v36 = vld [vmem:[%s8338_s0 + $0x2e4] sm:$0xf0] }
 0x6a6   : > { %v7597_v32 = vpop.eup %7596  ;;  %v3456_v13 = vmul.f32 -1.702, %v9443_v31  ;;  %4471 = vmatpush.bf16.msra.mxu3 %v6544_v55 }
 0x6a7   : > { %v3537_v54 = vadd.f32 1.0, %v7597_v32  ;;  %v3498_v42 = vmul.f32 1.442695, %v3449_v28  ;;  %4484 = vmatpush.bf16.msrb.mxu0 %v6656_v5  ;;  %v6631_v5 = vld [vmem:[%s8338_s0 + $0x240] sm:$0xf] }
 0x6a8   : > { %v7599_v17 = vpop.eup %7598  ;;  %v3512_v25 = vmul.f32 1.442695, %v3456_v13  ;;  %v3182_v27 = vpop.f32.mrf.mxu2 }
 0x6a9   : > { %v3201_v34 = vpop.f32.mrf.mxu3  ;;  %v3600_v44 = vmul.f32 %v7599_v17, %v9411_v29  ;;  %7604 = vrcp.f32 %v3537_v54  ;;  %v3183_v22 = vadd.f32 %v3182_v27, %v9396_v24  ;;  %v3213_v52 = vpop.f32.mrf.mxu0  ;;  %v6472_v24 = vor.u32 %v7284_v8, %v6471_v33 }
 0x6aa   : > { %v3232_v57 = vpop.f32.mrf.mxu1  ;;  %v7601_v19 = vpop.eup %7600  ;;  %7606 = vpow2.f32 %v3498_v42  ;;  %v3214_v7 = vadd.f32 %v3213_v52, %v9449_v56  ;;  %v6647_v42 = vld [vmem:[%s8338_s0 + $0x260] sm:$0xf] }
 0x6ab   : > { %v9462_v12 = vpack.c.bf16 %v3600_v44, %v3592_v18  ;;  %7608 = vpow2.f32 %v3512_v25  ;;  %v9464_v29 = vadd.f32 %v3201_v34, %v3183_v22  ;;  %v7603_v45 = vpop.eup %7602  ;;  %v3544_v63 = vadd.f32 1.0, %v7601_v19  ;;  %4453 = vmatpush.bf16.msra.mxu2 %v6472_v24 }
 0x6ac   : > { %v9466_v40 = vadd.f32 %v3232_v57, %v3214_v7  ;;  %v3593_v4 = vmul.f32 %v7603_v45, %v9407_v60  ;;  %v6536_v18 = vor.u32 %v7300_v15, %v6535_v59  ;;  %v6648_v34 = vor.u32 %v7328_v48, %v6647_v42  ;;  %v6639_v57 = vld [vmem:[%s8338_s0 + $0x250] sm:$0xf] }
 0x6ad   : > { %v3457_v62 = vmul.f32 -1.702, %v9464_v29  ;;  %4416 = vmatmul.bf16.vlgmr.msra.gmra.mxu0 %v9462_v12  ;;  %v6720_v22 = vor.u32 %v7346_v11, %v6719_v50  ;;  %v6640_v33 = vor.u32 %v7326_v58, %v6639_v57  ;;  %v6703_v59 = vld [vmem:[%s8338_s0 + $0x2d0] sm:$0xf] }
 0x6ae   : > { %v3434_v20 = vmul.f32 -1.702, %v9466_v40  ;;  %4472 = vmatpush.bf16.msra.mxu3 %v6536_v18  ;;  %4485 = vmatpush.bf16.msrb.mxu0 %v6648_v34 }
 0x6af   : > { %v7605_v10 = vpop.eup %7604  ;;  %v3514_v46 = vmul.f32 1.442695, %v3457_v62  ;;  %4503 = vmatpush.bf16.msrb.mxu1 %v6720_v22 }
 0x6b0   : > { %v7607_v30 = vpop.eup %7606  ;;  %v3601_v41 = vmul.f32 %v7605_v10, %v9422_v23  ;;  %v3468_v9 = vmul.f32 1.442695, %v3434_v20  ;;  %v3251_v2 = vpop.f32.mrf.mxu2 }
 0x6b1   : > { %v3270_v28 = vpop.f32.mrf.mxu3  ;;  %v7609_v53 = vpop.eup %7608  ;;  %7610 = vpow2.f32 %v3514_v46  ;;  %v3252_v32 = vadd.f32 %v3251_v2, %v9473_v1  ;;  %v3545_v25 = vadd.f32 1.0, %v7607_v30  ;;  %v7324_v30 = vld [vmem:[%s8338_s0 + $0x244] sm:$0xf0] }
 0x6b2   : > { %v3215_v13 = vpop.f32.mrf.mxu0  ;;  %v3234_v3 = vpop.f32.mrf.mxu1  ;;  %v9483_v60 = vpack.c.bf16 %v3601_v41, %v3593_v4  ;;  %7612 = vrcp.f32 %v3544_v63  ;;  %v3552_v23 = vadd.f32 1.0, %v7609_v53  ;;  %v6711_v63 = vld [vmem:[%s8338_s0 + $0x2e0] sm:$0xf]  ;;  %4486 = vmatpush.bf16.msrb.mxu0 %v6640_v33  ;;  %v6632_v2 = vor.u32 %v7324_v30, %v6631_v5  ;;  %v7342_v53 = vld [vmem:[%s8338_s0 + $0x2d4] sm:$0xf0] }
 0x6b3   : > { %v3216_v54 = vadd.f32 %v3215_v13, %v9449_v56  ;;  %7614 = vpow2.f32 %v3468_v9  ;;  %v9488_v17 = vadd.f32 %v3270_v28, %v3252_v32  ;;  %v6712_v46 = vor.u32 %v7344_v36, %v6711_v63  ;;  %v7730_v36 = vld [vmem:[%s8340_s16 + $0x20] sm:$0xff]  ;;  %v6607_v5 = vld [vmem:[%s8338_s0 + $0x210] sm:$0xf]  ;;  %v7318_v30 = vld [vmem:[%s8338_s0 + $0x214] sm:$0xf0] }
 0x6b4   : > { %7616 = vrcp.f32 %v3552_v23  ;;  %4435 = vmatmul.bf16.vlgmr.msra.gmra.mxu1 %v9483_v60  ;;  %v6623_v23 = vld [vmem:[%s8338_s0 + $0x230] sm:$0xf] }
 0x6b5   : > { %v9490_v27 = vadd.f32 %v3234_v3, %v3216_v54  ;;  %v3435_v44 = vmul.f32 -1.702, %v9488_v17  ;;  %7618 = vrcp.f32 %v3545_v25  ;;  %4504 = vmatpush.bf16.msrb.mxu1 %v6712_v46  ;;  %v7322_v54 = vld [vmem:[%s8338_s0 + $0x234] sm:$0xf0] }
 0x6b6   : > { %4487 = vmatpush.bf16.msrb.mxu0 %v6632_v2  ;;  %v6624_v18 = vor.u32 %v7322_v54, %v6623_v23  ;;  %v6608_v2 = vor.u32 %v7318_v30, %v6607_v5 }
 0x6b7   : > { %v3442_v52 = vmul.f32 -1.702, %v9490_v27  ;;  %v7611_v19 = vpop.eup %7610  ;;  %v3470_v7 = vmul.f32 1.442695, %v3435_v44  ;;  %v6695_v44 = vld [vmem:[%s8338_s0 + $0x2c0] sm:$0xf] }
 0x6b8   : > { %v7613_v8 = vpop.eup %7612  ;;  %v3553_v24 = vadd.f32 1.0, %v7611_v19  ;;  %v3253_v61 = vpop.f32.mrf.mxu2 }
 0x6b9   : > { %v3484_v38 = vmul.f32 1.442695, %v3442_v52  ;;  %v3272_v45 = vpop.f32.mrf.mxu3  ;;  %v7615_v62 = vpop.eup %7614  ;;  %7620 = vpow2.f32 %v3470_v7  ;;  %v3254_v51 = vadd.f32 %v3253_v61, %v9473_v1  ;;  %v3608_v4 = vmul.f32 %v7613_v8, %v9428_v49  ;;  %v7340_v7 = vld [vmem:[%s8338_s0 + $0x2c4] sm:$0xf0]  ;;  %v6615_v61 = vld [vmem:[%s8338_s0 + $0x220] sm:$0xf] }
 0x6ba   : > { %v3218_v55 = vpop.f32.mrf.mxu0  ;;  %v3237_v20 = vpop.f32.mrf.mxu1  ;;  %7622 = vrcp.f32 %v3553_v24  ;;  %v3530_v32 = vadd.f32 1.0, %v7615_v62  ;;  %v6704_v49 = vor.u32 %v7342_v53, %v6703_v59  ;;  %4488 = vmatpush.bf16.msrb.mxu0 %v6624_v18 }
 0x6bb   : > { %v7617_v21 = vpop.eup %7616  ;;  %v3219_v10 = vadd.f32 %v3218_v55, %v9449_v56  ;;  %v9507_v9 = vadd.f32 %v3272_v45, %v3254_v51  ;;  %7624 = vpow2.f32 %v3484_v38  ;;  %v6696_v38 = vor.u32 %v7340_v7, %v6695_v44  ;;  %v6687_v55 = vld [vmem:[%s8338_s0 + $0x2b0] sm:$0xf]  ;;  %v7334_v7 = vld [vmem:[%s8338_s0 + $0x294] sm:$0xf0] }
 0x6bc   : > { %v3616_v41 = vmul.f32 %v7617_v21, %v9443_v31  ;;  %v7619_v15 = vpop.eup %7618  ;;  %4505 = vmatpush.bf16.msrb.mxu1 %v6704_v49  ;;  %v9539_v21 = vperm.slane %v7730_v36, 6 }
 0x6bd   : > { %v9509_v28 = vadd.f32 %v3237_v20, %v3219_v10  ;;  %v3443_v13 = vmul.f32 -1.702, %v9507_v9  ;;  %v3609_v22 = vmul.f32 %v7619_v15, %v9441_v43  ;;  %v7320_v43 = vld [vmem:[%s8338_s0 + $0x224] sm:$0xf0]  ;;  %v7338_v20 = vld [vmem:[%s8338_s0 + $0x2b4] sm:$0xf0] }
 0x6be   : > { %v9514_v3 = vpack.c.bf16 %v3616_v41, %v3608_v4  ;;  %v6616_v51 = vor.u32 %v7320_v43, %v6615_v61  ;;  %v6688_v10 = vor.u32 %v7338_v20, %v6687_v55  ;;  %v6679_v15 = vld [vmem:[%s8338_s0 + $0x2a0] sm:$0xf] }
 0x6bf   : > { %v3450_v31 = vmul.f32 -1.702, %v9509_v28  ;;  %v7621_v42 = vpop.eup %7620  ;;  %v3486_v48 = vmul.f32 1.442695, %v3443_v13 }
 0x6c0   : > { %4421 = vmatmul.bf16.gmra.mxu0 %v9514_v3  ;;  %v7623_v25 = vpop.eup %7622  ;;  %v3256_v50 = vpop.f32.mrf.mxu2  ;;  %v3531_v8 = vadd.f32 1.0, %v7621_v42  ;;  %4506 = vmatpush.bf16.msrb.mxu1 %v6696_v38 }
 0x6c1   : > { %v3500_v34 = vmul.f32 1.442695, %v3450_v31  ;;  %v3275_v11 = vpop.f32.mrf.mxu3  ;;  %v3617_v52 = vmul.f32 %v7623_v25, %v9464_v29  ;;  %7626 = vpow2.f32 %v3486_v48  ;;  %v3257_v57 = vadd.f32 %v3256_v50, %v9473_v1  ;;  %v7625_v33 = vpop.eup %7624  ;;  %4489 = vmatpush.bf16.msrb.mxu0 %v6616_v51  ;;  %v7336_v48 = vld [vmem:[%s8338_s0 + $0x2a4] sm:$0xf0]  ;;  %v6599_v25 = vld [vmem:[%s8338_s0 + $0x200] sm:$0xf] }
 0x6c2   : > { %v3220_v58 = vpop.f32.mrf.mxu0  ;;  %v3239_v19 = vpop.f32.mrf.mxu1  ;;  %7628 = vrcp.f32 %v3530_v32  ;;  %v3538_v45 = vadd.f32 1.0, %v7625_v33  ;;  %v6680_v44 = vor.u32 %v7336_v48, %v6679_v15 }
 0x6c3   : > { %v3221_v24 = vadd.f32 %v3220_v58, %v9449_v56  ;;  %7630 = vpow2.f32 %v3500_v34  ;;  %v9528_v29 = vadd.f32 %v3275_v11, %v3257_v57  ;;  %v9530_v63 = vpack.c.bf16 %v3617_v52, %v3609_v22  ;;  %v7316_v34 = vld [vmem:[%s8338_s0 + $0x204] sm:$0xf0] }
 0x6c4   : > { %7632 = vrcp.f32 %v3538_v45  ;;  %4507 = vmatpush.bf16.msrb.mxu1 %v6688_v10  ;;  %v6600_v22 = vor.u32 %v7316_v34, %v6599_v25  ;;  %v7362_v45 = vld [vmem:[%s8338_s0 + $0x374] sm:$0xf0]  ;;  %v7263_v25 = vld [vmem:[%s8338_s0 + $0x64] sm:$0xf]  ;;  %v6393_v34 = vld [vmem:[%s8338_s0 + $0x68] sm:$0xf0] }
 0x6c5   : > { %v9532_v62 = vadd.f32 %v3239_v19, %v3221_v24  ;;  %v3451_v56 = vmul.f32 -1.702, %v9528_v29  ;;  %4440 = vmatmul.bf16.gmra.mxu1 %v9530_v63  ;;  %7634 = vrcp.f32 %v3531_v8  ;;  %4490 = vmatpush.bf16.msrb.mxu0 %v6608_v2  ;;  %v6671_v19 = vld [vmem:[%s8338_s0 + $0x290] sm:$0xf]  ;;  %v7731_v24 = vld [vmem:[%s8340_s16 + $0x28] sm:$0xff] }
 0x6c6   : > { %v9560_v38 = vperm.slane %v7731_v24, 6  ;;  %v6672_v61 = vor.u32 %v7334_v7, %v6671_v19 }
 0x6c7   : > { %v3458_v46 = vmul.f32 -1.702, %v9532_v62  ;;  %v7627_v4 = vpop.eup %7626  ;;  %v3502_v41 = vmul.f32 1.442695, %v3451_v56  ;;  %v7265_v56 = vld [vmem:[%s8338_s0 + $0x74] sm:$0xf] }
 0x6c8   : > { %v7629_v59 = vpop.eup %7628  ;;  %v3539_v53 = vadd.f32 1.0, %v7627_v4  ;;  %v3258_v13 = vpop.f32.mrf.mxu2  ;;  %4508 = vmatpush.bf16.msrb.mxu1 %v6680_v44  ;;  %v6401_v4 = vld [vmem:[%s8338_s0 + $0x78] sm:$0xf0] }
 0x6c9   : > { %v3516_v32 = vmul.f32 1.442695, %v3458_v46  ;;  %v3277_v49 = vpop.f32.mrf.mxu3  ;;  %v7631_v31 = vpop.eup %7630  ;;  %7636 = vpow2.f32 %v3502_v41  ;;  %v3259_v23 = vadd.f32 %v3258_v13, %v9473_v1  ;;  %v3594_v1 = vmul.f32 %v7629_v59, %v9466_v40  ;;  %4491 = vmatpush.bf16.msrb.mxu0 %v6600_v22  ;;  %v6663_v13 = vld [vmem:[%s8338_s0 + $0x280] sm:$0xf] }
 0x6ca   : > { %v3289_v54 = vpop.f32.mrf.mxu0  ;;  %v3308_v42 = vpop.f32.mrf.mxu1  ;;  %7638 = vrcp.f32 %v3539_v53  ;;  %v3546_v57 = vadd.f32 1.0, %v7631_v31  ;;  %v6396_v22 = vor.u32 %v7263_v25, %v6393_v34 }
 0x6cb   : > { %v3290_v18 = vadd.f32 %v3289_v54, %v9539_v21  ;;  %v7633_v50 = vpop.eup %7632  ;;  %7640 = vpow2.f32 %v3516_v32  ;;  %v9550_v11 = vadd.f32 %v3277_v49, %v3259_v23  ;;  %v7332_v49 = vld [vmem:[%s8338_s0 + $0x284] sm:$0xf0] }
 0x6cc   : > { %v3602_v52 = vmul.f32 %v7633_v50, %v9490_v27  ;;  %v7635_v33 = vpop.eup %7634  ;;  %v6783_v27 = vld [vmem:[%s8338_s0 + $0x370] sm:$0xf]  ;;  %7642 = vrcp.f32 %v3546_v57  ;;  %4509 = vmatpush.bf16.msrb.mxu1 %v6672_v61  ;;  %v6664_v23 = vor.u32 %v7332_v49, %v6663_v13  ;;  %v7360_v54 = vld [vmem:[%s8338_s0 + $0x364] sm:$0xf0]  ;;  %v7281_v57 = vld [vmem:[%s8338_s0 + $0xf4] sm:$0xf] }
 0x6cd   : > { %v9554_v58 = vadd.f32 %v3308_v42, %v3290_v18  ;;  %v3459_v8 = vmul.f32 -1.702, %v9550_v11  ;;  %v6784_v20 = vor.u32 %v7362_v45, %v6783_v27  ;;  %v3595_v10 = vmul.f32 %v7635_v33, %v9488_v17  ;;  %v6465_v33 = vld [vmem:[%s8338_s0 + $0xf8] sm:$0xf0]  ;;  %v7358_v27 = vld [vmem:[%s8338_s0 + $0x354] sm:$0xf0] }
 0x6ce   : > { %v9562_v43 = vpack.c.bf16 %v3602_v52, %v3594_v1  ;;  %v6404_v17 = vor.u32 %v7265_v56, %v6401_v4  ;;  %v6847_v1 = vld [vmem:[%s8338_s0 + $0x3f0] sm:$0xf]  ;;  %v7378_v52 = vld [vmem:[%s8338_s0 + $0x3f4] sm:$0xf0]  ;;  %v6468_v61 = vor.u32 %v7281_v57, %v6465_v33  ;;  %v6385_v56 = vld [vmem:[%s8338_s0 + $0x58] sm:$0xf0] }
 0x6cf   : > { %v3436_v40 = vmul.f32 -1.702, %v9554_v58  ;;  %v7637_v51 = vpop.eup %7636  ;;  %v3518_v55 = vmul.f32 1.442695, %v3459_v8  ;;  %4522 = vmatpush.bf16.msrb.mxu2 %v6784_v20  ;;  %v6848_v7 = vor.u32 %v7378_v52, %v6847_v1  ;;  %v7261_v20 = vld [vmem:[%s8338_s0 + $0x54] sm:$0xf] }
 0x6d0   : > { %v7639_v36 = vpop.eup %7638  ;;  %4454 = vmatmul.bf16.vlgmr.msra.gmra.mxu2 %v9562_v43  ;;  %v3327_v5 = vpop.f32.mrf.mxu2  ;;  %v3547_v48 = vadd.f32 1.0, %v7637_v51  ;;  %4560 = vmatpush.bf16.msra.mxu0 %v6404_v17  ;;  %v6839_v4 = vld [vmem:[%s8338_s0 + $0x3e0] sm:$0xf]  ;;  %v7376_v17 = vld [vmem:[%s8338_s0 + $0x3e4] sm:$0xf0] }
 0x6d1   : > { %v3472_v46 = vmul.f32 1.442695, %v3436_v40  ;;  %v3346_v30 = vpop.f32.mrf.mxu3  ;;  %v7641_v41 = vpop.eup %7640  ;;  %v3603_v2 = vmul.f32 %v7639_v36, %v9507_v9  ;;  %7644 = vpow2.f32 %v3518_v55  ;;  %v3328_v59 = vadd.f32 %v3327_v5, %v9560_v38  ;;  %v6775_v9 = vld [vmem:[%s8338_s0 + $0x360] sm:$0xf]  ;;  %4510 = vmatpush.bf16.msrb.mxu1 %v6664_v23  ;;  %v6767_v40 = vld [vmem:[%s8338_s0 + $0x350] sm:$0xf]  ;;  %4541 = vmatpush.bf16.msrb.mxu3 %v6848_v7 }
 0x6d2   : > { %v3291_v53 = vpop.f32.mrf.mxu0  ;;  %v3310_v32 = vpop.f32.mrf.mxu1  ;;  %v3554_v15 = vadd.f32 1.0, %v7641_v41  ;;  %v6776_v44 = vor.u32 %v7360_v54, %v6775_v9  ;;  %v6768_v55 = vor.u32 %v7358_v27, %v6767_v40  ;;  %v7279_v13 = vld [vmem:[%s8338_s0 + $0xe4] sm:$0xf]  ;;  %v6457_v49 = vld [vmem:[%s8338_s0 + $0xe8] sm:$0xf0]  ;;  %v6840_v9 = vor.u32 %v7376_v17, %v6839_v4 }
 0x6d3   : > { %v3292_v31 = vadd.f32 %v3291_v53, %v9539_v21  ;;  %v9578_v42 = vpack.c.bf16 %v3603_v2, %v3595_v10  ;;  %7646 = vpow2.f32 %v3472_v46  ;;  %v9580_v18 = vadd.f32 %v3346_v30, %v3328_v59  ;;  %v7643_v8 = vpop.eup %7642  ;;  %v7356_v54 = vld [vmem:[%s8338_s0 + $0x344] sm:$0xf0]  ;;  %v7374_v7 = vld [vmem:[%s8338_s0 + $0x3d4] sm:$0xf0]  ;;  %v7277_v33 = vld [vmem:[%s8338_s0 + $0xd4] sm:$0xf] }
 0x6d4   : > { %7648 = vrcp.f32 %v3554_v15  ;;  %4523 = vmatpush.bf16.msrb.mxu2 %v6776_v44  ;;  %4561 = vmatpush.bf16.msra.mxu0 %v6396_v22  ;;  %v6388_v30 = vor.u32 %v7261_v20, %v6385_v56  ;;  %v3610_v2 = vmul.f32 %v7643_v8, %v9509_v28  ;;  %v6759_v28 = vld [vmem:[%s8338_s0 + $0x340] sm:$0xf]  ;;  %v6460_v34 = vor.u32 %v7279_v13, %v6457_v49  ;;  %v7259_v44 = vld [vmem:[%s8338_s0 + $0x44] sm:$0xf]  ;;  %v6377_v22 = vld [vmem:[%s8338_s0 + $0x48] sm:$0xf0] }
 0x6d5   : > { %v9584_v50 = vadd.f32 %v3310_v32, %v3292_v31  ;;  %v3437_v19 = vmul.f32 -1.702, %v9580_v18  ;;  %4473 = vmatmul.bf16.vlgmr.msra.gmra.mxu3 %v9578_v42  ;;  %7650 = vrcp.f32 %v3547_v48  ;;  %4579 = vmatpush.bf16.msra.mxu1 %v6468_v61  ;;  %v6760_v52 = vor.u32 %v7356_v54, %v6759_v28  ;;  %v6449_v61 = vld [vmem:[%s8338_s0 + $0xd8] sm:$0xf0] }
 0x6d6   : > { %4542 = vmatpush.bf16.msrb.mxu3 %v6840_v9  ;;  %v6380_v57 = vor.u32 %v7259_v44, %v6377_v22  ;;  %v6441_v9 = vld [vmem:[%s8338_s0 + $0xc8] sm:$0xf0] }
 0x6d7   : > { %v3444_v24 = vmul.f32 -1.702, %v9584_v50  ;;  %v7645_v45 = vpop.eup %7644  ;;  %v3474_v51 = vmul.f32 1.442695, %v3437_v19  ;;  %v6831_v19 = vld [vmem:[%s8338_s0 + $0x3d0] sm:$0xf] }
 0x6d8   : > { %v3555_v36 = vadd.f32 1.0, %v7645_v45  ;;  %v3329_v46 = vpop.f32.mrf.mxu2  ;;  %4524 = vmatpush.bf16.msrb.mxu2 %v6768_v55  ;;  %4562 = vmatpush.bf16.msra.mxu0 %v6388_v30  ;;  %v6452_v45 = vor.u32 %v7277_v33, %v6449_v61  ;;  %v7354_v55 = vld [vmem:[%s8338_s0 + $0x334] sm:$0xf0]  ;;  %v7273_v61 = vld [vmem:[%s8338_s0 + $0xb4] sm:$0xf] }
 0x6d9   : > { %v3488_v10 = vmul.f32 1.442695, %v3444_v24  ;;  %v3348_v5 = vpop.f32.mrf.mxu3  ;;  %v7647_v41 = vpop.eup %7646  ;;  %7652 = vpow2.f32 %v3474_v51  ;;  %v3330_v59 = vadd.f32 %v3329_v46, %v9560_v38  ;;  %4580 = vmatpush.bf16.msra.mxu1 %v6460_v34  ;;  %v6832_v24 = vor.u32 %v7374_v7, %v6831_v19  ;;  %v6751_v51 = vld [vmem:[%s8338_s0 + $0x330] sm:$0xf]  ;;  %v6369_v46 = vld [vmem:[%s8338_s0 + $0x38] sm:$0xf0] }
 0x6da   : > { %v3294_v53 = vpop.f32.mrf.mxu0  ;;  %v3313_v32 = vpop.f32.mrf.mxu1  ;;  %7654 = vrcp.f32 %v3555_v36  ;;  %v3532_v31 = vadd.f32 1.0, %v7647_v41  ;;  %v6752_v36 = vor.u32 %v7354_v55, %v6751_v51  ;;  %v7352_v34 = vld [vmem:[%s8338_s0 + $0x324] sm:$0xf0]  ;;  %v6361_v19 = vld [vmem:[%s8338_s0 + $0x28] sm:$0xf0] }
 0x6db   : > { %v7649_v15 = vpop.eup %7648  ;;  %v3295_v23 = vadd.f32 %v3294_v53, %v9539_v21  ;;  %7656 = vpow2.f32 %v3488_v10  ;;  %v9607_v25 = vadd.f32 %v3348_v5, %v3330_v59  ;;  %v7257_v10 = vld [vmem:[%s8338_s0 + $0x34] sm:$0xf]  ;;  %4543 = vmatpush.bf16.msrb.mxu3 %v6832_v24  ;;  %v6823_v59 = vld [vmem:[%s8338_s0 + $0x3c0] sm:$0xf]  ;;  %v7370_v24 = vld [vmem:[%s8338_s0 + $0x3b4] sm:$0xf0] }
 0x6dc   : > { %v3618_v48 = vmul.f32 %v7649_v15, %v9532_v62  ;;  %v7651_v40 = vpop.eup %7650  ;;  %4525 = vmatpush.bf16.msrb.mxu2 %v6760_v52  ;;  %4563 = vmatpush.bf16.msra.mxu0 %v6380_v57  ;;  %7658 = vrcp.f32 %v3532_v31  ;;  %v7372_v31 = vld [vmem:[%s8338_s0 + $0x3c4] sm:$0xf0]  ;;  %v7255_v57 = vld [vmem:[%s8338_s0 + $0x24] sm:$0xf]  ;;  %v6433_v55 = vld [vmem:[%s8338_s0 + $0xb8] sm:$0xf0] }
 0x6dd   : > { %v9611_v1 = vadd.f32 %v3313_v32, %v3295_v23  ;;  %v3445_v62 = vmul.f32 -1.702, %v9607_v25  ;;  %v3611_v32 = vmul.f32 %v7651_v40, %v9528_v29  ;;  %4581 = vmatpush.bf16.msra.mxu1 %v6452_v45  ;;  %v7275_v23 = vld [vmem:[%s8338_s0 + $0xc4] sm:$0xf]  ;;  %v6824_v29 = vor.u32 %v7372_v31, %v6823_v59 }
 0x6de   : > { %v9617_v8 = vpack.c.bf16 %v3618_v48, %v3610_v2  ;;  %v6372_v2 = vor.u32 %v7257_v10, %v6369_v46  ;;  %v640_v48 = vld [vmem:[%s8340_s16 + $0x30] sm:$0xff]  ;;  %v6444_v7 = vor.u32 %v7275_v23, %v6441_v9  ;;  %v6364_v45 = vor.u32 %v7255_v57, %v6361_v19  ;;  %v7350_v46 = vld [vmem:[%s8338_s0 + $0x314] sm:$0xf0]  ;;  %v7348_v19 = vld [vmem:[%s8338_s0 + $0x304] sm:$0xf0] }
 0x6df   : > { %v3452_v27 = vmul.f32 -1.702, %v9611_v1  ;;  %v7653_v20 = vpop.eup %7652  ;;  %v3490_v56 = vmul.f32 1.442695, %v3445_v62  ;;  %4544 = vmatpush.bf16.msrb.mxu3 %v6824_v29  ;;  %v6815_v62 = vld [vmem:[%s8338_s0 + $0x3b0] sm:$0xf] }
 0x6e0   : > { %v7655_v5 = vpop.eup %7654  ;;  %4459 = vmatmul.bf16.gmra.mxu2 %v9617_v8  ;;  %v3332_v4 = vpop.f32.mrf.mxu2  ;;  %v3533_v44 = vadd.f32 1.0, %v7653_v20  ;;  %4564 = vmatpush.bf16.msra.mxu0 %v6372_v2  ;;  %v6816_v51 = vor.u32 %v7370_v24, %v6815_v62  ;;  %v6735_v10 = vld [vmem:[%s8338_s0 + $0x310] sm:$0xf]  ;;  %v6353_v2 = vld [vmem:[%s8338_s0 + $0x18] sm:$0xf0] }
 0x6e1   : > { %v3504_v30 = vmul.f32 1.442695, %v3452_v27  ;;  %v3351_v41 = vpop.f32.mrf.mxu3  ;;  %v7657_v53 = vpop.eup %7656  ;;  %v3619_v17 = vmul.f32 %v7655_v5, %v9550_v11  ;;  %7660 = vpow2.f32 %v3490_v56  ;;  %v3333_v13 = vadd.f32 %v3332_v4, %v9560_v38  ;;  %4526 = vmatpush.bf16.msrb.mxu2 %v6752_v36  ;;  %v6743_v11 = vld [vmem:[%s8338_s0 + $0x320] sm:$0xf]  ;;  %4582 = vmatpush.bf16.msra.mxu1 %v6444_v7  ;;  %v6425_v29 = vld [vmem:[%s8338_s0 + $0xa8] sm:$0xf0] }
 0x6e2   : > { %v3296_v49 = vpop.f32.mrf.mxu0  ;;  %v3315_v15 = vpop.f32.mrf.mxu1  ;;  %v3540_v28 = vadd.f32 1.0, %v7657_v53  ;;  %v6744_v33 = vor.u32 %v7352_v34, %v6743_v11  ;;  %v9650_v27 = vperm.slane %v640_v48, 6  ;;  %v6436_v36 = vor.u32 %v7273_v61, %v6433_v55  ;;  %v7271_v48 = vld [vmem:[%s8338_s0 + $0xa4] sm:$0xf]  ;;  %v641_v57 = vld [vmem:[%s8340_s16 + $0x38] sm:$0xff] }
 0x6e3   : > { %v3297_v54 = vadd.f32 %v3296_v49, %v9539_v21  ;;  %7662 = vpow2.f32 %v3504_v30  ;;  %v9637_v22 = vadd.f32 %v3351_v41, %v3333_v13  ;;  %v9639_v52 = vpack.c.bf16 %v3619_v17, %v3611_v32  ;;  %v7659_v20 = vpop.eup %7658  ;;  %v7253_v41 = vld [vmem:[%s8338_s0 + $0x14] sm:$0xf]  ;;  %4545 = vmatpush.bf16.msrb.mxu3 %v6816_v51  ;;  %v6807_v49 = vld [vmem:[%s8338_s0 + $0x3a0] sm:$0xf]  ;;  %v7251_v24 = vld [vmem:[%s8338_s0 + $0x4] sm:$0xf] }
 0x6e4   : > { %7664 = vrcp.f32 %v3540_v28  ;;  %4565 = vmatpush.bf16.msra.mxu0 %v6364_v45  ;;  %v6736_v4 = vor.u32 %v7350_v46, %v6735_v10  ;;  %v6356_v13 = vor.u32 %v7253_v41, %v6353_v2  ;;  %v3596_v31 = vmul.f32 %v7659_v20, %v9554_v58  ;;  %v6345_v61 = vld [vmem:[%s8338_s0 + $0x8] sm:$0xf0]  ;;  %v6799_v55 = vld [vmem:[%s8338_s0 + $0x390] sm:$0xf]  ;;  %v7366_v20 = vld [vmem:[%s8338_s0 + $0x394] sm:$0xf0] }
 0x6e5   : > { %v9643_v21 = vadd.f32 %v3315_v15, %v3297_v54  ;;  %v3453_v40 = vmul.f32 -1.702, %v9637_v22  ;;  %4478 = vmatmul.bf16.gmra.mxu3 %v9639_v52  ;;  %4527 = vmatpush.bf16.msrb.mxu2 %v6744_v33  ;;  %7666 = vrcp.f32 %v3533_v44  ;;  %v7368_v54 = vld [vmem:[%s8338_s0 + $0x3a4] sm:$0xf0]  ;;  %v6428_v62 = vor.u32 %v7271_v48, %v6425_v29  ;;  %v7297_v2 = vld [vmem:[%s8338_s0 + $0x174] sm:$0xf] }
 0x6e6   : > { %4583 = vmatpush.bf16.msra.mxu1 %v6436_v36  ;;  %v6808_v58 = vor.u32 %v7368_v54, %v6807_v49  ;;  %v6348_v51 = vor.u32 %v7251_v24, %v6345_v61  ;;  %v9681_v10 = vperm.slane %v641_v57, 6  ;;  %v6800_v46 = vor.u32 %v7366_v20, %v6799_v55  ;;  %v6657_v49 = vld [vmem:[%s8338_s0 + $0x278] sm:$0xf0]  ;;  %v6791_v54 = vld [vmem:[%s8338_s0 + $0x380] sm:$0xf] }
 0x6e7   : > { %v3460_v56 = vmul.f32 -1.702, %v9643_v21  ;;  %v7661_v5 = vpop.eup %7660  ;;  %v3506_v30 = vmul.f32 1.442695, %v3453_v40  ;;  %v6521_v24 = vld [vmem:[%s8338_s0 + $0x168] sm:$0xf0] }
 0x6e8   : > { %v3541_v59 = vadd.f32 1.0, %v7661_v5  ;;  %v3334_v32 = vpop.f32.mrf.mxu2  ;;  %4566 = vmatpush.bf16.msra.mxu0 %v6356_v13  ;;  %4546 = vmatpush.bf16.msrb.mxu3 %v6808_v58  ;;  %v6417_v5 = vld [vmem:[%s8338_s0 + $0x98] sm:$0xf0]  ;;  %v7329_v13 = vld [vmem:[%s8338_s0 + $0x274] sm:$0xf] }
 0x6e9   : > { %v3520_v53 = vmul.f32 1.442695, %v3460_v56  ;;  %v3353_v17 = vpop.f32.mrf.mxu3  ;;  %v7663_v15 = vpop.eup %7662  ;;  %7668 = vpow2.f32 %v3506_v30  ;;  %v3335_v23 = vadd.f32 %v3334_v32, %v9560_v38  ;;  %4528 = vmatpush.bf16.msrb.mxu2 %v6736_v4  ;;  %v6727_v38 = vld [vmem:[%s8338_s0 + $0x300] sm:$0xf]  ;;  %v7269_v56 = vld [vmem:[%s8338_s0 + $0x94] sm:$0xf] }
 0x6ea   : > { %v3365_v9 = vpop.f32.mrf.mxu0  ;;  %v3384_v28 = vpop.f32.mrf.mxu1  ;;  %7670 = vrcp.f32 %v3541_v59  ;;  %v3548_v34 = vadd.f32 1.0, %v7663_v15  ;;  %v6728_v45 = vor.u32 %v7348_v19, %v6727_v38  ;;  %4584 = vmatpush.bf16.msra.mxu1 %v6428_v62  ;;  %v6420_v41 = vor.u32 %v7269_v56, %v6417_v5  ;;  %v6529_v59 = vld [vmem:[%s8338_s0 + $0x178] sm:$0xf0]  ;;  %v7364_v58 = vld [vmem:[%s8338_s0 + $0x384] sm:$0xf0] }
 0x6eb   : > { %v7665_v11 = vpop.eup %7664  ;;  %v3366_v44 = vadd.f32 %v3365_v9, %v9650_v27  ;;  %7672 = vpow2.f32 %v3520_v53  ;;  %v9669_v33 = vadd.f32 %v3353_v17, %v3335_v23  ;;  %v6532_v17 = vor.u32 %v7297_v2, %v6529_v59  ;;  %v7267_v38 = vld [vmem:[%s8338_s0 + $0x84] sm:$0xf]  ;;  %v6409_v19 = vld [vmem:[%s8338_s0 + $0x88] sm:$0xf0]  ;;  %v7313_v5 = vld [vmem:[%s8338_s0 + $0x1f4] sm:$0xf] }
 0x6ec   : > { %v3604_v7 = vmul.f32 %v7665_v11, %v9584_v50  ;;  %v7667_v30 = vpop.eup %7666  ;;  %7674 = vrcp.f32 %v3548_v34  ;;  %4567 = vmatpush.bf16.msra.mxu0 %v6348_v51  ;;  %4547 = vmatpush.bf16.msrb.mxu3 %v6800_v46  ;;  %v7327_v55 = vld [vmem:[%s8338_s0 + $0x264] sm:$0xf]  ;;  %v6649_v20 = vld [vmem:[%s8338_s0 + $0x268] sm:$0xf0] }
 0x6ed   : > { %v9673_v40 = vadd.f32 %v3384_v28, %v3366_v44  ;;  %v3461_v50 = vmul.f32 -1.702, %v9669_v33  ;;  %4529 = vmatpush.bf16.msrb.mxu2 %v6728_v45  ;;  %v6660_v28 = vor.u32 %v7329_v13, %v6657_v49  ;;  %v3597_v29 = vmul.f32 %v7667_v30, %v9580_v18  ;;  %v6593_v30 = vld [vmem:[%s8338_s0 + $0x1f8] sm:$0xf0]  ;;  %v7293_v49 = vld [vmem:[%s8338_s0 + $0x154] sm:$0xf] }
 0x6ee   : > { %v9678_v36 = vpack.c.bf16 %v3604_v7, %v3596_v31  ;;  %4585 = vmatpush.bf16.msra.mxu1 %v6420_v41  ;;  %v6792_v18 = vor.u32 %v7364_v58, %v6791_v54  ;;  %v6652_v2 = vor.u32 %v7327_v55, %v6649_v20  ;;  %v6596_v59 = vor.u32 %v7313_v5, %v6593_v30  ;;  %v6641_v54 = vld [vmem:[%s8338_s0 + $0x258] sm:$0xf0] }
 0x6ef   : > { %v3438_v4 = vmul.f32 -1.702, %v9673_v40  ;;  %v7669_v53 = vpop.eup %7668  ;;  %v3522_v32 = vmul.f32 1.442695, %v3461_v50  ;;  %v6412_v50 = vor.u32 %v7267_v38, %v6409_v19 }
 0x6f0   : > { %4492 = vmatmul.bf16.vlgmr.msrb.gmra.mxu0 %v9678_v36  ;;  %v7671_v15 = vpop.eup %7670  ;;  %v3403_v23 = vpop.f32.mrf.mxu2  ;;  %v3549_v45 = vadd.f32 1.0, %v7669_v53  ;;  %4548 = vmatpush.bf16.msrb.mxu3 %v6792_v18  ;;  %v6721_v53 = vld [vmem:[%s8338_s0 + $0x2f8] sm:$0xf0]  ;;  %v6585_v18 = vld [vmem:[%s8338_s0 + $0x1e8] sm:$0xf0] }
 0x6f1   : > { %v3476_v31 = vmul.f32 1.442695, %v3438_v4  ;;  %v3422_v9 = vpop.f32.mrf.mxu3  ;;  %v7673_v48 = vpop.eup %7672  ;;  %v3605_v11 = vmul.f32 %v7671_v15, %v9607_v25  ;;  %7676 = vpow2.f32 %v3522_v32  ;;  %v3404_v34 = vadd.f32 %v3403_v23, %v9681_v10  ;;  %4598 = vmatpush.bf16.msra.mxu2 %v6532_v17  ;;  %4636 = vmatpush.bf16.msrb.mxu0 %v6660_v28  ;;  %v7295_v25 = vld [vmem:[%s8338_s0 + $0x164] sm:$0xf]  ;;  %v7345_v4 = vld [vmem:[%s8338_s0 + $0x2f4] sm:$0xf] }
 0x6f2   : > { %v3367_v44 = vpop.f32.mrf.mxu0  ;;  %v3386_v57 = vpop.f32.mrf.mxu1  ;;  %v3556_v7 = vadd.f32 1.0, %v7673_v48  ;;  %v6524_v46 = vor.u32 %v7295_v25, %v6521_v24  ;;  %4586 = vmatpush.bf16.msra.mxu1 %v6412_v50  ;;  %v6724_v13 = vor.u32 %v7345_v4, %v6721_v53  ;;  %v6513_v15 = vld [vmem:[%s8338_s0 + $0x158] sm:$0xf0]  ;;  %v7325_v28 = vld [vmem:[%s8338_s0 + $0x254] sm:$0xf] }
 0x6f3   : > { %v3368_v62 = vadd.f32 %v3367_v44, %v9650_v27  ;;  %v9700_v61 = vpack.c.bf16 %v3605_v11, %v3597_v29  ;;  %7678 = vpow2.f32 %v3476_v31  ;;  %v9702_v51 = vadd.f32 %v3422_v9, %v3404_v34  ;;  %v7675_v32 = vpop.eup %7674  ;;  %v7343_v25 = vld [vmem:[%s8338_s0 + $0x2e4] sm:$0xf]  ;;  %v6713_v24 = vld [vmem:[%s8338_s0 + $0x2e8] sm:$0xf0] }
 0x6f4   : > { %7680 = vrcp.f32 %v3556_v7  ;;  %4617 = vmatpush.bf16.msra.mxu3 %v6596_v59  ;;  %v6516_v9 = vor.u32 %v7293_v49, %v6513_v15  ;;  %v6644_v44 = vor.u32 %v7325_v28, %v6641_v54  ;;  %v3612_v38 = vmul.f32 %v7675_v32, %v9611_v1  ;;  %v7291_v1 = vld [vmem:[%s8338_s0 + $0x144] sm:$0xf]  ;;  %v7341_v49 = vld [vmem:[%s8338_s0 + $0x2d4] sm:$0xf] }
 0x6f5   : > { %v9706_v56 = vadd.f32 %v3386_v57, %v3368_v62  ;;  %v3439_v41 = vmul.f32 -1.702, %v9702_v51  ;;  %4511 = vmatmul.bf16.vlgmr.msrb.gmra.mxu1 %v9700_v61  ;;  %4599 = vmatpush.bf16.msra.mxu2 %v6524_v46  ;;  %7682 = vrcp.f32 %v3549_v45  ;;  %v7311_v57 = vld [vmem:[%s8338_s0 + $0x1e4] sm:$0xf]  ;;  %v6505_v46 = vld [vmem:[%s8338_s0 + $0x148] sm:$0xf0]  ;;  %v6716_v4 = vor.u32 %v7343_v25, %v6713_v24 }
 0x6f6   : > { %4637 = vmatpush.bf16.msrb.mxu0 %v6652_v2  ;;  %4655 = vmatpush.bf16.msrb.mxu1 %v6724_v13  ;;  %v6588_v50 = vor.u32 %v7311_v57, %v6585_v18  ;;  %v6633_v2 = vld [vmem:[%s8338_s0 + $0x248] sm:$0xf0]  ;;  %v6508_v53 = vor.u32 %v7291_v1, %v6505_v46  ;;  %v6577_v13 = vld [vmem:[%s8338_s0 + $0x1d8] sm:$0xf0]  ;;  %v7321_v57 = vld [vmem:[%s8338_s0 + $0x234] sm:$0xf] }
 0x6f7   : > { %v3446_v17 = vmul.f32 -1.702, %v9706_v56  ;;  %v7677_v31 = vpop.eup %7676  ;;  %v3478_v23 = vmul.f32 1.442695, %v3439_v41  ;;  %v7323_v41 = vld [vmem:[%s8338_s0 + $0x244] sm:$0xf] }
 0x6f8   : > { %v3557_v48 = vadd.f32 1.0, %v7677_v31  ;;  %v3405_v11 = vpop.f32.mrf.mxu2  ;;  %4618 = vmatpush.bf16.msra.mxu3 %v6588_v50  ;;  %v6636_v32 = vor.u32 %v7323_v41, %v6633_v2  ;;  %v7307_v25 = vld [vmem:[%s8338_s0 + $0x1c4] sm:$0xf]  ;;  %v6569_v1 = vld [vmem:[%s8338_s0 + $0x1c8] sm:$0xf0] }
 0x6f9   : > { %v3492_v29 = vmul.f32 1.442695, %v3446_v17  ;;  %v3424_v34 = vpop.f32.mrf.mxu3  ;;  %v7679_v58 = vpop.eup %7678  ;;  %7684 = vpow2.f32 %v3478_v23  ;;  %v3406_v19 = vadd.f32 %v3405_v11, %v9681_v10  ;;  %4600 = vmatpush.bf16.msra.mxu2 %v6516_v9  ;;  %v7309_v17 = vld [vmem:[%s8338_s0 + $0x1d4] sm:$0xf]  ;;  %v6705_v23 = vld [vmem:[%s8338_s0 + $0x2d8] sm:$0xf0]  ;;  %v6572_v2 = vor.u32 %v7307_v25, %v6569_v1 }
 0x6fa   : > { %v3370_v7 = vpop.f32.mrf.mxu0  ;;  %v3389_v62 = vpop.f32.mrf.mxu1  ;;  %7686 = vrcp.f32 %v3557_v48  ;;  %v3534_v55 = vadd.f32 1.0, %v7679_v58  ;;  %4638 = vmatpush.bf16.msrb.mxu0 %v6644_v44  ;;  %4656 = vmatpush.bf16.msrb.mxu1 %v6716_v4  ;;  %v6580_v31 = vor.u32 %v7309_v17, %v6577_v13  ;;  %v6708_v54 = vor.u32 %v7341_v49, %v6705_v23  ;;  %v7289_v48 = vld [vmem:[%s8338_s0 + $0x134] sm:$0xf]  ;;  %v6625_v58 = vld [vmem:[%s8338_s0 + $0x238] sm:$0xf0] }
 0x6fb   : > { %v7681_v45 = vpop.eup %7680  ;;  %v3371_v20 = vadd.f32 %v3370_v7, %v9650_v27  ;;  %7688 = vpow2.f32 %v3492_v29  ;;  %v9729_v30 = vadd.f32 %v3424_v34, %v3406_v19  ;;  %v6497_v29 = vld [vmem:[%s8338_s0 + $0x138] sm:$0xf0]  ;;  %v6628_v18 = vor.u32 %v7321_v57, %v6625_v58  ;;  %v7339_v46 = vld [vmem:[%s8338_s0 + $0x2c4] sm:$0xf] }
 0x6fc   : > { %v3620_v5 = vmul.f32 %v7681_v45, %v9643_v21  ;;  %v7683_v9 = vpop.eup %7682  ;;  %v6500_v44 = vor.u32 %v7289_v48, %v6497_v29  ;;  %7690 = vrcp.f32 %v3534_v55  ;;  %4619 = vmatpush.bf16.msra.mxu3 %v6580_v31  ;;  %v7319_v49 = vld [vmem:[%s8338_s0 + $0x224] sm:$0xf] }
 0x6fd   : > { %v9733_v59 = vadd.f32 %v3389_v62, %v3371_v20  ;;  %v3447_v21 = vmul.f32 -1.702, %v9729_v30  ;;  %4601 = vmatpush.bf16.msra.mxu2 %v6508_v53  ;;  %v3613_v45 = vmul.f32 %v7683_v9, %v9637_v22  ;;  %v7287_v22 = vld [vmem:[%s8338_s0 + $0x124] sm:$0xf]  ;;  %v7305_v9 = vld [vmem:[%s8338_s0 + $0x1b4] sm:$0xf] }
 0x6fe   : > { %v9739_v15 = vpack.c.bf16 %v3620_v5, %v3612_v38  ;;  %4639 = vmatpush.bf16.msrb.mxu0 %v6636_v32  ;;  %4657 = vmatpush.bf16.msrb.mxu1 %v6708_v54  ;;  %v6697_v5 = vld [vmem:[%s8338_s0 + $0x2c8] sm:$0xf0]  ;;  %v7337_v54 = vld [vmem:[%s8338_s0 + $0x2b4] sm:$0xf] }
 0x6ff   : > { %v3454_v28 = vmul.f32 -1.702, %v9733_v59  ;;  %v7685_v11 = vpop.eup %7684  ;;  %v3494_v34 = vmul.f32 1.442695, %v3447_v21  ;;  %v6617_v21 = vld [vmem:[%s8338_s0 + $0x228] sm:$0xf0] }
 0x700   : > { %4497 = vmatmul.bf16.gmra.mxu0 %v9739_v15  ;;  %v7687_v38 = vpop.eup %7686  ;;  %v3408_v7 = vpop.f32.mrf.mxu2  ;;  %v3535_v53 = vadd.f32 1.0, %v7685_v11  ;;  %4620 = vmatpush.bf16.msra.mxu3 %v6572_v2  ;;  %v6620_v29 = vor.u32 %v7319_v49, %v6617_v21  ;;  %v6681_v2 = vld [vmem:[%s8338_s0 + $0x2a8] sm:$0xf0]  ;;  %v7283_v49 = vld [vmem:[%s8338_s0 + $0x104] sm:$0xf] }
 0x701   : > { %v3508_v19 = vmul.f32 1.442695, %v3454_v28  ;;  %v3427_v62 = vpop.f32.mrf.mxu3  ;;  %v7689_v24 = vpop.eup %7688  ;;  %v3621_v20 = vmul.f32 %v7687_v38, %v9669_v33  ;;  %7692 = vpow2.f32 %v3494_v34  ;;  %v3409_v50 = vadd.f32 %v3408_v7, %v9681_v10  ;;  %4602 = vmatpush.bf16.msra.mxu2 %v6500_v44  ;;  %v6489_v33 = vld [vmem:[%s8338_s0 + $0x128] sm:$0xf0]  ;;  %v6561_v28 = vld [vmem:[%s8338_s0 + $0x1b8] sm:$0xf0] }
 0x702   : > { %v3372_v55 = vpop.f32.mrf.mxu0  ;;  %v3542_v4 = vadd.f32 1.0, %v7689_v24  ;;  %v3391_v17 = vpop.f32.mrf.mxu1  ;;  %4640 = vmatpush.bf16.msrb.mxu0 %v6628_v18  ;;  %v6492_v23 = vor.u32 %v7287_v22, %v6489_v33  ;;  %v6564_v11 = vor.u32 %v7305_v9, %v6561_v28  ;;  %v6689_v34 = vld [vmem:[%s8338_s0 + $0x2b8] sm:$0xf0]  ;;  %v7285_v44 = vld [vmem:[%s8338_s0 + $0x114] sm:$0xf] }
 0x703   : > { %v3373_v41 = vadd.f32 %v3372_v55, %v9650_v27  ;;  %v9758_v32 = vadd.f32 %v3427_v62, %v3409_v50  ;;  %v9760_v13 = vpack.c.bf16 %v3621_v20, %v3613_v45  ;;  %v6700_v27 = vor.u32 %v7339_v46, %v6697_v5  ;;  %v7691_v57 = vpop.eup %7690  ;;  %v6481_v7 = vld [vmem:[%s8338_s0 + $0x118] sm:$0xf0]  ;;  %v7317_v62 = vld [vmem:[%s8338_s0 + $0x214] sm:$0xf]  ;;  %v7303_v45 = vld [vmem:[%s8338_s0 + $0x1a4] sm:$0xf] }
 0x704   : > { %7694 = vrcp.f32 %v3542_v4  ;;  %v6692_v38 = vor.u32 %v7337_v54, %v6689_v34  ;;  %v6484_v25 = vor.u32 %v7285_v44, %v6481_v7  ;;  %v6609_v24 = vld [vmem:[%s8338_s0 + $0x218] sm:$0xf0]  ;;  %4621 = vmatpush.bf16.msra.mxu3 %v6564_v11  ;;  %v6553_v46 = vld [vmem:[%s8338_s0 + $0x1a8] sm:$0xf0]  ;;  %v3598_v33 = vmul.f32 %v7691_v57, %v9673_v40  ;;  %v7315_v28 = vld [vmem:[%s8338_s0 + $0x204] sm:$0xf] }
 0x705   : > { %v9764_v31 = vadd.f32 %v3391_v17, %v3373_v41  ;;  %7696 = vpow2.f32 %v3508_v19  ;;  %v3455_v48 = vmul.f32 -1.702, %v9758_v32  ;;  %4516 = vmatmul.bf16.gmra.mxu1 %v9760_v13  ;;  %4603 = vmatpush.bf16.msra.mxu2 %v6492_v23  ;;  %v6612_v1 = vor.u32 %v7317_v62, %v6609_v24  ;;  %v7335_v41 = vld [vmem:[%s8338_s0 + $0x2a4] sm:$0xf]  ;;  %v6473_v21 = vld [vmem:[%s8338_s0 + $0x108] sm:$0xf0] }
 0x706   : > { %4658 = vmatpush.bf16.msrb.mxu1 %v6700_v27  ;;  %7698 = vrcp.f32 %v3535_v53  ;;  %4641 = vmatpush.bf16.msrb.mxu0 %v6620_v29  ;;  %v6556_v4 = vor.u32 %v7303_v45, %v6553_v46  ;;  %v6684_v17 = vor.u32 %v7335_v41, %v6681_v2  ;;  %v6476_v9 = vor.u32 %v7283_v49, %v6473_v21  ;;  %v6601_v54 = vld [vmem:[%s8338_s0 + $0x208] sm:$0xf0]  ;;  %v7301_v40 = vld [vmem:[%s8338_s0 + $0x194] sm:$0xf]  ;;  %v6545_v29 = vld [vmem:[%s8338_s0 + $0x198] sm:$0xf0] }
 0x707   : > { %v3462_v58 = vmul.f32 -1.702, %v9764_v31  ;;  %v7693_v19 = vpop.eup %7692  ;;  %v3510_v18 = vmul.f32 1.442695, %v3455_v48  ;;  %v6604_v48 = vor.u32 %v7315_v28, %v6601_v54  ;;  %v7333_v11 = vld [vmem:[%s8338_s0 + $0x294] sm:$0xf] }
 0x708   : > { %v3543_v20 = vadd.f32 1.0, %v7693_v19  ;;  %v3410_v55 = vpop.f32.mrf.mxu2  ;;  %4622 = vmatpush.bf16.msra.mxu3 %v6556_v4  ;;  %v6673_v34 = vld [vmem:[%s8338_s0 + $0x298] sm:$0xf0]  ;;  %v7361_v62 = vld [vmem:[%s8338_s0 + $0x374] sm:$0xf] }
 0x709   : > { %v3524_v50 = vmul.f32 1.442695, %v3462_v58  ;;  %7700 = vpow2.f32 %v3510_v18  ;;  %v3411_v5 = vadd.f32 %v3410_v55, %v9681_v10  ;;  %v3429_v53 = vpop.f32.mrf.mxu3  ;;  %4604 = vmatpush.bf16.msra.mxu2 %v6484_v25  ;;  %v6676_v7 = vor.u32 %v7333_v11, %v6673_v34  ;;  %v6785_v19 = vld [vmem:[%s8338_s0 + $0x378] sm:$0xf0]  ;;  %v7331_v4 = vld [vmem:[%s8338_s0 + $0x284] sm:$0xf] }
 0x70a   : > { %v7695_v22 = vpop.eup %7694  ;;  %7702 = vrcp.f32 %v3543_v20  ;;  %4659 = vmatpush.bf16.msrb.mxu1 %v6692_v38  ;;  %4642 = vmatpush.bf16.msrb.mxu0 %v6612_v1  ;;  %v6788_v24 = vor.u32 %v7361_v62, %v6785_v19  ;;  %v7299_v20 = vld [vmem:[%s8338_s0 + $0x184] sm:$0xf]  ;;  %v6849_v49 = vld [vmem:[%s8338_s0 + $0x3f8] sm:$0xf0] }
 0x70b   : > { %v7697_v10 = vpop.eup %7696  ;;  %v3606_v27 = vmul.f32 %v7695_v22, %v9706_v56  ;;  %7704 = vpow2.f32 %v3524_v50  ;;  %v9786_v23 = vadd.f32 %v3429_v53, %v3411_v5  ;;  %v6548_v56 = vor.u32 %v7301_v40, %v6545_v29  ;;  %v6537_v50 = vld [vmem:[%s8338_s0 + $0x188] sm:$0xf0]  ;;  %v7359_v22 = vld [vmem:[%s8338_s0 + $0x364] sm:$0xf]  ;;  %v6833_v62 = vld [vmem:[%s8338_s0 + $0x3d8] sm:$0xf0] }
 0x70c   : > { %v7699_v58 = vpop.eup %7698  ;;  %v3550_v38 = vadd.f32 1.0, %v7697_v10  ;;  %v6540_v5 = vor.u32 %v7299_v20, %v6537_v50  ;;  %v7357_v10 = vld [vmem:[%s8338_s0 + $0x354] sm:$0xf]  ;;  %v6841_v29 = vld [vmem:[%s8338_s0 + $0x3e8] sm:$0xf0] }
 0x70d   : > { %v9794_v44 = vpack.c.bf16 %v3606_v27, %v3598_v33  ;;  %v3463_v57 = vmul.f32 -1.702, %v9786_v23  ;;  %4605 = vmatpush.bf16.msra.mxu2 %v6476_v9  ;;  %4623 = vmatpush.bf16.msra.mxu3 %v6548_v56  ;;  %v3599_v1 = vmul.f32 %v7699_v58, %v9702_v51  ;;  %v6777_v33 = vld [vmem:[%s8338_s0 + $0x368] sm:$0xf0]  ;;  %v6769_v27 = vld [vmem:[%s8338_s0 + $0x358] sm:$0xf0] }
 0x70e   : > { %4660 = vmatpush.bf16.msrb.mxu1 %v6684_v17  ;;  %4643 = vmatpush.bf16.msrb.mxu0 %v6604_v48  ;;  %v6780_v51 = vor.u32 %v7359_v22, %v6777_v33  ;;  %v6772_v9 = vor.u32 %v7357_v10, %v6769_v27  ;;  %v7375_v48 = vld [vmem:[%s8338_s0 + $0x3e4] sm:$0xf]  ;;  %v6825_v50 = vld [vmem:[%s8338_s0 + $0x3c8] sm:$0xf0]  ;;  %v6737_v22 = vld [vmem:[%s8338_s0 + $0x318] sm:$0xf0] }
 0x70f   : > { %v7701_v18 = vpop.eup %7700  ;;  %v3526_v25 = vmul.f32 1.442695, %v3463_v57  ;;  %4530 = vmatmul.bf16.vlgmr.msrb.gmra.mxu2 %v9794_v44  ;;  %v6844_v11 = vor.u32 %v7375_v48, %v6841_v29  ;;  %v7355_v34 = vld [vmem:[%s8338_s0 + $0x344] sm:$0xf]  ;;  %v6761_v57 = vld [vmem:[%s8338_s0 + $0x348] sm:$0xf0] }
 0x710   : > { %4568 = vmatmul.bf16.vlgmr.msra.gmra.mxu0 %v9462_v12  ;;  %v7703_v45 = vpop.eup %7702  ;;  %v6665_v12 = vld [vmem:[%s8338_s0 + $0x288] sm:$0xf0]  ;;  %v3551_v17 = vadd.f32 1.0, %v7701_v18  ;;  %v7371_v20 = vld [vmem:[%s8338_s0 + $0x3c4] sm:$0xf] }
 0x711   : > { %v7705_v55 = vpop.eup %7704  ;;  %v3607_v46 = vmul.f32 %v7703_v45, %v9729_v30  ;;  %7706 = vpow2.f32 %v3526_v25  ;;  %4674 = vmatpush.bf16.msrb.mxu2 %v6788_v24  ;;  %v6668_v2 = vor.u32 %v7331_v4, %v6665_v12  ;;  %4624 = vmatpush.bf16.msra.mxu3 %v6540_v5  ;;  %v7377_v30 = vld [vmem:[%s8338_s0 + $0x3f4] sm:$0xf]  ;;  %v6753_v45 = vld [vmem:[%s8338_s0 + $0x338] sm:$0xf0]  ;;  %v7351_v5 = vld [vmem:[%s8338_s0 + $0x324] sm:$0xf] }
 0x712   : > { %7708 = vrcp.f32 %v3550_v38  ;;  %v3558_v41 = vadd.f32 1.0, %v7705_v55  ;;  %4661 = vmatpush.bf16.msrb.mxu1 %v6676_v7  ;;  %v6852_v21 = vor.u32 %v7377_v30, %v6849_v49  ;;  %v6764_v38 = vor.u32 %v7355_v34, %v6761_v57  ;;  %v7373_v7 = vld [vmem:[%s8338_s0 + $0x3d4] sm:$0xf]  ;;  %v6745_v4 = vld [vmem:[%s8338_s0 + $0x328] sm:$0xf0] }
 0x713   : > { %v9809_v53 = vpack.c.bf16 %v3607_v46, %v3599_v1  ;;  %v6836_v18 = vor.u32 %v7373_v7, %v6833_v62  ;;  %v7353_v24 = vld [vmem:[%s8338_s0 + $0x334] sm:$0xf]  ;;  %v6828_v46 = vor.u32 %v7371_v20, %v6825_v50  ;;  %v7347_v49 = vld [vmem:[%s8338_s0 + $0x304] sm:$0xf] }
 0x714   : > { %7710 = vrcp.f32 %v3558_v41  ;;  %v7369_v41 = vld [vmem:[%s8338_s0 + $0x3b4] sm:$0xf] }
 0x715   : > { %4549 = vmatmul.bf16.vlgmr.msrb.gmra.mxu3 %v9809_v53  ;;  %4587 = vmatmul.bf16.vlgmr.msra.gmra.mxu1 %v9483_v60  ;;  %7712 = vrcp.f32 %v3551_v17  ;;  %v6809_v17 = vld [vmem:[%s8338_s0 + $0x3a8] sm:$0xf0]  ;;  %v7365_v27 = vld [vmem:[%s8338_s0 + $0x394] sm:$0xf] }
 0x716   : > { %4662 = vmatpush.bf16.msrb.mxu1 %v6668_v2  ;;  %4675 = vmatpush.bf16.msrb.mxu2 %v6780_v51  ;;  %v6817_v2 = vld [vmem:[%s8338_s0 + $0x3b8] sm:$0xf0]  ;;  %v7367_v51 = vld [vmem:[%s8338_s0 + $0x3a4] sm:$0xf] }
 0x717   : > { %v7707_v28 = vpop.eup %7706  ;;  %4693 = vmatpush.bf16.msrb.mxu3 %v6852_v21  ;;  %v6812_v30 = vor.u32 %v7367_v51, %v6809_v17  ;;  %v6729_v21 = vld [vmem:[%s8338_s0 + $0x308] sm:$0xf0] }
 0x718   : > { %v7709_v54 = vpop.eup %7708  ;;  %v3559_v40 = vadd.f32 1.0, %v7707_v28  ;;  %v6732_v10 = vor.u32 %v7347_v49, %v6729_v21 }
 0x719   : > { %v3614_v56 = vmul.f32 %v7709_v54, %v9733_v59  ;;  %v6756_v59 = vor.u32 %v7353_v24, %v6753_v45  ;;  %v6793_v54 = vld [vmem:[%s8338_s0 + $0x388] sm:$0xf0] }
 0x71a   : > { %v7711_v60 = vpop.eup %7710  ;;  %7714 = vrcp.f32 %v3559_v40  ;;  %4676 = vmatpush.bf16.msrb.mxu2 %v6772_v9  ;;  %v6801_v9 = vld [vmem:[%s8338_s0 + $0x398] sm:$0xf0] }
 0x71b   : > { %v3622_v58 = vmul.f32 %v7711_v60, %v9764_v31  ;;  %4694 = vmatpush.bf16.msrb.mxu3 %v6844_v11  ;;  %v7713_v25 = vpop.eup %7712  ;;  %v6804_v28 = vor.u32 %v7365_v27, %v6801_v9 }
 0x71c   : > { %v3615_v55 = vmul.f32 %v7713_v25, %v9758_v32  ;;  %v6820_v32 = vor.u32 %v7369_v41, %v6817_v2 }
 0x71d   : > { %v3638_v19 = vpack.c.bf16 %v3622_v58, %v3614_v56 }
 0x71e   : > { %4677 = vmatpush.bf16.msrb.mxu2 %v6764_v38 }
 0x71f   : > { %4535 = vmatmul.bf16.gmra.mxu2 %v3638_v19  ;;  %4695 = vmatpush.bf16.msrb.mxu3 %v6836_v18 }
 0x720   : > { %4573 = vmatmul.bf16.gmra.mxu0 %v9514_v3  ;;  %v7715_v31 = vpop.eup %7714  ;;  %v6748_v3 = vor.u32 %v7351_v5, %v6745_v4 }
 0x721   : > { %v3623_v1 = vmul.f32 %v7715_v31, %v9786_v23  ;;  %v7349_v23 = vld [vmem:[%s8338_s0 + $0x314] sm:$0xf] }
 0x722   : > { %4678 = vmatpush.bf16.msrb.mxu2 %v6756_v59  ;;  %v6740_v33 = vor.u32 %v7349_v23, %v6737_v22 }
 0x723   : > { %v3639_v12 = vpack.c.bf16 %v3623_v1, %v3615_v55  ;;  %4696 = vmatpush.bf16.msrb.mxu3 %v6828_v46 }
 0x725   : > { %4554 = vmatmul.bf16.gmra.mxu3 %v3639_v12  ;;  %4592 = vmatmul.bf16.gmra.mxu1 %v9530_v63  ;;  %v7363_v63 = vld [vmem:[%s8338_s0 + $0x384] sm:$0xf] }
 0x726   : > { %4679 = vmatpush.bf16.msrb.mxu2 %v6748_v3  ;;  %v6796_v40 = vor.u32 %v7363_v63, %v6793_v54 }
 0x727   : > { %4697 = vmatpush.bf16.msrb.mxu3 %v6820_v32 }
 0x72a   : > { %4680 = vmatpush.bf16.msrb.mxu2 %v6740_v33 }
 0x72b   : > { %4698 = vmatpush.bf16.msrb.mxu3 %v6812_v30 }
 0x72e   : > { %4681 = vmatpush.bf16.msrb.mxu2 %v6732_v10 }
 0x72f   : > { %4606 = vmatmul.bf16.vlgmr.msra.gmra.mxu2 %v9562_v43  ;;  %4699 = vmatpush.bf16.msrb.mxu3 %v6804_v28  ;;  %v4417_v43 = vpop.f32.mrf.mxu0 }
 0x730   : > { %4644 = vmatmul.bf16.vlgmr.msrb.gmra.mxu0 %v9678_v36 }
 0x731   : > { %v4436_v36 = vpop.f32.mrf.mxu1 }
 0x732   : > { %v4437_v7 = vadd.f32 %v4436_v36, %v4417_v43 }
 0x733   : > { %4700 = vmatpush.bf16.msrb.mxu3 %v6796_v40 }
 0x735   : > { %4625 = vmatmul.bf16.vlgmr.msra.gmra.mxu3 %v9578_v42  ;;  %4663 = vmatmul.bf16.vlgmr.msrb.gmra.mxu1 %v9700_v61 }
 0x737   : > { %v4419_v48 = vpop.f32.mrf.mxu0 }
 0x739   : > { %v4438_v29 = vpop.f32.mrf.mxu1 }
 0x73a   : > { %v4439_v31 = vadd.f32 %v4438_v29, %v4419_v48 }
 0x73f   : > { %4611 = vmatmul.bf16.gmra.mxu2 %v9617_v8  ;;  %v4422_v42 = vpop.f32.mrf.mxu0 }
 0x740   : > { %4649 = vmatmul.bf16.gmra.mxu0 %v9739_v15 }
 0x742   : > { %v4441_v61 = vpop.f32.mrf.mxu1 }
 0x743   : > { %v4442_v22 = vadd.f32 %v4441_v61, %v4422_v42 }
 0x745   : > { %4630 = vmatmul.bf16.gmra.mxu3 %v9639_v52  ;;  %4668 = vmatmul.bf16.gmra.mxu1 %v9760_v13 }
 0x747   : > { %v4424_v8 = vpop.f32.mrf.mxu0 }
 0x74a   : > { %v4443_v15 = vpop.f32.mrf.mxu1 }
 0x74b   : > { %v4444_v54 = vadd.f32 %v4443_v15, %v4424_v8 }
 0x74f   : > { %4682 = vmatmul.bf16.vlgmr.msrb.gmra.mxu2 %v9794_v44 }
 0x753   : > { %v4455_v11 = vpop.f32.mrf.mxu2 }
 0x755   : > { %4701 = vmatmul.bf16.vlgmr.msrb.gmra.mxu3 %v9809_v53 }
 0x758   : > { %v4474_v60 = vpop.f32.mrf.mxu3 }
 0x75b   : > { %v4457_v34 = vpop.f32.mrf.mxu2 }
 0x75c   : > { %v4458_v50 = vadd.f32 %v4457_v34, %v4439_v31 }
 0x75f   : > { %4687 = vmatmul.bf16.gmra.mxu2 %v3638_v19  ;;  %v4456_v19 = vadd.f32 %v4455_v11, %v4437_v7 }
 0x760   : > { %v4476_v57 = vpop.f32.mrf.mxu3 }
 0x761   : > { %v4475_v25 = vadd.f32 %v4474_v60, %v4456_v19  ;;  %v4477_v5 = vadd.f32 %v4476_v57, %v4458_v50 }
 0x763   : > { %v4460_v56 = vpop.f32.mrf.mxu2 }
 0x764   : > { %v4461_v17 = vadd.f32 %v4460_v56, %v4442_v22 }
 0x765   : > { %4706 = vmatmul.bf16.gmra.mxu3 %v3639_v12  ;;  %v7732_v12 = vld [vmem:[%s8340_s16] sm:$0xff] }
 0x766   : > { %v4720_v3 = vperm.slane %v7732_v12, 5 }
 0x768   : > { %v4479_v58 = vpop.f32.mrf.mxu3 }
 0x769   : > { %v4480_v21 = vadd.f32 %v4479_v58, %v4461_v17 }
 0x76b   : > { %v4462_v53 = vpop.f32.mrf.mxu2 }
 0x76d   : > { %v4493_v52 = vpop.f32.mrf.mxu0 }
 0x76e   : > { %v4494_v59 = vadd.f32 %v4493_v52, %v4475_v25 }
 0x770   : > { %v4481_v18 = vpop.f32.mrf.mxu3 }
 0x772   : > { %v4512_v13 = vpop.f32.mrf.mxu1 }
 0x773   : > { %v4513_v20 = vadd.f32 %v4512_v13, %v4494_v59 }
 0x775   : > { %v4495_v44 = vpop.f32.mrf.mxu0 }
 0x776   : > { %v4496_v2 = vadd.f32 %v4495_v44, %v4477_v5 }
 0x77a   : > { %v4514_v38 = vpop.f32.mrf.mxu1 }
 0x77b   : > { %v4515_v33 = vadd.f32 %v4514_v38, %v4496_v2 }
 0x77d   : > { %v4498_v62 = vpop.f32.mrf.mxu0 }
 0x77e   : > { %v4499_v28 = vadd.f32 %v4498_v62, %v4480_v21 }
 0x782   : > { %v4517_v24 = vpop.f32.mrf.mxu1 }
 0x783   : > { %v4518_v40 = vadd.f32 %v4517_v24, %v4499_v28 }
 0x785   : > { %v4500_v1 = vpop.f32.mrf.mxu0 }
 0x78a   : > { %v4519_v23 = vpop.f32.mrf.mxu1 }
 0x78d   : > { %v4569_v27 = vpop.f32.mrf.mxu0 }
 0x792   : > { %v4531_v45 = vpop.f32.mrf.mxu2  ;;  %v4588_v36 = vpop.f32.mrf.mxu1 }
 0x793   : > { %v4532_v55 = vadd.f32 %v4531_v45, %v4513_v20  ;;  %v4589_v59 = vadd.f32 %v4588_v36, %v4569_v27 }
 0x795   : > { %v4571_v52 = vpop.f32.mrf.mxu0 }
 0x798   : > { %v4550_v46 = vpop.f32.mrf.mxu3 }
 0x799   : > { %v4551_v4 = vadd.f32 %v4550_v46, %v4532_v55 }
 0x79a   : > { %v4533_v41 = vpop.f32.mrf.mxu2 }
 0x79b   : > { %v4712_v32 = vadd.f32 %v4551_v4, %v8897_v39  ;;  %v4534_v30 = vadd.f32 %v4533_v41, %v4515_v33  ;;  %v4463_v39 = vadd.f32 %v4462_v53, %v4444_v54 }
 0x79d   : > { %v4722_v51 = vadd.f32 %v4720_v3, %v4712_v32  ;;  %v4482_v42 = vadd.f32 %v4481_v18, %v4463_v39  ;;  %v4574_v53 = vpop.f32.mrf.mxu0 }
 0x79f   : > { %4730 = vst [vmem:[#allocation2] sm:$0xff] %v4722_v51  ;;  %v4501_v60 = vadd.f32 %v4500_v1, %v4482_v42 }
 0x7a0   : > { %v4552_v49 = vpop.f32.mrf.mxu3 }
 0x7a1   : > { %v4553_v10 = vadd.f32 %v4552_v49, %v4534_v30  ;;  %v4520_v57 = vadd.f32 %v4519_v23, %v4501_v60  ;;  %v7733_v30 = vld [vmem:[%s8340_s16 + $0x8] sm:$0xff] }
 0x7a2   : > { %v4536_v9 = vpop.f32.mrf.mxu2  ;;  %v4721_v49 = vperm.slane %v7733_v30, 5 }
 0x7a3   : > { %v4714_v63 = vadd.f32 %v4553_v10, %v8903_v14  ;;  %v4537_v48 = vadd.f32 %v4536_v9, %v4518_v40  ;;  %v4590_v14 = vpop.f32.mrf.mxu1 }
 0x7a5   : > { %v4724_v43 = vadd.f32 %v4720_v3, %v4714_v63  ;;  %v4576_v18 = vpop.f32.mrf.mxu0 }
 0x7a7   : > { %4732 = vst [vmem:[#allocation2 + $0x10] sm:$0xff] %v4724_v43 }
 0x7a8   : > { %v4555_v29 = vpop.f32.mrf.mxu3 }
 0x7a9   : > { %v4556_v61 = vadd.f32 %v4555_v29, %v4537_v48 }
 0x7aa   : > { %v4538_v11 = vpop.f32.mrf.mxu2 }
 0x7ab   : > { %v4716_v34 = vadd.f32 %v4556_v61, %v8909_v0  ;;  %v4539_v56 = vadd.f32 %v4538_v11, %v4520_v57  ;;  %v4593_v62 = vpop.f32.mrf.mxu1 }
 0x7ac   : > { %v4594_v33 = vadd.f32 %v4593_v62, %v4574_v53 }
 0x7ad   : > { %v4726_v13 = vadd.f32 %v4720_v3, %v4716_v34  ;;  %v4645_v31 = vpop.f32.mrf.mxu0 }
 0x7af   : > { %4734 = vst [vmem:[#allocation2 + $0x20] sm:$0xff] %v4726_v13 }
 0x7b0   : > { %v4557_v8 = vpop.f32.mrf.mxu3 }
 0x7b1   : > { %v4558_v15 = vadd.f32 %v4557_v8, %v4539_v56 }
 0x7b2   : > { %v4607_v44 = vpop.f32.mrf.mxu2 }
 0x7b3   : > { %v4718_v58 = vadd.f32 %v4558_v15, %v8915_v37  ;;  %v4595_v24 = vpop.f32.mrf.mxu1  ;;  %v4608_v50 = vadd.f32 %v4607_v44, %v4589_v59  ;;  %v4591_v37 = vadd.f32 %v4590_v14, %v4571_v52 }
 0x7b4   : > { %v4596_v36 = vadd.f32 %v4595_v24, %v4576_v18 }
 0x7b5   : > { %v4728_v38 = vadd.f32 %v4720_v3, %v4718_v58  ;;  %v4647_v3 = vpop.f32.mrf.mxu0 }
 0x7b7   : > { %4736 = vst [vmem:[#allocation2 + $0x30] sm:$0xff] %v4728_v38 }
 0x7b8   : > { %v4626_v7 = vpop.f32.mrf.mxu3 }
 0x7b9   : > { %v4627_v55 = vadd.f32 %v4626_v7, %v4608_v50 }
 0x7ba   : > { %v4609_v19 = vpop.f32.mrf.mxu2 }
 0x7bb   : > { %v4664_v1 = vpop.f32.mrf.mxu1  ;;  %v4646_v5 = vadd.f32 %v4645_v31, %v4627_v55  ;;  %v4610_v12 = vadd.f32 %v4609_v19, %v4591_v37 }
 0x7bd   : > { %v4665_v2 = vadd.f32 %v4664_v1, %v4646_v5  ;;  %v4650_v54 = vpop.f32.mrf.mxu0 }
 0x7c0   : > { %v4628_v25 = vpop.f32.mrf.mxu3 }
 0x7c1   : > { %v4629_v41 = vadd.f32 %v4628_v25, %v4610_v12 }
 0x7c2   : > { %v4612_v0 = vpop.f32.mrf.mxu2 }
 0x7c3   : > { %v4666_v23 = vpop.f32.mrf.mxu1  ;;  %v4648_v51 = vadd.f32 %v4647_v3, %v4629_v41  ;;  %v4613_v10 = vadd.f32 %v4612_v0, %v4594_v33 }
 0x7c5   : > { %v4667_v63 = vadd.f32 %v4666_v23, %v4648_v51  ;;  %v4652_v57 = vpop.f32.mrf.mxu0 }
 0x7c8   : > { %v4631_v45 = vpop.f32.mrf.mxu3 }
 0x7c9   : > { %v4632_v9 = vadd.f32 %v4631_v45, %v4613_v10 }
 0x7ca   : > { %v4614_v20 = vpop.f32.mrf.mxu2 }
 0x7cb   : > { %v4651_v39 = vadd.f32 %v4650_v54, %v4632_v9  ;;  %v4669_v29 = vpop.f32.mrf.mxu1  ;;  %v4615_v61 = vadd.f32 %v4614_v20, %v4596_v36 }
 0x7cd   : > { %v4670_v52 = vadd.f32 %v4669_v29, %v4651_v39 }
 0x7d0   : > { %v4633_v46 = vpop.f32.mrf.mxu3 }
 0x7d1   : > { %v4634_v60 = vadd.f32 %v4633_v46, %v4615_v61 }
 0x7d2   : > { %v4683_v4 = vpop.f32.mrf.mxu2 }
 0x7d3   : > { %v4684_v32 = vadd.f32 %v4683_v4, %v4665_v2  ;;  %v4653_v56 = vadd.f32 %v4652_v57, %v4634_v60  ;;  %v4671_v15 = vpop.f32.mrf.mxu1 }
 0x7d5   : > { %v4672_v38 = vadd.f32 %v4671_v15, %v4653_v56 }
 0x7d8   : > { %v4702_v22 = vpop.f32.mrf.mxu3 }
 0x7d9   : > { %v4703_v17 = vadd.f32 %v4702_v22, %v4684_v32 }
 0x7da   : > { %v4685_v21 = vpop.f32.mrf.mxu2 }
 0x7db   : > { %v4713_v27 = vadd.f32 %v4703_v17, %v8899_v6  ;;  %v4686_v40 = vadd.f32 %v4685_v21, %v4667_v63 }
 0x7dd   : > { %v4723_v28 = vadd.f32 %v4721_v49, %v4713_v27 }
 0x7df   : > { %4731 = vst [vmem:[#allocation2 + $0x8] sm:$0xff] %v4723_v28 }
 0x7e0   : > { %v4704_v43 = vpop.f32.mrf.mxu3 }
 0x7e1   : > { %v4705_v48 = vadd.f32 %v4704_v43, %v4686_v40 }
 0x7e2   : > { %v4688_v42 = vpop.f32.mrf.mxu2 }
 0x7e3   : > { %v4715_v11 = vadd.f32 %v4705_v48, %v8905_v16  ;;  %v4689_v6 = vadd.f32 %v4688_v42, %v4670_v52 }
 0x7e5   : > { %v4725_v34 = vadd.f32 %v4721_v49, %v4715_v11 }
 0x7e7   : > { %4733 = vst [vmem:[#allocation2 + $0x18] sm:$0xff] %v4725_v34 }
 0x7e8   : > { %v4707_v13 = vpop.f32.mrf.mxu3 }
 0x7e9   : > { %v4708_v14 = vadd.f32 %v4707_v13, %v4689_v6 }
 0x7ea   : > { %v4690_v44 = vpop.f32.mrf.mxu2 }
 0x7eb   : > { %v4717_v8 = vadd.f32 %v4708_v14, %v8911_v35  ;;  %v4691_v53 = vadd.f32 %v4690_v44, %v4672_v38 }
 0x7ed   : > { %v4727_v58 = vadd.f32 %v4721_v49, %v4717_v8 }
 0x7ef   : > { %4735 = vst [vmem:[#allocation2 + $0x28] sm:$0xff] %v4727_v58 }
 0x7f0   : > { %v4709_v7 = vpop.f32.mrf.mxu3 }
 0x7f1   : > { %v4710_v62 = vadd.f32 %v4709_v7, %v4691_v53 }
 0x7f3   : > { %v4719_v16 = vadd.f32 %v4710_v62, %v8917_v47  ;;  %4741 = sbr.rel (%p6853_p2) target bundleno = 2605 (0xa2d), region = 100 }
 0x7f5   : > { %v4729_v19 = vadd.f32 %v4721_v49, %v4719_v16 }
 0x7f7   : > { %4737 = vst [vmem:[#allocation2 + $0x38] sm:$0xff] %v4729_v19 }
 0x7f8   : > { %vm4775_vm10 = vcmask 1040384   ;;  %vm4780_vm11 = vcmask 1041408   ;;  %v6917_v55 = vld [vmem:[#allocation15 + $0x70] sm:$0xf]  ;;  %v7395_v1 = vld [vmem:[#allocation15 + $0x74] sm:$0xf0] }
 0x7f9   : > { %v6981_v46 = vld [vmem:[#allocation15 + $0xf0] sm:$0xf]  ;;  %v6918_v37 = vor.u32 %v7395_v1, %v6917_v55  ;;  %v7411_v5 = vld [vmem:[#allocation15 + $0xf4] sm:$0xf0]  ;;  %v7394_v4 = vld [vmem:[#allocation15 + $0x74] sm:$0xf] }
 0x7fa   : > { %v6919_v12 = vld [vmem:[#allocation15 + $0x78] sm:$0xf0]  ;;  %v6982_v3 = vor.u32 %v7411_v5, %v6981_v46  ;;  %v7410_v2 = vld [vmem:[#allocation15 + $0xf4] sm:$0xf]  ;;  %v6909_v9 = vld [vmem:[#allocation15 + $0x60] sm:$0xf] }
 0x7fb   : > { %v6922_v41 = vor.u32 %v7394_v4, %v6919_v12  ;;  %v6983_v32 = vld [vmem:[#allocation15 + $0xf8] sm:$0xf0]  ;;  %5018 = vmatpush.bf16.msra.mxu0 %v6918_v37  ;;  %v7393_v28 = vld [vmem:[#allocation15 + $0x64] sm:$0xf0]  ;;  %v6973_v63 = vld [vmem:[#allocation15 + $0xe0] sm:$0xf] }
 0x7fc   : > { %v6986_v23 = vor.u32 %v7410_v2, %v6983_v32  ;;  %5031 = vmatpush.bf16.msra.mxu1 %v6982_v3  ;;  %v6910_v54 = vor.u32 %v7393_v28, %v6909_v9  ;;  %v7409_v40 = vld [vmem:[#allocation15 + $0xe4] sm:$0xf0]  ;;  %v7392_v43 = vld [vmem:[#allocation15 + $0x64] sm:$0xf]  ;;  %v6911_v36 = vld [vmem:[#allocation15 + $0x68] sm:$0xf0] }
 0x7fd   : > { %5044 = vmatpush.bf16.msra.mxu2 %v6922_v41  ;;  %v6974_v39 = vor.u32 %v7409_v40, %v6973_v63  ;;  %v6914_v48 = vor.u32 %v7392_v43, %v6911_v36  ;;  %v7408_v29 = vld [vmem:[#allocation15 + $0xe4] sm:$0xf]  ;;  %v6975_v42 = vld [vmem:[#allocation15 + $0xe8] sm:$0xf0]  ;;  %v6901_v11 = vld [vmem:[#allocation15 + $0x50] sm:$0xf] }
 0x7fe   : > { %v4752_v35 = vld [vmem:[%s4751_s8] ss:$8 sm:$0x3]  ;;  %5057 = vmatpush.bf16.msra.mxu3 %v6986_v23  ;;  %v6978_v61 = vor.u32 %v7408_v29, %v6975_v42  ;;  %v7390_v57 = vld [vmem:[#allocation15 + $0x54] sm:$0xf] }
 0x7ff   : > { %v4766_v18 = vperm.slane %v4752_v35, 0  ;;  %v4767_v25 = vperm.slane %v4752_v35, 1  ;;  %v6858_v47 = vld [vmem:[%s5189_s24 + $0x20] ss:$8 sm:$0x3]  ;;  %5019 = vmatpush.bf16.msra.mxu0 %v6910_v54 }
 0x800   : > { %v4771_v0 = vperm.slane %v6858_v47, 0  ;;  %v4772_v24 = vperm.slane %v6858_v47, 1  ;;  %5032 = vmatpush.bf16.msra.mxu1 %v6974_v39  ;;  %v7391_v60 = vld [vmem:[#allocation15 + $0x54] sm:$0xf0]  ;;  %v6965_v34 = vld [vmem:[#allocation15 + $0xd0] sm:$0xf] }
 0x801   : > { %5045 = vmatpush.bf16.msra.mxu2 %v6914_v48  ;;  %v6902_v52 = vor.u32 %v7391_v60, %v6901_v11  ;;  %v7407_v6 = vld [vmem:[#allocation15 + $0xd4] sm:$0xf0]  ;;  %v6903_v13 = vld [vmem:[#allocation15 + $0x58] sm:$0xf0]  ;;  %v7406_v8 = vld [vmem:[#allocation15 + $0xd4] sm:$0xf] }
 0x802   : > { %v4776_v45 = vsel %vm4775_vm10, %v4766_v18, %v4771_v0  ;;  %v4777_v59 = vsel %vm4775_vm10, %v4767_v25, %v4772_v24  ;;  %5058 = vmatpush.bf16.msra.mxu3 %v6978_v61  ;;  %v6966_v56 = vor.u32 %v7407_v6, %v6965_v34  ;;  %v6906_v14 = vor.u32 %v7390_v57, %v6903_v13  ;;  %v6967_v15 = vld [vmem:[#allocation15 + $0xd8] sm:$0xf0]  ;;  %v6893_v58 = vld [vmem:[#allocation15 + $0x40] sm:$0xf]  ;;  %v7389_v38 = vld [vmem:[#allocation15 + $0x44] sm:$0xf0] }
 0x803   : > { %v4781_v31 = vsel %vm4780_vm11, %v4776_v45, 0.0  ;;  %v4782_v20 = vsel %vm4780_vm11, %v4777_v59, 0.0  ;;  %5020 = vmatpush.bf16.msra.mxu0 %v6902_v52  ;;  %v6970_v44 = vor.u32 %v7406_v8, %v6967_v15  ;;  %v6957_v53 = vld [vmem:[#allocation15 + $0xc0] sm:$0xf]  ;;  %v6894_v7 = vor.u32 %v7389_v38, %v6893_v58  ;;  %v7405_v62 = vld [vmem:[#allocation15 + $0xc4] sm:$0xf0] }
 0x804   : > { %v4783_v50 = vadd.f32 %v4782_v20, %v4781_v31  ;;  %5033 = vmatpush.bf16.msra.mxu1 %v6966_v56  ;;  %v7388_v16 = vld [vmem:[#allocation15 + $0x44] sm:$0xf]  ;;  %v6895_v19 = vld [vmem:[#allocation15 + $0x48] sm:$0xf0]  ;;  %v6958_v35 = vor.u32 %v7405_v62, %v6957_v53  ;;  %v6885_v24 = vld [vmem:[#allocation15 + $0x30] sm:$0xf] }
 0x805   : > { %5046 = vmatpush.bf16.msra.mxu2 %v6906_v14  ;;  %v6898_v18 = vor.u32 %v7388_v16, %v6895_v19  ;;  %v7404_v25 = vld [vmem:[#allocation15 + $0xc4] sm:$0xf]  ;;  %v6959_v47 = vld [vmem:[#allocation15 + $0xc8] sm:$0xf0]  ;;  %v7403_v20 = vld [vmem:[#allocation15 + $0xb4] sm:$0xf0] }
 0x806   : > { %4784 = vadd.xlane.f32.xlu0 %v4783_v50  ;;  %5059 = vmatpush.bf16.msra.mxu3 %v6970_v44  ;;  %v6962_v0 = vor.u32 %v7404_v25, %v6959_v47  ;;  %v7386_v50 = vld [vmem:[#allocation15 + $0x34] sm:$0xf]  ;;  %v6887_v55 = vld [vmem:[#allocation15 + $0x38] sm:$0xf0]  ;;  %v6877_v12 = vld [vmem:[#allocation15 + $0x20] sm:$0xf] }
 0x807   : > { %5021 = vmatpush.bf16.msra.mxu0 %v6894_v7  ;;  %v6890_v46 = vor.u32 %v7386_v50, %v6887_v55  ;;  %v7402_v37 = vld [vmem:[#allocation15 + $0xb4] sm:$0xf]  ;;  %v6951_v5 = vld [vmem:[#allocation15 + $0xb8] sm:$0xf0]  ;;  %v7385_v3 = vld [vmem:[#allocation15 + $0x24] sm:$0xf0] }
 0x808   : > { %5034 = vmatpush.bf16.msra.mxu1 %v6958_v35  ;;  %v6954_v4 = vor.u32 %v7402_v37, %v6951_v5  ;;  %v6941_v41 = vld [vmem:[#allocation15 + $0xa0] sm:$0xf]  ;;  %v6878_v2 = vor.u32 %v7385_v3, %v6877_v12  ;;  %v7401_v32 = vld [vmem:[#allocation15 + $0xa4] sm:$0xf0]  ;;  %v7384_v23 = vld [vmem:[#allocation15 + $0x24] sm:$0xf] }
 0x809   : > { %5047 = vmatpush.bf16.msra.mxu2 %v6898_v18  ;;  %v7383_v9 = vld [vmem:[#allocation15 + $0x14] sm:$0xf0]  ;;  %v6933_v28 = vld [vmem:[#allocation15 + $0x90] sm:$0xf]  ;;  %v7382_v40 = vld [vmem:[#allocation15 + $0x14] sm:$0xf] }
 0x80a   : > { %5060 = vmatpush.bf16.msra.mxu3 %v6962_v0  ;;  %v7399_v54 = vld [vmem:[#allocation15 + $0x94] sm:$0xf0]  ;;  %v6871_v43 = vld [vmem:[#allocation15 + $0x18] sm:$0xf0]  ;;  %v7398_v48 = vld [vmem:[#allocation15 + $0x94] sm:$0xf] }
 0x80b   : > { %v6934_v36 = vor.u32 %v7399_v54, %v6933_v28  ;;  %v6874_v39 = vor.u32 %v7382_v40, %v6871_v43  ;;  %v6935_v29 = vld [vmem:[#allocation15 + $0x98] sm:$0xf0]  ;;  %v6861_v42 = vld [vmem:[#allocation15] sm:$0xf]  ;;  %v7381_v11 = vld [vmem:[#allocation15 + $0x4] sm:$0xf0] }
 0x80c   : > { %v6938_v61 = vor.u32 %v7398_v48, %v6935_v29  ;;  %v6925_v60 = vld [vmem:[#allocation15 + $0x80] sm:$0xf]  ;;  %v7397_v34 = vld [vmem:[#allocation15 + $0x84] sm:$0xf0]  ;;  %v6862_v52 = vor.u32 %v7381_v11, %v6861_v42  ;;  %v7380_v6 = vld [vmem:[#allocation15 + $0x4] sm:$0xf] }
 0x80d   : > { %5048 = vmatpush.bf16.msra.mxu2 %v6890_v46  ;;  %v6863_v57 = vld [vmem:[#allocation15 + $0x8] sm:$0xf0]  ;;  %v7396_v13 = vld [vmem:[#allocation15 + $0x84] sm:$0xf]  ;;  %v6926_v56 = vor.u32 %v7397_v34, %v6925_v60  ;;  %v4778_v35 = vld [vmem:[%s9956_s30] sm:$0x3] }
 0x80e   : > { %5061 = vmatpush.bf16.msra.mxu3 %v6954_v4  ;;  %v6866_v14 = vor.u32 %v7380_v6, %v6863_v57  ;;  %v6927_v8 = vld [vmem:[#allocation15 + $0x88] sm:$0xf0]  ;;  %v4779_v25 = vld [vmem:[%s9957_s13] sm:$0x3]  ;;  %v4812_v47 = vperm.slane %v4778_v35, 1 }
 0x80f   : > { %v6930_v15 = vor.u32 %v7396_v13, %v6927_v8 }
 0x879   : > { %v4785_v22 = vpop.xlane.xlu0 %4784 }
 0x87a   : > { %v4786_v33 = vmul.f32 %v4785_v22, %v8347_v26  ;;  %v6879_v22 = vld [vmem:[#allocation15 + $0x28] sm:$0xf0] }
 0x87c   : > { %v9871_v51 = vsub.f32 %v4776_v45, %v4786_v33  ;;  %v9873_v17 = vsub.f32 %v4777_v59, %v4786_v33  ;;  %v7387_v45 = vld [vmem:[#allocation15 + $0x34] sm:$0xf0]  ;;  %v6949_v59 = vld [vmem:[#allocation15 + $0xb0] sm:$0xf]  ;;  %v6942_v33 = vor.u32 %v7401_v32, %v6941_v41 }
 0x87d   : > { %v6886_v31 = vor.u32 %v7387_v45, %v6885_v24  ;;  %v6950_v1 = vor.u32 %v7403_v20, %v6949_v59  ;;  %v4818_v45 = vperm.slane %v4779_v25, 0 }
 0x87e   : > { %v4789_v30 = vmul.f32 %v9871_v51, %v9871_v51  ;;  %v4790_v49 = vmul.f32 %v9873_v17, %v9873_v17 }
 0x87f   : > { %5022 = vmatpush.bf16.msra.mxu0 %v6886_v31  ;;  %5035 = vmatpush.bf16.msra.mxu1 %v6950_v1  ;;  %v4819_v31 = vperm.slane %v4779_v25, 1 }
 0x880   : > { %v4791_v21 = vsel %vm4780_vm11, %v4789_v30, 0.0  ;;  %v4792_v10 = vsel %vm4780_vm11, %v4790_v49, 0.0  ;;  %v6882_v30 = vor.u32 %v7384_v23, %v6879_v22  ;;  %v7400_v49 = vld [vmem:[#allocation15 + $0xa4] sm:$0xf] }
 0x881   : > { %v4793_v27 = vadd.f32 %v4792_v10, %v4791_v21  ;;  %v6943_v21 = vld [vmem:[#allocation15 + $0xa8] sm:$0xf0] }
 0x882   : > { %v6946_v10 = vor.u32 %v7400_v49, %v6943_v21  ;;  %5049 = vmatpush.bf16.msra.mxu2 %v6882_v30 }
 0x883   : > { %4794 = vadd.xlane.f32.xlu0 %v4793_v27  ;;  %5023 = vmatpush.bf16.msra.mxu0 %v6878_v2  ;;  %v6869_v27 = vld [vmem:[#allocation15 + $0x10] sm:$0xf] }
 0x884   : > { %5036 = vmatpush.bf16.msra.mxu1 %v6942_v33  ;;  %v6870_v63 = vor.u32 %v7383_v9, %v6869_v27  ;;  %5062 = vmatpush.bf16.msra.mxu3 %v6946_v10 }
 0x886   : > { %5050 = vmatpush.bf16.msra.mxu2 %v6874_v39 }
 0x887   : > { %5024 = vmatpush.bf16.msra.mxu0 %v6870_v63 }
 0x888   : > { %5037 = vmatpush.bf16.msra.mxu1 %v6934_v36  ;;  %5063 = vmatpush.bf16.msra.mxu3 %v6938_v61 }
 0x88a   : > { %5051 = vmatpush.bf16.msra.mxu2 %v6866_v14 }
 0x88b   : > { %5025 = vmatpush.bf16.msra.mxu0 %v6862_v52 }
 0x88c   : > { %5038 = vmatpush.bf16.msra.mxu1 %v6926_v56  ;;  %5064 = vmatpush.bf16.msra.mxu3 %v6930_v15 }
 0x8f6   : > { %v4795_v44 = vpop.xlane.xlu0 %4794 }
 0x8f7   : > { %v4796_v58 = vmul.f32 %v4795_v44, %v8347_v26  ;;  %v4811_v26 = vperm.slane %v4778_v35, 0 }
 0x8f9   : > { %v4797_v38 = vadd.f32 1e-05, %v4796_v58 }
 0x8fb   : > { %7734 = vrsqrt.f32 %v4797_v38  ;;  %vm4804_vm13 = vweird.f32 %v4797_v38 }
 0x901   : > { %v7735_v53 = vpop.eup %7734 }
 0x902   : > { %v4799_v7 = vmul.f32 %v7735_v53, %v4797_v38  ;;  %vm4805_vm12 = vweird.f32 %v7735_v53 }
 0x903   : > { %vm4806_vm14 = vmor %vm4804_vm13, %vm4805_vm12 }
 0x904   : > { %v4800_v62 = vmul.f32 %v7735_v53, %v4799_v7 }
 0x906   : > { %v4801_v16 = vmul.f32 0.5, %v4800_v62 }
 0x908   : > { %v4802_v19 = vsub.f32 1.5, %v4801_v16 }
 0x90a   : > { %v4803_v18 = vmul.f32 %v7735_v53, %v4802_v19 }
 0x90c   : > { %v4807_v0 = vsel %vm4806_vm14, %v7735_v53, %v4803_v18 }
 0x90d   : > { %v4808_v24 = vmul.f32 %v4807_v0, %v9871_v51  ;;  %v4809_v59 = vmul.f32 %v4807_v0, %v9873_v17 }
 0x90f   : > { %v4815_v20 = vmul.f32 %v4811_v26, %v4808_v24  ;;  %v4816_v50 = vmul.f32 %v4812_v47, %v4809_v59 }
 0x911   : > { %v4822_v55 = vadd.f32 %v4818_v45, %v4815_v20  ;;  %v4823_v1 = vadd.f32 %v4819_v31, %v4816_v50 }
 0x913   : > { %v4824_v46 = vpack.c.bf16 %v4822_v55, %v4822_v55  ;;  %v4825_v37 = vpack.c.bf16 %v4823_v1, %v4823_v1 }
 0x915   : > { %5026 = vmatmul.bf16.vlgmr.msra.gmra.mxu0 %v4824_v46  ;;  %5039 = vmatmul.bf16.vlgmr.msra.gmra.mxu1 %v4825_v37 }
 0x916   : > { %5052 = vmatmul.bf16.vlgmr.msra.gmra.mxu2 %v4824_v46  ;;  %5065 = vmatmul.bf16.vlgmr.msra.gmra.mxu3 %v4825_v37 }
 0x992   : > { %v5027_v5 = vpop.f32.mrf.mxu0  ;;  %v5040_v4 = vpop.f32.mrf.mxu1 }
 0x993   : > { %v5041_v12 = vadd.f32 %v5040_v4, %v5027_v5 }
 0x995   : > { %v5070_v51 = vmul.f32 %v5041_v12, %v5041_v12 }
 0x997   : > { %v5072_v22 = vsel %vm4780_vm11, %v5070_v51, 0.0 }
 0x999   : > { %v5053_v3 = vpop.f32.mrf.mxu2  ;;  %v5066_v41 = vpop.f32.mrf.mxu3 }
 0x99a   : > { %v5067_v2 = vadd.f32 %v5066_v41, %v5053_v3  ;;  %v5029_v32 = vpop.f32.mrf.mxu0  ;;  %v5042_v17 = vpop.f32.mrf.mxu1 }
 0x99c   : > { %v5071_v23 = vmul.f32 %v5067_v2, %v5067_v2 }
 0x99e   : > { %v5073_v33 = vsel %vm4780_vm11, %v5071_v23, 0.0 }
 0x99f   : > { %v5074_v30 = vadd.f32 %v5073_v33, %v5072_v22 }
 0x9a1   : > { %v5055_v49 = vpop.f32.mrf.mxu2  ;;  %v5068_v21 = vpop.f32.mrf.mxu3  ;;  %5075 = vadd.xlane.f32.xlu1 %v5074_v30 }
 0xa14   : > { %v5076_v10 = vpop.xlane.xlu1 %5075 }
 0xa15   : > { %7736 = vrsqrt.f32 %v5076_v10  ;;  %vm5083_vm0 = vweird.f32 %v5076_v10 }
 0xa1b   : > { %v7737_v27 = vpop.eup %7736 }
 0xa1c   : > { %v5078_v9 = vmul.f32 %v7737_v27, %v5076_v10  ;;  %vm5084_vm15 = vweird.f32 %v7737_v27 }
 0xa1d   : > { %vm5085_vm1 = vmor %vm5083_vm0, %vm5084_vm15 }
 0xa1e   : > { %v5079_v28 = vmul.f32 %v7737_v27, %v5078_v9 }
 0xa20   : > { %v5080_v63 = vmul.f32 0.5, %v5079_v28 }
 0xa22   : > { %v5081_v54 = vsub.f32 1.5, %v5080_v63 }
 0xa24   : > { %v5082_v40 = vmul.f32 %v7737_v27, %v5081_v54 }
 0xa26   : > { %v5086_v43 = vsel %vm5085_vm1, %v7737_v27, %v5082_v40 }
 0xa27   : > { %v5088_v36 = vmul.f32 %v5086_v43, %v5067_v2  ;;  %v5087_v39 = vmul.f32 %v5086_v43, %v5041_v12 }
 0xa29   : > { %v5091_v48 = vrot.slane %v5088_v36, 6 }
 0xa2b   : > { %v5092_v29 = vsel %vm4780_vm11, %v5087_v39, %v5091_v48 }
 0xa2c   : > { %5094 = vst [vmem:[#allocation16] sm:$0xf] %v5092_v29 }
 0xa2d PF: > { %p7474_p3 = scmp.eq.s32.totalorder %s8194_s26, 1  ;;  %s9958_s16 = sld [smem:[#allocation33_spill]] }
 0xa2e   : > { %s8101_s29 = smov [#allocation16]  }
 0xa2f   : > { %s5104_s15 = sshll.u32 %s8101_s29, 4  ;;  %s5105_s15 = int_to_ptr.vmem [resolvable:$true] %s5104_s15 }
 0xa33   : > { %s5106_s12 = sshll.u32 %s9958_s16, 4  ;;  %s5107_s12 = int_to_ptr.hbm [resolvable:$true] %s5106_s12 }
 0xa34   : > { %7438 = dma.vmem_to_hbm [thread:$0]  (%p7474_p3), %s5105_s15, 64, %s5107_s12, [#allocation7]  }
 0xa35   : > { %8061 = dma.done.wait (%p7474_p3), [#allocation7], 64  }
 0xa36   : > { %8063 = vsyncadd (%p7474_p3), [#allocation7], 4294967232 }
 0xa37 PF: > { %s9959_s18 = sld [smem:[#allocation25_spill]]  ;;  %s9963_s21 = smov %s8070_s22 }
 0xa38   : > { %s9960_s3 = sld [smem:[#allocation23_spill]]  ;;  %s9965_s24 = smov %s8082_s25 }
 0xa39   : > { %s9961_s23 = sld [smem:[#allocation27_spill]] }
 0xa3a   : > { %s9962_s26 = sld [smem:[#allocation26_spill]] }
 0xa3d   : > { %s32_s0 = sadd.s32 1, %s9959_s18  }
 0xa3e   : > { %p29_p4 = scmp.ge.s32.totalorder %s32_s0, 4   ;;  %s9964_s22 = smov %s9960_s3 }
 0xa40   : > { %s9966_s25 = smov %s9962_s26  ;;  %31 = sbr.rel (!%p29_p4) target bundleno = 16 (0x10), region = 164 }
 0xa45   :  { %5120 = vsyncpa [#allocation6], 1 }
 0xa46   :  { %5122 = vsyncpa [#allocation6 + $0x1], 1 }
 0xa47   :  { %5123 = vsyncpa [#allocation9], 1 }
 0xa48   :  { %5124 = vsyncpa [#allocation7], 1 }
 0xa49   :  { %5126 = vsyncpa [#allocation7 + $0x1], 1 }

</bundles_post_ra>
